<compile_context>
chip_gen: v6e
topology: v6e:2x2x1
jax: 0.10.0
libtpu: 0.0.40
codegen_flags: <defaults>
</compile_context>

<pallas_src>
import functools

import numpy as np
import jax
import jax.numpy as jnp
from jax import lax
from jax.experimental import pallas as pl
from jax.experimental.pallas import tpu as pltpu

LN_EPS = 1e-5                       # torch.nn.LayerNorm default


# ---------------------------------------------------------------- helpers
def _layernorm(x, w, b):
    mu = jnp.mean(x, axis=-1, keepdims=True)
    var = jnp.mean(jnp.square(x - mu), axis=-1, keepdims=True)
    return (x - mu) * lax.rsqrt(var + LN_EPS) * w + b


_VMEM_CACHE = None


def _vmem_caps():
    """(vmem_limit_bytes, working-set budget), generation-aware.

    128 MiB parts (v5e/v6e) -> limit 96 MiB / budget 72 MiB; 64 MiB parts (v7x)
    -> limit 48 MiB / budget 36 MiB.  Conservative 64 MiB fallback if the query fails.
    """
    global _VMEM_CACHE
    if _VMEM_CACHE is None:
        cap = 64 * 1024 * 1024
        try:
            cap = int(getattr(pltpu.get_tpu_info(), "vmem_capacity_bytes", cap))
        except Exception:
            pass
        limit = min(cap * 3 // 4, cap - (8 << 20))
        budget = limit * 3 // 4
        _VMEM_CACHE = (int(limit), int(budget))
    return _VMEM_CACHE


def _divisor_tiles(L):
    cands = [t for t in range(8, L, 8) if L % t == 0]
    cands.append(L)
    return cands


def _pick_tile(L, per_row_vmem, fixed_vmem, per_row_stream, budget,
               target_stream=4 << 20):
    """Largest i-tile (divisor of L, multiple of 8 or == L) that (a) keeps the working
    set *including in-kernel temporaries* under the budget and (b) keeps the per-step
    HBM stream near the measured sweet spot (~1-4 MiB) so the grid retains enough
    steps for double buffering / megacore balance."""
    cands = _divisor_tiles(L)
    fit = [t for t in cands if fixed_vmem + t * per_row_vmem <= budget]
    if not fit:
        return min(cands)
    pref = [t for t in fit if t * per_row_stream <= target_stream]
    return max(pref) if pref else min(fit)


def _pick_cblk(D, L, budget, target_stream=4 << 20):
    cands = [c for c in range(1, D + 1) if D % c == 0]
    per_c = 20 * L * L          # bf16 l/r/tri pipeline buffers + f32 dot temps
    fit = [c for c in cands if c * per_c <= budget]
    if not fit:
        return 1
    pref = [c for c in fit if 6 * L * L * c <= target_stream]
    return max(pref) if pref else min(fit)


# ---------------------------------------------------------------- stage 1
def proj_kernel(x_ref, lnw_ref, lnb_ref, w5_ref, b5_ref,
                left_ref, right_ref, og_ref, *, right_channel_major):
    _, ti, L, D = x_ref.shape
    x = x_ref[0].reshape(ti * L, D)
    normed = _layernorm(x, lnw_ref[...], lnb_ref[...])
    # One fused (D, 5D) MXU matmul: [left | right | left_gate | right_gate | out_gate]
    proj = jnp.dot(normed, w5_ref[...], preferred_element_type=jnp.float32) + b5_ref[...]
    left = proj[:, 0 * D:1 * D] * jax.nn.sigmoid(proj[:, 2 * D:3 * D])
    right = proj[:, 1 * D:2 * D] * jax.nn.sigmoid(proj[:, 3 * D:4 * D])
    og = jax.nn.sigmoid(proj[:, 4 * D:5 * D])

    og_ref[0] = og.astype(og_ref.dtype).reshape(ti, L, D)
    # Channel-major (D, ti, L): lane-dense store and exactly the layout the triangular
    # matmul streams (contraction on the minor axis -> no per-step vxpose).
    left_ref[0] = left.astype(left_ref.dtype).T.reshape(D, ti, L)
    if right_channel_major:
        right_ref[0] = right.astype(right_ref.dtype).T.reshape(D, ti, L)
    else:
        right_ref[0] = right.astype(right_ref.dtype).reshape(ti, L, D)


# ------------------------------------------------- fused stage 2+3 (primary path)
def _epilogue(tri_f32, og_ref, x_ref, lnw_ref, lnb_ref, wo_ref, bo_ref, o_ref):
    D, ti, L = tri_f32.shape
    # channel-major -> row-major once per tile for the D-axis LayerNorm / out_proj.
    t = tri_f32.reshape(D, ti * L).T                          # (ti*L, D) f32
    gate = og_ref[0].reshape(ti * L, D).astype(jnp.float32)
    yn = _layernorm(t, lnw_ref[...], lnb_ref[...]) * gate
    out = jnp.dot(yn, wo_ref[...], preferred_element_type=jnp.float32) + bo_ref[...]
    out = out + x_ref[0].reshape(ti * L, D)
    o_ref[0] = out.reshape(ti, L, D)


def fused_outgoing_kernel(l_ref, r_ref, og_ref, x_ref, lnw_ref, lnb_ref,
                          wo_ref, bo_ref, o_ref, bt_ref):
    # r_ref holds the full right tensor (channel-major [d, j, k]) for this batch
    # element; swap its pair axes ONCE per batch element into scratch so every i-step
    # feeds the MXU a contraction-natural stationary operand.
    @pl.when(pl.program_id(1) == 0)
    def _():
        bt_ref[...] = jnp.swapaxes(r_ref[0], 1, 2)            # -> [d, k, j]

    a = l_ref[0]                                              # (D, ti, L)  [d, i, k]
    tri = lax.dot_general(a, bt_ref[...], (((2,), (1,)), ((0,), (0,))),
                          preferred_element_type=jnp.float32)  # (D, ti, L)  [d, i, j]
    _epilogue(tri, og_ref, x_ref, lnw_ref, lnb_ref, wo_ref, bo_ref, o_ref)


def fused_ingoing_kernel(l_ref, r_ref, og_ref, x_ref, lnw_ref, lnb_ref,
                         wo_ref, bo_ref, o_ref):
    # l_ref holds the full left tensor (channel-major [d, k, j]) for this batch
    # element — already contraction-natural, no transpose.  The small per-step rows
    # block of `right` is relayouted in-kernel (each element touched once overall).
    src = r_ref[0]                                            # (L, ti, D)  [k, i, d]
    L, ti, D = src.shape
    a = jnp.swapaxes(src, 1, 2).reshape(L, D * ti).T.reshape(D, ti, L)   # [d, i, k]
    tri = lax.dot_general(a, l_ref[0], (((2,), (1,)), ((0,), (0,))),
                          preferred_element_type=jnp.float32)  # (D, ti, L)  [d, i, j]
    _epilogue(tri, og_ref, x_ref, lnw_ref, lnb_ref, wo_ref, bo_ref, o_ref)


# ------------------------------------------------- split fallback (very large L)
def split_tri_kernel(l_ref, r_ref, o_ref, *, direction):
    l = l_ref[0]                                              # (C, L, L) bf16 [c,p,q]
    r = r_ref[0]
    if direction == "outgoing":
        # tri[c,i,j] = sum_k l[c,i,k] * r[c,j,k]
        o = lax.dot_general(l, r, (((2,), (2,)), ((0,), (0,))),
                            preferred_element_type=jnp.float32)
    else:
        # tri[c,i,j] = sum_k r[c,k,i] * l[c,k,j]
        o = lax.dot_general(r, l, (((1,), (1,)), ((0,), (0,))),
                            preferred_element_type=jnp.float32)
    o_ref[0] = o.astype(o_ref.dtype)                          # bf16 tri round trip


def split_out_kernel(tri_ref, og_ref, x_ref, lnw_ref, lnb_ref, wo_ref, bo_ref, o_ref):
    tri = tri_ref[0].astype(jnp.float32)                      # (D, ti, L)
    _epilogue(tri, og_ref, x_ref, lnw_ref, lnb_ref, wo_ref, bo_ref, o_ref)


# ---------------------------------------------------------------- wrapper
@functools.partial(jax.jit, static_argnames=("direction", "force_split"))
def pairwise_mixer_forward(pairwise_states, params, direction="outgoing",
                           force_split=False):
    assert direction in ("outgoing", "ingoing")
    B, L, L2, D = pairwise_states.shape
    assert L == L2
    x = pairwise_states

    vmem_limit, budget = _vmem_caps()

    def cparams(sem):
        return pltpu.CompilerParams(dimension_semantics=sem,
                                    vmem_limit_bytes=vmem_limit)

    # Fuse the five projection weights into one (D, 5D) matrix / (1, 5D) bias.
    w5 = jnp.concatenate([params["wl"], params["wr"], params["wlg"],
                          params["wrg"], params["wog"]], axis=1)
    b5 = jnp.concatenate([params["bl"], params["br"], params["blg"],
                          params["brg"], params["bog"]], axis=1)

    # -------- decide: fused path (tri never hits HBM) vs split fallback ------------
    full_bytes = 2 * D * L * L                    # one bf16 (D, L, L) operand
    fused_fixed = (3 if direction == "outgoing" else 2) * full_bytes \
        + 8 * D * D + (1 << 20)
    per_row_fused = 56 * L * D                    # pipeline buffers + f32 temps / row
    min_tile = min(_divisor_tiles(L))
    use_fused = (not force_split) and (fused_fixed + min_tile * per_row_fused <= budget)

    # fused-ingoing streams `right` row-major; all other consumers want channel-major.
    right_channel_major = (direction == "outgoing") or (not use_fused)

    # -------- stage 1: LayerNorm + fused projections + sigmoid gating --------------
    # per-row accounting includes normed/proj(5D-wide)/gated slices/transposed copies.
    ti1 = _pick_tile(L, per_row_vmem=72 * L * D,
                     fixed_vmem=40 * D * D + (1 << 20),
                     per_row_stream=10 * L * D, budget=budget)
    n1 = L // ti1

    row_blk1 = pl.BlockSpec((1, ti1, L, D), lambda b, i: (b, i, 0, 0))
    cm_blk1 = pl.BlockSpec((1, D, ti1, L), lambda b, i: (b, 0, i, 0))
    vec_d1 = pl.BlockSpec((1, D), lambda b, i: (0, 0))
    vec_5d = pl.BlockSpec((1, 5 * D), lambda b, i: (0, 0))
    mat_5d = pl.BlockSpec((D, 5 * D), lambda b, i: (0, 0))

    right_shape = (B, D, L, L) if right_channel_major else (B, L, L, D)
    right_spec = cm_blk1 if right_channel_major else row_blk1

    left_cm, right_st, og_st = pl.pallas_call(
        functools.partial(proj_kernel, right_channel_major=right_channel_major),
        out_shape=(jax.ShapeDtypeStruct((B, D, L, L), jnp.bfloat16),
                   jax.ShapeDtypeStruct(right_shape, jnp.bfloat16),
                   jax.ShapeDtypeStruct((B, L, L, D), jnp.bfloat16)),
        grid=(B, n1),
        in_specs=[row_blk1, vec_d1, vec_d1, mat_5d, vec_5d],
        out_specs=(cm_blk1, right_spec, row_blk1),
        compiler_params=cparams(("parallel", "parallel")),
    )(x, params["ln1_w"], params["ln1_b"], w5, b5)

    # -------- fused stage 2+3 -------------------------------------------------------
    if use_fused:
        ti2 = _pick_tile(L, per_row_vmem=per_row_fused, fixed_vmem=fused_fixed,
                         per_row_stream=12 * L * D, budget=budget)
        n2 = L // ti2

        row_blk2 = pl.BlockSpec((1, ti2, L, D), lambda b, i: (b, i, 0, 0))
        full_cm = pl.BlockSpec((1, D, L, L), lambda b, i: (b, 0, 0, 0))
        vec_d2 = pl.BlockSpec((1, D), lambda b, i: (0, 0))
        mat_d2 = pl.BlockSpec((D, D), lambda b, i: (0, 0))

        common = dict(out_shape=jax.ShapeDtypeStruct((B, L, L, D), jnp.float32),
                      grid=(B, n2), out_specs=row_blk2)
        args = (left_cm, right_st, og_st, x,
                params["ln2_w"], params["ln2_b"], params["wo"], params["bo"])

        if direction == "outgoing":
            rows_cm = pl.BlockSpec((1, D, ti2, L), lambda b, i: (b, 0, i, 0))
            return pl.pallas_call(
                fused_outgoing_kernel,
                in_specs=[rows_cm, full_cm, row_blk2, row_blk2,
                          vec_d2, vec_d2, mat_d2, vec_d2],
                scratch_shapes=[pltpu.VMEM((D, L, L), jnp.bfloat16)],
                # i-axis "arbitrary": scratch is (re)built at i==0 of every batch elem.
                compiler_params=cparams(("parallel", "arbitrary")),
                **common,
            )(*args)

        rows_rm = pl.BlockSpec((1, L, ti2, D), lambda b, i: (b, 0, i, 0))
        return pl.pallas_call(
            fused_ingoing_kernel,
            in_specs=[full_cm, rows_rm, row_blk2, row_blk2,
                      vec_d2, vec_d2, mat_d2, vec_d2],
            compiler_params=cparams(("parallel", "parallel")),
            **common,
        )(*args)

    # -------- split fallback: channel-blocked tri matmul, bf16 round trip ----------
    # TODO(synk): for extreme L a k-tiled accumulation variant would be the next step.
    c_blk = _pick_cblk(D, L, budget)
    nc = D // c_blk
    cblk_spec = pl.BlockSpec((1, c_blk, L, L), lambda b, c: (b, c, 0, 0))

    tri_cm = pl.pallas_call(
        functools.partial(split_tri_kernel, direction=direction),
        out_shape=jax.ShapeDtypeStruct((B, D, L, L), jnp.bfloat16),
        grid=(B, nc),
        in_specs=[cblk_spec, cblk_spec],
        out_specs=cblk_spec,
        compiler_params=cparams(("parallel", "parallel")),
    )(left_cm, right_st)

    ti3 = _pick_tile(L, per_row_vmem=44 * L * D,
                     fixed_vmem=8 * D * D + (1 << 20),
                     per_row_stream=12 * L * D, budget=budget)
    n3 = L // ti3
    row_blk3 = pl.BlockSpec((1, ti3, L, D), lambda b, i: (b, i, 0, 0))
    tri_blk3 = pl.BlockSpec((1, D, ti3, L), lambda b, i: (b, 0, i, 0))
    vec_d3 = pl.BlockSpec((1, D), lambda b, i: (0, 0))
    mat_d3 = pl.BlockSpec((D, D), lambda b, i: (0, 0))

    return pl.pallas_call(
        split_out_kernel,
        out_shape=jax.ShapeDtypeStruct((B, L, L, D), jnp.float32),
        grid=(B, n3),
        in_specs=[tri_blk3, row_blk3, row_blk3, vec_d3, vec_d3, mat_d3, vec_d3],
        out_specs=row_blk3,
        compiler_params=cparams(("parallel", "parallel")),
    )(tri_cm, og_st, x, params["ln2_w"], params["ln2_b"], params["wo"], params["bo"])


# ---------------------------------------------------------------- pure-JAX reference
def reference_forward(x, p, direction="outgoing"):
    normed = _layernorm(x, p["ln1_w"][0], p["ln1_b"][0])
    left = normed @ p["wl"] + p["bl"][0]
    right = normed @ p["wr"] + p["br"][0]
    lg = jax.nn.sigmoid(normed @ p["wlg"] + p["blg"][0])
    rg = jax.nn.sigmoid(normed @ p["wrg"] + p["brg"][0])
    og = jax.nn.sigmoid(normed @ p["wog"] + p["bog"][0])
    left = left * lg
    right = right * rg
    if direction == "outgoing":
        tri = jnp.einsum("bikd,bjkd->bijd", left, right)
    else:
        tri = jnp.einsum("bkjd,bkid->bijd", left, right)
    out = _layernorm(tri, p["ln2_w"][0], p["ln2_b"][0]) * og
    out = out @ p["wo"] + p["bo"][0]
    return out + x


if __name__ == "__main__":
    B, L, D = 2, 8, 32   # batch, sequence length, pairwise_size
    key = jax.random.PRNGKey(0)
    ks = jax.random.split(key, 20)

    def lin_p(kw, kb):
        # weight stored as [in, out] (pre-transposed nn.Linear weight)
        return (0.05 * jax.random.normal(kw, (D, D), jnp.float32),
                0.02 * jax.random.normal(kb, (1, D), jnp.float32))

    wl, bl = lin_p(ks[0], ks[1])
    wr, br = lin_p(ks[2], ks[3])
    wlg, blg = lin_p(ks[4], ks[5])
    wrg, brg = lin_p(ks[6], ks[7])
    wog, bog = lin_p(ks[8], ks[9])
    wo, bo = lin_p(ks[10], ks[11])

    params = dict(
        ln1_w=1.0 + 0.1 * jax.random.normal(ks[12], (1, D), jnp.float32),
        ln1_b=0.02 * jax.random.normal(ks[13], (1, D), jnp.float32),
        ln2_w=1.0 + 0.1 * jax.random.normal(ks[14], (1, D), jnp.float32),
        ln2_b=0.02 * jax.random.normal(ks[15], (1, D), jnp.float32),
        wl=wl, bl=bl, wr=wr, br=br,
        wlg=wlg, blg=blg, wrg=wrg, brg=brg,
        wog=wog, bog=bog, wo=wo, bo=bo,
    )

    pairwise_states = jax.random.normal(ks[16], (B, L, L, D), jnp.float32)

    for direction in ("outgoing", "ingoing"):
        ref = reference_forward(pairwise_states, params, direction=direction)
        for force_split in (False, True):   # exercise both fused and fallback paths
            out = pairwise_mixer_forward(pairwise_states, params,
                                         direction=direction, force_split=force_split)
            out = jax.block_until_ready(out)
            np.testing.assert_allclose(np.asarray(out), np.asarray(ref),
                                       rtol=2e-2, atol=2e-2)

    print("KERNEL_OK")
</pallas_src>

<mosaic_0001>
module attributes {stable_mosaic.version = 11 : i64} {
  func.func @proj_kernel(%arg0: i32, %arg1: i32, %arg2: memref<1x8x8x32xf32, #tpu.memory_space<vmem>>, %arg3: memref<1x32xf32, #tpu.memory_space<vmem>>, %arg4: memref<1x32xf32, #tpu.memory_space<vmem>>, %arg5: memref<32x160xf32, #tpu.memory_space<vmem>>, %arg6: memref<1x160xf32, #tpu.memory_space<vmem>>, %arg7: memref<1x32x8x8xbf16, #tpu.memory_space<vmem>>, %arg8: memref<1x32x8x8xbf16, #tpu.memory_space<vmem>>, %arg9: memref<1x8x8x32xbf16, #tpu.memory_space<vmem>>) attributes {dimension_semantics = [#tpu.dimension_semantics<parallel>, #tpu.dimension_semantics<parallel>], iteration_bounds = array<i64: 2, 1>, scalar_prefetch = 0 : i64, scratch_operands = 0 : i64, tpu.core_type = #tpu.core_type<tc>, window_params = [{transform_indices = @transform_0, window_bounds = array<i64: 1, 8, 8, 32>}, {pipeline_mode = #tpu.pipeline_mode<synchronous>, transform_indices = @transform_1, window_bounds = array<i64: 1, 32>}, {pipeline_mode = #tpu.pipeline_mode<synchronous>, transform_indices = @transform_2, window_bounds = array<i64: 1, 32>}, {pipeline_mode = #tpu.pipeline_mode<synchronous>, transform_indices = @transform_3, window_bounds = array<i64: 32, 160>}, {pipeline_mode = #tpu.pipeline_mode<synchronous>, transform_indices = @transform_4, window_bounds = array<i64: 1, 160>}, {transform_indices = @transform_5, window_bounds = array<i64: 1, 32, 8, 8>}, {transform_indices = @transform_6, window_bounds = array<i64: 1, 32, 8, 8>}, {transform_indices = @transform_7, window_bounds = array<i64: 1, 8, 8, 32>}]} {
    %c0 = arith.constant 0 : index
    %c0_0 = arith.constant 0 : index
    %c0_1 = arith.constant 0 : index
    %c0_2 = arith.constant 0 : index
    %0 = vector.load %arg2[%c0, %c0_0, %c0_1, %c0_2] : memref<1x8x8x32xf32, #tpu.memory_space<vmem>>, vector<1x8x8x32xf32>
    %1 = vector.shape_cast %0 : vector<1x8x8x32xf32> to vector<8x8x32xf32>
    %2 = vector.shape_cast %1 : vector<8x8x32xf32> to vector<64x32xf32>
    %c0_3 = arith.constant 0 : index
    %c0_4 = arith.constant 0 : index
    %3 = vector.load %arg3[%c0_3, %c0_4] : memref<1x32xf32, #tpu.memory_space<vmem>>, vector<1x32xf32>
    %c0_5 = arith.constant 0 : index
    %c0_6 = arith.constant 0 : index
    %4 = vector.load %arg4[%c0_5, %c0_6] : memref<1x32xf32, #tpu.memory_space<vmem>>, vector<1x32xf32>
    %cst = arith.constant dense<0.000000e+00> : vector<64xf32>
    %5 = vector.multi_reduction <add>, %2, %cst [1] : vector<64x32xf32> to vector<64xf32>
    %6 = vector.shape_cast %5 : vector<64xf32> to vector<64x1xf32>
    %cst_7 = arith.constant 3.200000e+01 : f32
    %7 = vector.broadcast %cst_7 : f32 to vector<64x1xf32>
    %8 = arith.divf %6, %7 : vector<64x1xf32>
    %9 = vector.broadcast %8 : vector<64x1xf32> to vector<64x32xf32>
    %10 = arith.subf %2, %9 : vector<64x32xf32>
    %11 = arith.mulf %10, %10 : vector<64x32xf32>
    %cst_8 = arith.constant dense<0.000000e+00> : vector<64xf32>
    %12 = vector.multi_reduction <add>, %11, %cst_8 [1] : vector<64x32xf32> to vector<64xf32>
    %13 = vector.shape_cast %12 : vector<64xf32> to vector<64x1xf32>
    %cst_9 = arith.constant 3.200000e+01 : f32
    %14 = vector.broadcast %cst_9 : f32 to vector<64x1xf32>
    %15 = arith.divf %13, %14 : vector<64x1xf32>
    %16 = vector.broadcast %8 : vector<64x1xf32> to vector<64x32xf32>
    %17 = arith.subf %2, %16 : vector<64x32xf32>
    %cst_10 = arith.constant 9.99999974E-6 : f32
    %18 = vector.broadcast %cst_10 : f32 to vector<64x1xf32>
    %19 = arith.addf %15, %18 : vector<64x1xf32>
    %20 = math.rsqrt %19 : vector<64x1xf32>
    %21 = vector.broadcast %20 : vector<64x1xf32> to vector<64x32xf32>
    %22 = arith.mulf %17, %21 : vector<64x32xf32>
    %23 = vector.broadcast %3 : vector<1x32xf32> to vector<64x32xf32>
    %24 = arith.mulf %22, %23 : vector<64x32xf32>
    %25 = vector.broadcast %4 : vector<1x32xf32> to vector<64x32xf32>
    %26 = arith.addf %24, %25 : vector<64x32xf32>
    %c0_11 = arith.constant 0 : index
    %c0_12 = arith.constant 0 : index
    %27 = vector.load %arg5[%c0_11, %c0_12] : memref<32x160xf32, #tpu.memory_space<vmem>>, vector<32x160xf32>
    %cst_13 = arith.constant dense<0.000000e+00> : vector<64x160xf32>
    %28 = tpu.matmul %26, %27, %cst_13 {dimension_numbers = #tpu.dot_dimension_numbers<[1], [0], [0], [1], [0, 0, 1, 1], [], []>} : vector<64x32xf32>, vector<32x160xf32>, vector<64x160xf32> -> vector<64x160xf32>
    %c0_14 = arith.constant 0 : index
    %c0_15 = arith.constant 0 : index
    %29 = vector.load %arg6[%c0_14, %c0_15] : memref<1x160xf32, #tpu.memory_space<vmem>>, vector<1x160xf32>
    %30 = vector.broadcast %29 : vector<1x160xf32> to vector<64x160xf32>
    %31 = arith.addf %28, %30 : vector<64x160xf32>
    %32 = vector.extract_strided_slice %31 {offsets = [0, 0], sizes = [64, 32], strides = [1, 1]} : vector<64x160xf32> to vector<64x32xf32>
    %33 = vector.extract_strided_slice %31 {offsets = [0, 64], sizes = [64, 32], strides = [1, 1]} : vector<64x160xf32> to vector<64x32xf32>
    %34 = arith.negf %33 : vector<64x32xf32>
    %35 = math.exp %34 : vector<64x32xf32>
    %cst_16 = arith.constant 1.000000e+00 : f32
    %36 = vector.broadcast %cst_16 : f32 to vector<64x32xf32>
    %37 = arith.addf %36, %35 : vector<64x32xf32>
    %38 = arith.divf %36, %37 : vector<64x32xf32>
    %39 = arith.mulf %32, %38 : vector<64x32xf32>
    %40 = vector.extract_strided_slice %31 {offsets = [0, 32], sizes = [64, 32], strides = [1, 1]} : vector<64x160xf32> to vector<64x32xf32>
    %41 = vector.extract_strided_slice %31 {offsets = [0, 96], sizes = [64, 32], strides = [1, 1]} : vector<64x160xf32> to vector<64x32xf32>
    %42 = arith.negf %41 : vector<64x32xf32>
    %43 = math.exp %42 : vector<64x32xf32>
    %cst_17 = arith.constant 1.000000e+00 : f32
    %44 = vector.broadcast %cst_17 : f32 to vector<64x32xf32>
    %45 = arith.addf %44, %43 : vector<64x32xf32>
    %46 = arith.divf %44, %45 : vector<64x32xf32>
    %47 = arith.mulf %40, %46 : vector<64x32xf32>
    %48 = vector.extract_strided_slice %31 {offsets = [0, 128], sizes = [64, 32], strides = [1, 1]} : vector<64x160xf32> to vector<64x32xf32>
    %49 = arith.negf %48 : vector<64x32xf32>
    %50 = math.exp %49 : vector<64x32xf32>
    %cst_18 = arith.constant 1.000000e+00 : f32
    %51 = vector.broadcast %cst_18 : f32 to vector<64x32xf32>
    %52 = arith.addf %51, %50 : vector<64x32xf32>
    %53 = arith.divf %51, %52 : vector<64x32xf32>
    %54 = arith.truncf %53 : vector<64x32xf32> to vector<64x32xbf16>
    %55 = vector.shape_cast %54 : vector<64x32xbf16> to vector<8x8x32xbf16>
    %c0_19 = arith.constant 0 : index
    %c0_20 = arith.constant 0 : index
    %c0_21 = arith.constant 0 : index
    %c0_22 = arith.constant 0 : index
    %56 = vector.load %arg9[%c0_19, %c0_20, %c0_21, %c0_22] : memref<1x8x8x32xbf16, #tpu.memory_space<vmem>>, vector<1x8x8x32xbf16>
    %57 = vector.shape_cast %56 : vector<1x8x8x32xbf16> to vector<8x8x32xbf16>
    %58 = vector.shape_cast %55 : vector<8x8x32xbf16> to vector<1x8x8x32xbf16>
    tpu.vector_store %arg9[%c0_19, %c0_20, %c0_21, %c0_22], %58 {strides = array<i32>} : memref<1x8x8x32xbf16, #tpu.memory_space<vmem>>, vector<1x8x8x32xbf16>,
    %59 = arith.truncf %39 : vector<64x32xf32> to vector<64x32xbf16>
    %60 = tpu.transpose %59, [1, 0] : vector<64x32xbf16> -> vector<32x64xbf16>
    %61 = vector.shape_cast %60 : vector<32x64xbf16> to vector<32x8x8xbf16>
    %c0_23 = arith.constant 0 : index
    %c0_24 = arith.constant 0 : index
    %c0_25 = arith.constant 0 : index
    %c0_26 = arith.constant 0 : index
    %62 = vector.load %arg7[%c0_23, %c0_24, %c0_25, %c0_26] : memref<1x32x8x8xbf16, #tpu.memory_space<vmem>>, vector<1x32x8x8xbf16>
    %63 = vector.shape_cast %62 : vector<1x32x8x8xbf16> to vector<32x8x8xbf16>
    %64 = vector.shape_cast %61 : vector<32x8x8xbf16> to vector<1x32x8x8xbf16>
    tpu.vector_store %arg7[%c0_23, %c0_24, %c0_25, %c0_26], %64 {strides = array<i32>} : memref<1x32x8x8xbf16, #tpu.memory_space<vmem>>, vector<1x32x8x8xbf16>,
    %65 = arith.truncf %47 : vector<64x32xf32> to vector<64x32xbf16>
    %66 = tpu.transpose %65, [1, 0] : vector<64x32xbf16> -> vector<32x64xbf16>
    %67 = vector.shape_cast %66 : vector<32x64xbf16> to vector<32x8x8xbf16>
    %c0_27 = arith.constant 0 : index
    %c0_28 = arith.constant 0 : index
    %c0_29 = arith.constant 0 : index
    %c0_30 = arith.constant 0 : index
    %68 = vector.load %arg8[%c0_27, %c0_28, %c0_29, %c0_30] : memref<1x32x8x8xbf16, #tpu.memory_space<vmem>>, vector<1x32x8x8xbf16>
    %69 = vector.shape_cast %68 : vector<1x32x8x8xbf16> to vector<32x8x8xbf16>
    %70 = vector.shape_cast %67 : vector<32x8x8xbf16> to vector<1x32x8x8xbf16>
    tpu.vector_store %arg8[%c0_27, %c0_28, %c0_29, %c0_30], %70 {strides = array<i32>} : memref<1x32x8x8xbf16, #tpu.memory_space<vmem>>, vector<1x32x8x8xbf16>,
    return
  }
  func.func @transform_0(%arg0: i32, %arg1: i32) -> (i32, i32, i32, i32) {
    %c0_i32 = arith.constant 0 : i32
    %c0_i32_0 = arith.constant 0 : i32
    %c0_i32_1 = arith.constant 0 : i32
    return %arg0, %arg1, %c0_i32, %c0_i32_0 : i32, i32, i32, i32
  }
  func.func @transform_1(%arg0: i32, %arg1: i32) -> (i32, i32) {
    %c0_i32 = arith.constant 0 : i32
    %c0_i32_0 = arith.constant 0 : i32
    %c0_i32_1 = arith.constant 0 : i32
    return %c0_i32, %c0_i32_0 : i32, i32
  }
  func.func @transform_2(%arg0: i32, %arg1: i32) -> (i32, i32) {
    %c0_i32 = arith.constant 0 : i32
    %c0_i32_0 = arith.constant 0 : i32
    %c0_i32_1 = arith.constant 0 : i32
    return %c0_i32, %c0_i32_0 : i32, i32
  }
  func.func @transform_3(%arg0: i32, %arg1: i32) -> (i32, i32) {
    %c0_i32 = arith.constant 0 : i32
    %c0_i32_0 = arith.constant 0 : i32
    %c0_i32_1 = arith.constant 0 : i32
    return %c0_i32, %c0_i32_0 : i32, i32
  }
  func.func @transform_4(%arg0: i32, %arg1: i32) -> (i32, i32) {
    %c0_i32 = arith.constant 0 : i32
    %c0_i32_0 = arith.constant 0 : i32
    %c0_i32_1 = arith.constant 0 : i32
    return %c0_i32, %c0_i32_0 : i32, i32
  }
  func.func @transform_5(%arg0: i32, %arg1: i32) -> (i32, i32, i32, i32) {
    %c0_i32 = arith.constant 0 : i32
    %c0_i32_0 = arith.constant 0 : i32
    %c0_i32_1 = arith.constant 0 : i32
    return %arg0, %c0_i32, %arg1, %c0_i32_0 : i32, i32, i32, i32
  }
  func.func @transform_6(%arg0: i32, %arg1: i32) -> (i32, i32, i32, i32) {
    %c0_i32 = arith.constant 0 : i32
    %c0_i32_0 = arith.constant 0 : i32
    %c0_i32_1 = arith.constant 0 : i32
    return %arg0, %c0_i32, %arg1, %c0_i32_0 : i32, i32, i32, i32
  }
  func.func @transform_7(%arg0: i32, %arg1: i32) -> (i32, i32, i32, i32) {
    %c0_i32 = arith.constant 0 : i32
    %c0_i32_0 = arith.constant 0 : i32
    %c0_i32_1 = arith.constant 0 : i32
    return %arg0, %arg1, %c0_i32, %c0_i32_0 : i32, i32, i32, i32
  }
}

module attributes {stable_mosaic.version = 11 : i64} {
  func.func @fused_outgoing_kernel(%arg0: i32, %arg1: i32, %arg2: memref<1x32x8x8xbf16, #tpu.memory_space<vmem>>, %arg3: memref<1x32x8x8xbf16, #tpu.memory_space<vmem>>, %arg4: memref<1x8x8x32xbf16, #tpu.memory_space<vmem>>, %arg5: memref<1x8x8x32xf32, #tpu.memory_space<vmem>>, %arg6: memref<1x32xf32, #tpu.memory_space<vmem>>, %arg7: memref<1x32xf32, #tpu.memory_space<vmem>>, %arg8: memref<32x32xf32, #tpu.memory_space<vmem>>, %arg9: memref<1x32xf32, #tpu.memory_space<vmem>>, %arg10: memref<1x8x8x32xf32, #tpu.memory_space<vmem>>, %arg11: memref<32x8x8xbf16, #tpu.memory_space<vmem>>) attributes {dimension_semantics = [#tpu.dimension_semantics<parallel>, #tpu.dimension_semantics<arbitrary>], iteration_bounds = array<i64: 2, 1>, scalar_prefetch = 0 : i64, scratch_operands = 1 : i64, tpu.core_type = #tpu.core_type<tc>, window_params = [{transform_indices = @transform_0, window_bounds = array<i64: 1, 32, 8, 8>}, {transform_indices = @transform_1, window_bounds = array<i64: 1, 32, 8, 8>}, {transform_indices = @transform_2, window_bounds = array<i64: 1, 8, 8, 32>}, {transform_indices = @transform_3, window_bounds = array<i64: 1, 8, 8, 32>}, {pipeline_mode = #tpu.pipeline_mode<synchronous>, transform_indices = @transform_4, window_bounds = array<i64: 1, 32>}, {pipeline_mode = #tpu.pipeline_mode<synchronous>, transform_indices = @transform_5, window_bounds = array<i64: 1, 32>}, {pipeline_mode = #tpu.pipeline_mode<synchronous>, transform_indices = @transform_6, window_bounds = array<i64: 32, 32>}, {pipeline_mode = #tpu.pipeline_mode<synchronous>, transform_indices = @transform_7, window_bounds = array<i64: 1, 32>}, {transform_indices = @transform_8, window_bounds = array<i64: 1, 8, 8, 32>}]} {
    %c0_i32 = arith.constant 0 : i32
    %0 = arith.cmpi eq, %arg1, %c0_i32 : i32
    %1 = arith.extui %0 : i1 to i32
    %c0_i32_0 = arith.constant 0 : i32
    %2 = arith.cmpi ne, %1, %c0_i32_0 : i32
    scf.if %2 {
      %c0_33 = arith.constant 0 : index
      %c0_34 = arith.constant 0 : index
      %c0_35 = arith.constant 0 : index
      %c0_36 = arith.constant 0 : index
      %51 = vector.load %arg3[%c0_33, %c0_34, %c0_35, %c0_36] : memref<1x32x8x8xbf16, #tpu.memory_space<vmem>>, vector<1x32x8x8xbf16>
      %52 = vector.shape_cast %51 : vector<1x32x8x8xbf16> to vector<32x8x8xbf16>
      %53 = tpu.transpose %52, [0, 2, 1] : vector<32x8x8xbf16> -> vector<32x8x8xbf16>
      %c0_37 = arith.constant 0 : index
      %c0_38 = arith.constant 0 : index
      %c0_39 = arith.constant 0 : index
      %54 = vector.load %arg11[%c0_37, %c0_38, %c0_39] : memref<32x8x8xbf16, #tpu.memory_space<vmem>>, vector<32x8x8xbf16>
      tpu.vector_store %arg11[%c0_37, %c0_38, %c0_39], %53 {strides = array<i32>} : memref<32x8x8xbf16, #tpu.memory_space<vmem>>, vector<32x8x8xbf16>,
    } else {
    }
    %c0 = arith.constant 0 : index
    %c0_1 = arith.constant 0 : index
    %c0_2 = arith.constant 0 : index
    %c0_3 = arith.constant 0 : index
    %3 = vector.load %arg2[%c0, %c0_1, %c0_2, %c0_3] : memref<1x32x8x8xbf16, #tpu.memory_space<vmem>>, vector<1x32x8x8xbf16>
    %4 = vector.shape_cast %3 : vector<1x32x8x8xbf16> to vector<32x8x8xbf16>
    %c0_4 = arith.constant 0 : index
    %c0_5 = arith.constant 0 : index
    %c0_6 = arith.constant 0 : index
    %5 = vector.load %arg11[%c0_4, %c0_5, %c0_6] : memref<32x8x8xbf16, #tpu.memory_space<vmem>>, vector<32x8x8xbf16>
    %cst = arith.constant dense<0.000000e+00> : vector<32x8x8xf32>
    %6 = tpu.matmul %4, %5, %cst {dimension_numbers = #tpu.dot_dimension_numbers<[2], [1], [1], [2], [0, 0, 0, 1, 1, 2], [0], [0]>} : vector<32x8x8xbf16>, vector<32x8x8xbf16>, vector<32x8x8xf32> -> vector<32x8x8xf32>
    %7 = vector.shape_cast %6 : vector<32x8x8xf32> to vector<32x64xf32>
    %8 = tpu.transpose %7, [1, 0] : vector<32x64xf32> -> vector<64x32xf32>
    %c0_7 = arith.constant 0 : index
    %c0_8 = arith.constant 0 : index
    %c0_9 = arith.constant 0 : index
    %c0_10 = arith.constant 0 : index
    %9 = vector.load %arg4[%c0_7, %c0_8, %c0_9, %c0_10] : memref<1x8x8x32xbf16, #tpu.memory_space<vmem>>, vector<1x8x8x32xbf16>
    %10 = vector.shape_cast %9 : vector<1x8x8x32xbf16> to vector<8x8x32xbf16>
    %11 = vector.shape_cast %10 : vector<8x8x32xbf16> to vector<64x32xbf16>
    %12 = arith.extf %11 : vector<64x32xbf16> to vector<64x32xf32>
    %c0_11 = arith.constant 0 : index
    %c0_12 = arith.constant 0 : index
    %13 = vector.load %arg6[%c0_11, %c0_12] : memref<1x32xf32, #tpu.memory_space<vmem>>, vector<1x32xf32>
    %c0_13 = arith.constant 0 : index
    %c0_14 = arith.constant 0 : index
    %14 = vector.load %arg7[%c0_13, %c0_14] : memref<1x32xf32, #tpu.memory_space<vmem>>, vector<1x32xf32>
    %cst_15 = arith.constant dense<0.000000e+00> : vector<64xf32>
    %15 = vector.multi_reduction <add>, %8, %cst_15 [1] : vector<64x32xf32> to vector<64xf32>
    %16 = vector.shape_cast %15 : vector<64xf32> to vector<64x1xf32>
    %cst_16 = arith.constant 3.200000e+01 : f32
    %17 = vector.broadcast %cst_16 : f32 to vector<64x1xf32>
    %18 = arith.divf %16, %17 : vector<64x1xf32>
    %19 = vector.broadcast %18 : vector<64x1xf32> to vector<64x32xf32>
    %20 = arith.subf %8, %19 : vector<64x32xf32>
    %21 = arith.mulf %20, %20 : vector<64x32xf32>
    %cst_17 = arith.constant dense<0.000000e+00> : vector<64xf32>
    %22 = vector.multi_reduction <add>, %21, %cst_17 [1] : vector<64x32xf32> to vector<64xf32>
    %23 = vector.shape_cast %22 : vector<64xf32> to vector<64x1xf32>
    %cst_18 = arith.constant 3.200000e+01 : f32
    %24 = vector.broadcast %cst_18 : f32 to vector<64x1xf32>
    %25 = arith.divf %23, %24 : vector<64x1xf32>
    %26 = vector.broadcast %18 : vector<64x1xf32> to vector<64x32xf32>
    %27 = arith.subf %8, %26 : vector<64x32xf32>
    %cst_19 = arith.constant 9.99999974E-6 : f32
    %28 = vector.broadcast %cst_19 : f32 to vector<64x1xf32>
    %29 = arith.addf %25, %28 : vector<64x1xf32>
    %30 = math.rsqrt %29 : vector<64x1xf32>
    %31 = vector.broadcast %30 : vector<64x1xf32> to vector<64x32xf32>
    %32 = arith.mulf %27, %31 : vector<64x32xf32>
    %33 = vector.broadcast %13 : vector<1x32xf32> to vector<64x32xf32>
    %34 = arith.mulf %32, %33 : vector<64x32xf32>
    %35 = vector.broadcast %14 : vector<1x32xf32> to vector<64x32xf32>
    %36 = arith.addf %34, %35 : vector<64x32xf32>
    %37 = arith.mulf %36, %12 : vector<64x32xf32>
    %c0_20 = arith.constant 0 : index
    %c0_21 = arith.constant 0 : index
    %38 = vector.load %arg8[%c0_20, %c0_21] : memref<32x32xf32, #tpu.memory_space<vmem>>, vector<32x32xf32>
    %cst_22 = arith.constant dense<0.000000e+00> : vector<64x32xf32>
    %39 = tpu.matmul %37, %38, %cst_22 {dimension_numbers = #tpu.dot_dimension_numbers<[1], [0], [0], [1], [0, 0, 1, 1], [], []>} : vector<64x32xf32>, vector<32x32xf32>, vector<64x32xf32> -> vector<64x32xf32>
    %c0_23 = arith.constant 0 : index
    %c0_24 = arith.constant 0 : index
    %40 = vector.load %arg9[%c0_23, %c0_24] : memref<1x32xf32, #tpu.memory_space<vmem>>, vector<1x32xf32>
    %41 = vector.broadcast %40 : vector<1x32xf32> to vector<64x32xf32>
    %42 = arith.addf %39, %41 : vector<64x32xf32>
    %c0_25 = arith.constant 0 : index
    %c0_26 = arith.constant 0 : index
    %c0_27 = arith.constant 0 : index
    %c0_28 = arith.constant 0 : index
    %43 = vector.load %arg5[%c0_25, %c0_26, %c0_27, %c0_28] : memref<1x8x8x32xf32, #tpu.memory_space<vmem>>, vector<1x8x8x32xf32>
    %44 = vector.shape_cast %43 : vector<1x8x8x32xf32> to vector<8x8x32xf32>
    %45 = vector.shape_cast %44 : vector<8x8x32xf32> to vector<64x32xf32>
    %46 = arith.addf %42, %45 : vector<64x32xf32>
    %47 = vector.shape_cast %46 : vector<64x32xf32> to vector<8x8x32xf32>
    %c0_29 = arith.constant 0 : index
    %c0_30 = arith.constant 0 : index
    %c0_31 = arith.constant 0 : index
    %c0_32 = arith.constant 0 : index
    %48 = vector.load %arg10[%c0_29, %c0_30, %c0_31, %c0_32] : memref<1x8x8x32xf32, #tpu.memory_space<vmem>>, vector<1x8x8x32xf32>
    %49 = vector.shape_cast %48 : vector<1x8x8x32xf32> to vector<8x8x32xf32>
    %50 = vector.shape_cast %47 : vector<8x8x32xf32> to vector<1x8x8x32xf32>
    tpu.vector_store %arg10[%c0_29, %c0_30, %c0_31, %c0_32], %50 {strides = array<i32>} : memref<1x8x8x32xf32, #tpu.memory_space<vmem>>, vector<1x8x8x32xf32>,
    return
  }
  func.func @transform_0(%arg0: i32, %arg1: i32) -> (i32, i32, i32, i32) {
    %c0_i32 = arith.constant 0 : i32
    %c0_i32_0 = arith.constant 0 : i32
    %c0_i32_1 = arith.constant 0 : i32
    return %arg0, %c0_i32, %arg1, %c0_i32_0 : i32, i32, i32, i32
  }
  func.func @transform_1(%arg0: i32, %arg1: i32) -> (i32, i32, i32, i32) {
    %c0_i32 = arith.constant 0 : i32
    %c0_i32_0 = arith.constant 0 : i32
    %c0_i32_1 = arith.constant 0 : i32
    %c0_i32_2 = arith.constant 0 : i32
    return %arg0, %c0_i32, %c0_i32_0, %c0_i32_1 : i32, i32, i32, i32
  }
  func.func @transform_2(%arg0: i32, %arg1: i32) -> (i32, i32, i32, i32) {
    %c0_i32 = arith.constant 0 : i32
    %c0_i32_0 = arith.constant 0 : i32
    %c0_i32_1 = arith.constant 0 : i32
    return %arg0, %arg1, %c0_i32, %c0_i32_0 : i32, i32, i32, i32
  }
  func.func @transform_3(%arg0: i32, %arg1: i32) -> (i32, i32, i32, i32) {
    %c0_i32 = arith.constant 0 : i32
    %c0_i32_0 = arith.constant 0 : i32
    %c0_i32_1 = arith.constant 0 : i32
    return %arg0, %arg1, %c0_i32, %c0_i32_0 : i32, i32, i32, i32
  }
  func.func @transform_4(%arg0: i32, %arg1: i32) -> (i32, i32) {
    %c0_i32 = arith.constant 0 : i32
    %c0_i32_0 = arith.constant 0 : i32
    %c0_i32_1 = arith.constant 0 : i32
    return %c0_i32, %c0_i32_0 : i32, i32
  }
  func.func @transform_5(%arg0: i32, %arg1: i32) -> (i32, i32) {
    %c0_i32 = arith.constant 0 : i32
    %c0_i32_0 = arith.constant 0 : i32
    %c0_i32_1 = arith.constant 0 : i32
    return %c0_i32, %c0_i32_0 : i32, i32
  }
  func.func @transform_6(%arg0: i32, %arg1: i32) -> (i32, i32) {
    %c0_i32 = arith.constant 0 : i32
    %c0_i32_0 = arith.constant 0 : i32
    %c0_i32_1 = arith.constant 0 : i32
    return %c0_i32, %c0_i32_0 : i32, i32
  }
  func.func @transform_7(%arg0: i32, %arg1: i32) -> (i32, i32) {
    %c0_i32 = arith.constant 0 : i32
    %c0_i32_0 = arith.constant 0 : i32
    %c0_i32_1 = arith.constant 0 : i32
    return %c0_i32, %c0_i32_0 : i32, i32
  }
  func.func @transform_8(%arg0: i32, %arg1: i32) -> (i32, i32, i32, i32) {
    %c0_i32 = arith.constant 0 : i32
    %c0_i32_0 = arith.constant 0 : i32
    %c0_i32_1 = arith.constant 0 : i32
    return %arg0, %arg1, %c0_i32, %c0_i32_0 : i32, i32, i32, i32
  }
}

</mosaic_0001>

<bundles_post_ra>
// kernel: pairwise_mixer_forward.2
= control target key start
LH: loop header
LB: loop body
LE: loop exit
PB: predicated region body
PF: predicated region fallthrough
CT: control target
= control target key end

     0   :  { %s2129_s24 = smov 0   ;;  %s2131_s25 = smov 0   ;;  %s2693_s0 = inlined_call_operand.vmem [shape: f32[2,8,8,32], index: 0, kind: input, shape index: {}]   ;;  %s2694_s1 = inlined_call_operand.vmem [shape: f32[1,32], index: 1, kind: input, shape index: {}]   ;;  %s2695_s2 = inlined_call_operand.vmem [shape: f32[1,32], index: 2, kind: input, shape index: {}]   ;;  %s2696_s3 = inlined_call_operand.vmem [shape: f32[32,160], index: 3, kind: input, shape index: {}]   ;;  %s2697_s4 = inlined_call_operand.vmem [shape: f32[1,160], index: 4, kind: input, shape index: {}]   ;;  %s2698_s5 = inlined_call_operand.vmem [shape: bf16[2,32,8,8], index: 5, kind: output, shape index: {0}]   ;;  %s2699_s6 = inlined_call_operand.vmem [shape: bf16[2,32,8,8], index: 6, kind: output, shape index: {1}]   ;;  %s2700_s7 = inlined_call_operand.vmem [shape: bf16[2,8,8,32], index: 7, kind: output, shape index: {2}]  }
   0x1   :  { %s2133_s26 = smov 0  }
   0x2 LB: > { %s30_s27 = sadd.s32 1, %s2071_s25  ;;  %p1872_p0 = scmp.ge.s32.totalorder %s2075_s26, 1  ;;  %s2075_s26 = sphi %s2133_s26, %s18_s26   ;;  %s2071_s25 = sphi %s2131_s25, %s2702_s25   ;;  %s2067_s24 = sphi %s2129_s24, %s2701_s24  }
   0x3   : > { %p32_p1 = scmp.ge.s32.totalorder %s30_s27, 2  ;;  %p267_p2 = scmp.lt.s32.totalorder %s2075_s26, 3 }
   0x5   : > { %s2704_s27 = smov (%p32_p1, %s30_s27), 0  ;;  %p268_p3 = pnand %p1872_p0, %p267_p2 }
   0x6   : > { %p324_p4 = scmp.lt.s32.totalorder (!%p268_p3), %s2067_s24, 1  ;;  %s2078_s13 = smov (!%p268_p3), 64  }
   0x7   : > { %271 = sbr.rel (%p268_p3) target bundleno = 1125 (0x465), region = 40  ;;  %s2079_s17 = smov (!%p268_p3), 96  }
   0x8   : > { %s2080_s18 = smov (!%p268_p3), 120   ;;  %s2081_s19 = smov (!%p268_p3), 112  }
   0x9   : > { %s2082_s20 = smov (!%p268_p3), 104   ;;  %s2083_s21 = smov (!%p268_p3), 88  }
   0xa   : > { %s2084_s22 = smov (!%p268_p3), 80   ;;  %s2085_s23 = smov (!%p268_p3), 72  }
   0xc   : > { %s2706_s24 = smov (!%p324_p4, %s2067_s24), 1  ;;  %vm370_vm0 = vcmask 261120   ;;  %v511_v56 = vld [vmem:[%s2696_s3 + $0x38] sm:$0xff]  ;;  %v510_v57 = vld [vmem:[%s2696_s3 + $0x30] sm:$0xff]  ;;  %v509_v58 = vld [vmem:[%s2696_s3 + $0x28] sm:$0xff]  ;;  %vm829_vm1 = vcmask 257024  }
   0xd   : > { %s1917_s28 = sshll.u32 %s2706_s24, 6  ;;  %572 = vmatprep.subr.mxu0 %v511_v56  ;;  %1929 = vmatprep.subr.mxu1 %v511_v56  ;;  %v508_v59 = vld [vmem:[%s2696_s3 + $0x20] sm:$0xff]  ;;  %v507_v60 = vld [vmem:[%s2696_s3 + $0x18] sm:$0xff]  ;;  %v506_v61 = vld [vmem:[%s2696_s3 + $0x10] sm:$0xff]  ;;  %s1920_s12 = sshll.u32 %s2706_s24, 5  ;;  %vm1224_vm2 = vcmask 60416  }
   0xe   : > { %s331_s8 = scalar_lea.vmem %s2693_s0, %s1917_s28  ;;  %573 = vmatpush1.msra.mxu0 %v510_v57  ;;  %1933 = vmatpush1.msra.mxu1 %v510_v57  ;;  %v505_v62 = vld [vmem:[%s2696_s3 + $0x8] sm:$0xff]  ;;  %v504_v63 = vld [vmem:[%s2696_s3] sm:$0xff]  ;;  %s2301_s16 = scalar_lea.vmem %s2700_s7, %s1920_s12 }
   0xf   : > { %v360_v0 = vld [vmem:[%s331_s8] sm:$0xff]  ;;  %v361_v2 = vld [vmem:[%s331_s8 + $0x8] sm:$0xff]  ;;  %v362_v5 = vld [vmem:[%s331_s8 + $0x10] sm:$0xff]  ;;  %574 = vmatprep.subr.mxu0 %v509_v58  ;;  %1930 = vmatprep.subr.mxu1 %v509_v58  ;;  %s1918_s28 = sshll.u32 %s2706_s24, 7 }
  0x10   : > { %v364_v1 = vld [vmem:[%s331_s8 + $0x20] sm:$0xff]  ;;  %v371_v3 = vsel %vm370_vm0, %v360_v0, 0.0  ;;  %v374_v6 = vsel %vm370_vm0, %v361_v2, 0.0  ;;  %v377_v7 = vsel %vm370_vm0, %v362_v5, 0.0  ;;  %v365_v8 = vld [vmem:[%s331_s8 + $0x28] sm:$0xff]  ;;  %v363_v9 = vld [vmem:[%s331_s8 + $0x18] sm:$0xff]  ;;  %575 = vmatpush1.msra.mxu0 %v508_v59  ;;  %1934 = vmatpush1.msra.mxu1 %v508_v59  ;;  %s2570_s11 = scalar_lea.vmem %s2699_s6, %s1918_s28 }
  0x11   : > { %v383_v4 = vsel %vm370_vm0, %v364_v1, 0.0  ;;  %372 = vadd.xlane.f32.xlu0 %v371_v3  ;;  %v386_v10 = vsel %vm370_vm0, %v365_v8, 0.0  ;;  %v380_v11 = vsel %vm370_vm0, %v363_v9, 0.0  ;;  %v366_v12 = vld [vmem:[%s331_s8 + $0x30] sm:$0xff]  ;;  %v367_v13 = vld [vmem:[%s331_s8 + $0x38] sm:$0xff]  ;;  %576 = vmatprep.subr.mxu0 %v507_v60  ;;  %s2385_s8 = scalar_lea.vmem %s2698_s5, %s1918_s28 }
  0x12   : > { %384 = vadd.xlane.f32.xlu1 %v383_v4  ;;  %v389_v14 = vsel %vm370_vm0, %v366_v12, 0.0  ;;  %v392_v15 = vsel %vm370_vm0, %v367_v13, 0.0  ;;  %577 = vmatpush1.msra.mxu0 %v506_v61 }
  0x13   : > { %1931 = vmatprep.subr.mxu1 %v507_v60  ;;  %578 = vmatprep.subr.mxu0 %v505_v62  ;;  %v514_v60 = vlaneseq }
  0x14   : > { %1935 = vmatpush1.msra.mxu1 %v506_v61  ;;  %579 = vmatpush1.msra.mxu0 %v504_v63 }
  0x15   : > { %375 = vadd.xlane.f32.xlu0 %v374_v6  ;;  %1932 = vmatprep.subr.mxu1 %v505_v62  ;;  %v2255_v61 = vshrl.u32 %v514_v60, 7 }
  0x16   : > { %378 = vadd.xlane.f32.xlu1 %v377_v7  ;;  %1936 = vmatpush1.msra.mxu1 %v504_v63 }
  0x17   : > { %v516_v62 = vsub.s32 0, %v2255_v61  ;;  %v520_v63 = vsub.s32 1, %v2255_v61 }
  0x19   : > { %387 = vadd.xlane.f32.xlu0 %v386_v10 }
  0x1a   : > { %381 = vadd.xlane.f32.xlu1 %v380_v11 }
  0x1d   : > { %390 = vadd.xlane.f32.xlu0 %v389_v14 }
  0x1e   : > { %393 = vadd.xlane.f32.xlu1 %v392_v15 }
  0x9a   : > { %v373_v16 = vpop.xlane.xlu0 %372 }
  0x9b   : > { %v385_v17 = vpop.xlane.xlu1 %384  ;;  %v396_v18 = vmul.f32 0.03125, %v373_v16 }
  0x9c   : > { %v400_v19 = vmul.f32 0.03125, %v385_v17 }
  0x9d   : > { %v2161_v20 = vsub.f32 %v360_v0, %v396_v18  ;;  %v2077_v0 = vmov 0.0  }
  0x9e   : > { %v2163_v21 = vsub.f32 %v364_v1, %v400_v19  ;;  %v376_v22 = vpop.xlane.xlu0 %375  ;;  %612 = vmatprep.mubr.f32.mxu0 %v2077_v0  ;;  %636 = vmatprep.mubr.f32.mxu1 %v2077_v0 }
  0x9f   : > { %v379_v23 = vpop.xlane.xlu1 %378  ;;  %v397_v24 = vmul.f32 0.03125, %v376_v22  ;;  %v412_v26 = vmul.f32 %v2161_v20, %v2161_v20 }
  0xa0   : > { %v398_v25 = vmul.f32 0.03125, %v379_v23  ;;  %v416_v27 = vmul.f32 %v2163_v21, %v2163_v21 }
  0xa1   : > { %v2169_v28 = vsub.f32 %v361_v2, %v397_v24  ;;  %v420_v30 = vsel %vm370_vm0, %v412_v26, 0.0 }
  0xa2   : > { %v2171_v29 = vsub.f32 %v362_v5, %v398_v25  ;;  %421 = vadd.xlane.f32.xlu0 %v420_v30  ;;  %v388_v31 = vpop.xlane.xlu0 %387  ;;  %v432_v33 = vsel %vm370_vm0, %v416_v27, 0.0  ;;  %v1881_v27 = vld [vmem:[%s2694_s1] ss:$0 sm:$0xff] }
  0xa3   : > { %v382_v32 = vpop.xlane.xlu1 %381  ;;  %v401_v34 = vmul.f32 0.03125, %v388_v31  ;;  %v413_v36 = vmul.f32 %v2169_v28, %v2169_v28 }
  0xa4   : > { %v399_v35 = vmul.f32 0.03125, %v382_v32  ;;  %v414_v37 = vmul.f32 %v2171_v29, %v2171_v29  ;;  %v1882_v32 = vld [vmem:[%s2695_s2] ss:$0 sm:$0xff] }
  0xa5   : > { %v2179_v38 = vsub.f32 %v365_v8, %v401_v34  ;;  %v423_v40 = vsel %vm370_vm0, %v413_v36, 0.0 }
  0xa6   : > { %v2181_v39 = vsub.f32 %v363_v9, %v399_v35  ;;  %433 = vadd.xlane.f32.xlu0 %v432_v33  ;;  %424 = vadd.xlane.f32.xlu1 %v423_v40  ;;  %v391_v41 = vpop.xlane.xlu0 %390  ;;  %v426_v43 = vsel %vm370_vm0, %v414_v37, 0.0 }
  0xa7   : > { %v394_v42 = vpop.xlane.xlu1 %393  ;;  %v402_v44 = vmul.f32 0.03125, %v391_v41  ;;  %v417_v46 = vmul.f32 %v2179_v38, %v2179_v38 }
  0xa8   : > { %v403_v45 = vmul.f32 0.03125, %v394_v42  ;;  %v415_v47 = vmul.f32 %v2181_v39, %v2181_v39 }
  0xa9   : > { %v2189_v48 = vsub.f32 %v366_v12, %v402_v44  ;;  %v435_v50 = vsel %vm370_vm0, %v417_v46, 0.0 }
  0xaa   : > { %v2191_v49 = vsub.f32 %v367_v13, %v403_v45  ;;  %427 = vadd.xlane.f32.xlu1 %v426_v43  ;;  %436 = vadd.xlane.f32.xlu0 %v435_v50  ;;  %v429_v51 = vsel %vm370_vm0, %v415_v47, 0.0 }
  0xab   : > { %v418_v52 = vmul.f32 %v2189_v48, %v2189_v48 }
  0xac   : > { %v419_v53 = vmul.f32 %v2191_v49, %v2191_v49 }
  0xad   : > { %v438_v54 = vsel %vm370_vm0, %v418_v52, 0.0 }
  0xae   : > { %430 = vadd.xlane.f32.xlu1 %v429_v51  ;;  %439 = vadd.xlane.f32.xlu0 %v438_v54  ;;  %v441_v55 = vsel %vm370_vm0, %v419_v53, 0.0 }
  0xb2   : > { %442 = vadd.xlane.f32.xlu1 %v441_v55 }
 0x12b   : > { %v422_v1 = vpop.xlane.xlu0 %421 }
 0x12c   : > { %v444_v2 = vmul.f32 0.03125, %v422_v1 }
 0x12e   : > { %v452_v3 = vadd.f32 1e-05, %v444_v2 }
 0x12f   : > { %v425_v4 = vpop.xlane.xlu1 %424  ;;  %v434_v5 = vpop.xlane.xlu0 %433 }
 0x130   : > { %1973 = vrsqrt.f32 %v452_v3  ;;  %v445_v6 = vmul.f32 0.03125, %v425_v4  ;;  %v448_v7 = vmul.f32 0.03125, %v434_v5 }
 0x132   : > { %v453_v8 = vadd.f32 1e-05, %v445_v6  ;;  %v456_v9 = vadd.f32 1e-05, %v448_v7 }
 0x133   : > { %v428_v10 = vpop.xlane.xlu1 %427  ;;  %v437_v11 = vpop.xlane.xlu0 %436 }
 0x134   : > { %1975 = vrsqrt.f32 %v453_v8  ;;  %v446_v12 = vmul.f32 0.03125, %v428_v10  ;;  %v449_v13 = vmul.f32 0.03125, %v437_v11 }
 0x135   : > { %1977 = vrsqrt.f32 %v456_v9 }
 0x136   : > { %v454_v14 = vadd.f32 1e-05, %v446_v12  ;;  %v457_v15 = vadd.f32 1e-05, %v449_v13 }
 0x137   : > { %v431_v16 = vpop.xlane.xlu1 %430  ;;  %v440_v17 = vpop.xlane.xlu0 %439 }
 0x138   : > { %1979 = vrsqrt.f32 %v454_v14  ;;  %v447_v18 = vmul.f32 0.03125, %v431_v16  ;;  %v450_v19 = vmul.f32 0.03125, %v440_v17 }
 0x139   : > { %1981 = vrsqrt.f32 %v457_v15 }
 0x13a   : > { %v455_v22 = vadd.f32 1e-05, %v447_v18  ;;  %v458_v23 = vadd.f32 1e-05, %v450_v19 }
 0x13b   : > { %v443_v24 = vpop.xlane.xlu1 %442 }
 0x13c   : > { %1983 = vrsqrt.f32 %v455_v22  ;;  %v451_v25 = vmul.f32 0.03125, %v443_v24 }
 0x13d   : > { %v1974_v26 = vpop.eup %1973  ;;  %1985 = vrsqrt.f32 %v458_v23 }
 0x13e   : > { %v459_v30 = vadd.f32 1e-05, %v451_v25  ;;  %v468_v31 = vmul.f32 %v1974_v26, %v2161_v20 }
 0x140   : > { %1987 = vrsqrt.f32 %v459_v30  ;;  %v482_v33 = vmul.f32 %v1881_v27, %v468_v31 }
 0x141   : > { %v1976_v34 = vpop.eup %1975 }
 0x142   : > { %v1978_v35 = vpop.eup %1977  ;;  %v496_v36 = vadd.f32 %v1882_v32, %v482_v33  ;;  %v469_v37 = vmul.f32 %v1976_v34, %v2169_v28 }
 0x143   : > { %v472_v40 = vmul.f32 %v1978_v35, %v2163_v21 }
 0x144   : > { %1883 = vmatmul.mubr.msk.f32.vlgmr.msra.gmra.mxu0 %vm370_vm0, %v496_v36  ;;  %v483_v41 = vmul.f32 %v1881_v27, %v469_v37 }
 0x145   : > { %v1980_v42 = vpop.eup %1979  ;;  %618 = vmatprep.mubr.f32.mxu0 %v2077_v0  ;;  %v486_v20 = vmul.f32 %v1881_v27, %v472_v40 }
 0x146   : > { %v1982_v43 = vpop.eup %1981  ;;  %v497_v44 = vadd.f32 %v1882_v32, %v483_v41  ;;  %v470_v45 = vmul.f32 %v1980_v42, %v2171_v29 }
 0x147   : > { %v500_v46 = vadd.f32 %v1882_v32, %v486_v20  ;;  %v473_v47 = vmul.f32 %v1982_v43, %v2179_v38 }
 0x148   : > { %1884 = vmatmul.mubr.msk.f32.gmra.mxu0 %vm370_vm0, %v497_v44  ;;  %v484_v50 = vmul.f32 %v1881_v27, %v470_v45 }
 0x149   : > { %v1984_v28 = vpop.eup %1983  ;;  %1887 = vmatmul.mubr.msk.f32.vlgmr.msra.gmra.mxu1 %vm370_vm0, %v500_v46  ;;  %624 = vmatprep.mubr.f32.mxu0 %v2077_v0  ;;  %v487_v21 = vmul.f32 %v1881_v27, %v473_v47 }
 0x14a   : > { %v1986_v51 = vpop.eup %1985  ;;  %642 = vmatprep.mubr.f32.mxu1 %v2077_v0  ;;  %v498_v52 = vadd.f32 %v1882_v32, %v484_v50  ;;  %v471_v53 = vmul.f32 %v1984_v28, %v2181_v39 }
 0x14b   : > { %v501_v54 = vadd.f32 %v1882_v32, %v487_v21  ;;  %v474_v29 = vmul.f32 %v1986_v51, %v2189_v48 }
 0x14c   : > { %1885 = vmatmul.mubr.msk.f32.gmra.mxu0 %vm370_vm0, %v498_v52  ;;  %v485_v38 = vmul.f32 %v1881_v27, %v471_v53 }
 0x14d   : > { %v1988_v55 = vpop.eup %1987  ;;  %1888 = vmatmul.mubr.msk.f32.gmra.mxu1 %vm370_vm0, %v501_v54  ;;  %630 = vmatprep.mubr.f32.mxu0 %v2077_v0  ;;  %v488_v56 = vmul.f32 %v1881_v27, %v474_v29 }
 0x14e   : > { %648 = vmatprep.mubr.f32.mxu1 %v2077_v0  ;;  %v499_v57 = vadd.f32 %v1882_v32, %v485_v38  ;;  %v475_v58 = vmul.f32 %v1988_v55, %v2191_v49  ;;  %v512_v49 = vld [vmem:[%s2697_s4] sm:$0x3] }
 0x14f   : > { %v502_v59 = vadd.f32 %v1882_v32, %v488_v56  ;;  %v517_v1 = vrot.slane %v512_v49, %v516_v62  ;;  %v2262_v2 = vrot.slane %v512_v49, %v520_v63 }
 0x150   : > { %1886 = vmatmul.mubr.msk.f32.gmra.mxu0 %vm370_vm0, %v499_v57  ;;  %v489_v39 = vmul.f32 %v1881_v27, %v475_v58 }
 0x151   : > { %1889 = vmatmul.mubr.msk.f32.gmra.mxu1 %vm370_vm0, %v502_v59 }
 0x152   : > { %654 = vmatprep.mubr.f32.mxu1 %v2077_v0  ;;  %v503_v48 = vadd.f32 %v1882_v32, %v489_v39 }
 0x155   : > { %1890 = vmatmul.mubr.msk.f32.gmra.mxu1 %vm370_vm0, %v503_v48 }
 0x204   : > { %v614_v3 = vpop.f32.mrf.mxu0 }
 0x205   : > { %v2264_v4 = vadd.f32 %v614_v3, %v517_v1 }
 0x206   : > { %v616_v0 = vpop.f32.mrf.mxu0 }
 0x207   : > { %v1891_v5 = vmul.f32 -1.442695, %v2264_v4  ;;  %v617_v6 = vadd.f32 %v616_v0, %v2262_v2 }
 0x208   : > { %v620_v7 = vpop.f32.mrf.mxu0 }
 0x209   : > { %1989 = vpow2.f32 %v1891_v5  ;;  %v1899_v8 = vmul.f32 -1.442695, %v617_v6  ;;  %v2268_v9 = vadd.f32 %v620_v7, %v517_v1  ;;  %v638_v10 = vpop.f32.mrf.mxu1 }
 0x20a   : > { %v2270_v11 = vadd.f32 %v638_v10, %v517_v1  ;;  %v622_v12 = vpop.f32.mrf.mxu0 }
 0x20b   : > { %1991 = vpow2.f32 %v1899_v8  ;;  %v1892_v13 = vmul.f32 -1.442695, %v2268_v9  ;;  %v623_v14 = vadd.f32 %v622_v12, %v2262_v2  ;;  %v640_v15 = vpop.f32.mrf.mxu1 }
 0x20c   : > { %v1895_v16 = vmul.f32 -1.442695, %v2270_v11  ;;  %v641_v17 = vadd.f32 %v640_v15, %v2262_v2  ;;  %v626_v18 = vpop.f32.mrf.mxu0 }
 0x20d   : > { %1993 = vpow2.f32 %v1892_v13  ;;  %v1900_v19 = vmul.f32 -1.442695, %v623_v14  ;;  %v2276_v22 = vadd.f32 %v626_v18, %v517_v1  ;;  %v644_v23 = vpop.f32.mrf.mxu1 }
 0x20e   : > { %1995 = vpow2.f32 %v1895_v16  ;;  %v1903_v24 = vmul.f32 -1.442695, %v641_v17  ;;  %v2278_v25 = vadd.f32 %v644_v23, %v517_v1  ;;  %v628_v26 = vpop.f32.mrf.mxu0 }
 0x20f   : > { %1997 = vpow2.f32 %v1900_v19  ;;  %v1893_v27 = vmul.f32 -1.442695, %v2276_v22  ;;  %v629_v30 = vadd.f32 %v628_v26, %v2262_v2  ;;  %v646_v31 = vpop.f32.mrf.mxu1 }
 0x210   : > { %1999 = vpow2.f32 %v1903_v24  ;;  %v1896_v32 = vmul.f32 -1.442695, %v2278_v25  ;;  %v647_v33 = vadd.f32 %v646_v31, %v2262_v2  ;;  %v632_v34 = vpop.f32.mrf.mxu0 }
 0x211   : > { %2001 = vpow2.f32 %v1893_v27  ;;  %v1901_v35 = vmul.f32 -1.442695, %v629_v30  ;;  %v2284_v36 = vadd.f32 %v632_v34, %v517_v1  ;;  %v650_v37 = vpop.f32.mrf.mxu1 }
 0x212   : > { %2003 = vpow2.f32 %v1896_v32  ;;  %v1904_v40 = vmul.f32 -1.442695, %v647_v33  ;;  %v2286_v41 = vadd.f32 %v650_v37, %v517_v1  ;;  %v634_v42 = vpop.f32.mrf.mxu0 }
 0x213   : > { %2005 = vpow2.f32 %v1901_v35  ;;  %v1894_v20 = vmul.f32 -1.442695, %v2284_v36  ;;  %v635_v43 = vadd.f32 %v634_v42, %v2262_v2  ;;  %v652_v44 = vpop.f32.mrf.mxu1 }
 0x214   : > { %2007 = vpow2.f32 %v1904_v40  ;;  %v1897_v45 = vmul.f32 -1.442695, %v2286_v41  ;;  %v653_v46 = vadd.f32 %v652_v44, %v2262_v2 }
 0x215   : > { %2009 = vpow2.f32 %v1894_v20  ;;  %v1902_v47 = vmul.f32 -1.442695, %v635_v43  ;;  %v656_v50 = vpop.f32.mrf.mxu1 }
 0x216   : > { %v1990_v28 = vpop.eup %1989  ;;  %2011 = vpow2.f32 %v1897_v45  ;;  %v1905_v21 = vmul.f32 -1.442695, %v653_v46  ;;  %v2292_v51 = vadd.f32 %v656_v50, %v517_v1 }
 0x217   : > { %v685_v52 = vadd.f32 1.0, %v1990_v28  ;;  %2013 = vpow2.f32 %v1902_v47  ;;  %v658_v53 = vpop.f32.mrf.mxu1 }
 0x218   : > { %v1992_v54 = vpop.eup %1991  ;;  %2015 = vpow2.f32 %v1905_v21  ;;  %v1898_v29 = vmul.f32 -1.442695, %v2292_v51  ;;  %v659_v38 = vadd.f32 %v658_v53, %v2262_v2 }
 0x219   : > { %2017 = vrcp.f32 %v685_v52  ;;  %v773_v55 = vadd.f32 1.0, %v1992_v54 }
 0x21a   : > { %v1994_v56 = vpop.eup %1993  ;;  %2019 = vpow2.f32 %v1898_v29  ;;  %v1906_v57 = vmul.f32 -1.442695, %v659_v38 }
 0x21b   : > { %v1996_v58 = vpop.eup %1995  ;;  %2021 = vrcp.f32 %v773_v55  ;;  %v686_v59 = vadd.f32 1.0, %v1994_v56 }
 0x21c   : > { %v1998_v39 = vpop.eup %1997  ;;  %v689_v48 = vadd.f32 1.0, %v1996_v58  ;;  %2023 = vpow2.f32 %v1906_v57 }
 0x21d   : > { %v2000_v60 = vpop.eup %1999  ;;  %2025 = vrcp.f32 %v686_v59  ;;  %v774_v62 = vadd.f32 1.0, %v1998_v39 }
 0x21e   : > { %v2002_v49 = vpop.eup %2001  ;;  %2027 = vrcp.f32 %v689_v48  ;;  %v777_v63 = vadd.f32 1.0, %v2000_v60 }
 0x21f   : > { %v2004_v1 = vpop.eup %2003  ;;  %2029 = vrcp.f32 %v774_v62  ;;  %v687_v5 = vadd.f32 1.0, %v2002_v49 }
 0x220   : > { %v2006_v2 = vpop.eup %2005  ;;  %2031 = vrcp.f32 %v777_v63  ;;  %v690_v3 = vadd.f32 1.0, %v2004_v1 }
 0x221   : > { %v2008_v0 = vpop.eup %2007  ;;  %v775_v6 = vadd.f32 1.0, %v2006_v2 }
 0x222   : > { %v2010_v7 = vpop.eup %2009  ;;  %2033 = vrcp.f32 %v690_v3  ;;  %v778_v8 = vadd.f32 1.0, %v2008_v0 }
 0x223   : > { %v2012_v10 = vpop.eup %2011  ;;  %2035 = vrcp.f32 %v775_v6  ;;  %v688_v17 = vadd.f32 1.0, %v2010_v7 }
 0x224   : > { %v2014_v12 = vpop.eup %2013  ;;  %2037 = vrcp.f32 %v778_v8  ;;  %v691_v13 = vadd.f32 1.0, %v2012_v10 }
 0x225   : > { %v2016_v14 = vpop.eup %2015  ;;  %2039 = vrcp.f32 %v687_v5  ;;  %v776_v15 = vadd.f32 1.0, %v2014_v12 }
 0x226   : > { %v2018_v16 = vpop.eup %2017  ;;  %2041 = vrcp.f32 %v691_v13  ;;  %v779_v18 = vadd.f32 1.0, %v2016_v14  ;;  %v2086_v14 = vmov 1983009808  }
 0x227   : > { %v2020_v19 = vpop.eup %2019  ;;  %2043 = vrcp.f32 %v776_v15  ;;  %717 = vrot.lane.b32.xlu0 %v2018_v16, %s2078_s13  ;;  %v955_v15 = vunpack.c.l.s4 %v2086_v14 }
 0x228   : > { %v2022_v23 = vpop.eup %2021  ;;  %2045 = vrcp.f32 %v779_v18  ;;  %v692_v30 = vadd.f32 1.0, %v2020_v19 }
 0x229   : > { %v2024_v24 = vpop.eup %2023  ;;  %v1921_v26 = vpack.c.bf16 %v2022_v23, %v2022_v23  ;;  %2047 = vrcp.f32 %v688_v17  ;;  %v2087_v17 = vmov 1934713408   ;;  %v956_v19 = vunpack.c.0.s8 %v955_v15 }
 0x22a   : > { %v2026_v27 = vpop.eup %2025  ;;  %v780_v31 = vadd.f32 1.0, %v2024_v24  ;;  %v987_v18 = vunpack.c.l.s4 %v2087_v17 }
 0x22b   : > { %v2028_v32 = vpop.eup %2027  ;;  %830 = vst.msk [vmem:[%s2301_s16] sm:$0xf] %vm829_vm1, %v1921_v26  ;;  %719 = vrot.lane.b32.xlu1 %v2026_v27, %s2078_s13 }
 0x22c   : > { %v2030_v33 = vpop.eup %2029  ;;  %2049 = vrcp.f32 %v780_v31  ;;  %725 = vrot.lane.b32.xlu0 %v2028_v32, %s2078_s13 }
 0x22d   : > { %v2032_v34 = vpop.eup %2031  ;;  %v1922_v35 = vpack.c.bf16 %v2030_v33, %v2030_v33  ;;  %2051 = vrcp.f32 %v692_v30  ;;  %v988_v30 = vunpack.c.0.s8 %v987_v18 }
 0x22e   : > { %v1925_v37 = vpack.c.bf16 %v2032_v34, %v2032_v34  ;;  %v2366_v34 = vsub.s32 %v956_v19, %v2255_v61 }
 0x22f   : > { %v2034_v40 = vpop.eup %2033  ;;  %831 = vst.msk [vmem:[%s2301_s16 + $0x4] sm:$0xf] %vm829_vm1, %v1922_v35 }
 0x230   : > { %v2036_v42 = vpop.eup %2035  ;;  %834 = vst.msk [vmem:[%s2301_s16 + $0x10] sm:$0xf] %vm829_vm1, %v1925_v37  ;;  %727 = vrot.lane.b32.xlu1 %v2034_v40, %s2078_s13 }
 0x231   : > { %v2038_v20 = vpop.eup %2037  ;;  %v1923_v43 = vpack.c.bf16 %v2036_v42, %v2036_v42 }
 0x232   : > { %v2040_v44 = vpop.eup %2039  ;;  %v1926_v45 = vpack.c.bf16 %v2038_v20, %v2038_v20 }
 0x233   : > { %v2042_v46 = vpop.eup %2041  ;;  %832 = vst.msk [vmem:[%s2301_s16 + $0x8] sm:$0xf] %vm829_vm1, %v1923_v43 }
 0x234   : > { %v2044_v47 = vpop.eup %2043  ;;  %835 = vst.msk [vmem:[%s2301_s16 + $0x14] sm:$0xf] %vm829_vm1, %v1926_v45  ;;  %721 = vrot.lane.b32.xlu1 %v2040_v44, %s2078_s13  ;;  %729 = vrot.lane.b32.xlu0 %v2042_v46, %s2078_s13 }
 0x235   : > { %v2046_v50 = vpop.eup %2045  ;;  %v1924_v28 = vpack.c.bf16 %v2044_v47, %v2044_v47 }
 0x236   : > { %v1927_v21 = vpack.c.bf16 %v2046_v50, %v2046_v50  ;;  %v2048_v52 = vpop.eup %2047 }
 0x237   : > { %833 = vst.msk [vmem:[%s2301_s16 + $0xc] sm:$0xf] %vm829_vm1, %v1924_v28 }
 0x238   : > { %836 = vst.msk [vmem:[%s2301_s16 + $0x18] sm:$0xf] %vm829_vm1, %v1927_v21  ;;  %723 = vrot.lane.b32.xlu1 %v2048_v52, %s2078_s13  ;;  %v2371_v21 = vsub.s32 %v988_v30, %v2255_v61 }
 0x239   : > { %v2050_v53 = vpop.eup %2049 }
 0x23a   : > { %v1928_v54 = vpack.c.bf16 %v2050_v53, %v2050_v53  ;;  %v2052_v29 = vpop.eup %2051 }
 0x23c   : > { %837 = vst.msk [vmem:[%s2301_s16 + $0x1c] sm:$0xf] %vm829_vm1, %v1928_v54  ;;  %731 = vrot.lane.b32.xlu1 %v2052_v29, %s2078_s13 }
 0x299   : > { %v718_v38 = vpop.permute.xlu0 %717 }
 0x29a   : > { %v741_v56 = vmul.f32 %v718_v38, %v2264_v4 }
 0x29d   : > { %v720_v55 = vpop.permute.xlu1 %719 }
 0x29e   : > { %v742_v57 = vmul.f32 %v720_v55, %v2268_v9  ;;  %v726_v59 = vpop.permute.xlu0 %725 }
 0x29f   : > { %v745_v48 = vmul.f32 %v726_v59, %v2270_v11 }
 0x2a0   : > { %v838_v58 = vpack.c.bf16 %v742_v57, %v741_v56 }
 0x2a2   : > { %v728_v39 = vpop.permute.xlu1 %727  ;;  %1261 = vrot.lane.b32.xlu0 %v838_v58, %s2079_s17 }
 0x2a3   : > { %v746_v60 = vmul.f32 %v728_v39, %v2278_v25 }
 0x2a5   : > { %v840_v62 = vpack.c.bf16 %v746_v60, %v745_v48 }
 0x2a6   : > { %v722_v49 = vpop.permute.xlu1 %721  ;;  %v730_v9 = vpop.permute.xlu0 %729 }
 0x2a7   : > { %1265 = vrot.lane.b32.xlu0 %v840_v62, %s2079_s17  ;;  %v743_v1 = vmul.f32 %v722_v49, %v2276_v22  ;;  %v747_v0 = vmul.f32 %v730_v9, %v2286_v41 }
 0x2aa   : > { %v724_v63 = vpop.permute.xlu1 %723 }
 0x2ab   : > { %v744_v4 = vmul.f32 %v724_v63, %v2284_v36 }
 0x2ad   : > { %v839_v2 = vpack.c.bf16 %v744_v4, %v743_v1 }
 0x2ae   : > { %v732_v3 = vpop.permute.xlu1 %731 }
 0x2af   : > { %v748_v5 = vmul.f32 %v732_v3, %v2292_v51  ;;  %1263 = vrot.lane.b32.xlu1 %v839_v2, %s2079_s17 }
 0x2b1   : > { %v841_v11 = vpack.c.bf16 %v748_v5, %v747_v0 }
 0x2b3   : > { %1267 = vrot.lane.b32.xlu1 %v841_v11, %s2079_s17 }
 0x2c5   : > { %842 = vxpose.xlu0.c.b16.start [1/4] (short) (narrow) %v838_v58, 32 }
 0x2c9   : > { %843 = vxpose.xlu0.c.b16.cont [2/4] (short) (narrow) %v839_v2, 32 }
 0x2cd   : > { %844 = vxpose.xlu0.c.b16.cont [3/4] (short) (narrow) %v840_v62, 32 }
 0x2d1   : > { %845 = vxpose.xlu0.c.b16.end [4/4] (short) (narrow) %v841_v11, 32 }
 0x314   : > { %v1262_v25 = vpop.permute.xlu0 %1261 }
 0x319   : > { %v1266_v22 = vpop.permute.xlu0 %1265 }
 0x321   : > { %v1264_v41 = vpop.permute.xlu1 %1263 }
 0x325   : > { %v1268_v51 = vpop.permute.xlu1 %1267 }
 0x327   : > { %v850_v6 = vpop.trf.xlu0 }
 0x328   : > { %860 = vrot.lane.b32.xlu0 %v850_v6, %s2080_s18  ;;  %v892_v35 = vshrl.u32 %v850_v6, 16 }
 0x32b   : > { %v2339_v36 = vpop.trf.xlu0 }
 0x32c   : > { %864 = vrot.lane.b32.xlu0 %v850_v6, %s2081_s19  ;;  %862 = vrot.lane.b32.xlu1 %v2339_v36, %s2080_s18 }
 0x330   : > { %868 = vrot.lane.b32.xlu0 %v850_v6, %s2082_s20  ;;  %866 = vrot.lane.b32.xlu1 %v2339_v36, %s2081_s19 }
 0x334   : > { %872 = vrot.lane.b32.xlu0 %v850_v6, %s2079_s17  ;;  %870 = vrot.lane.b32.xlu1 %v2339_v36, %s2082_s20 }
 0x338   : > { %876 = vrot.lane.b32.xlu0 %v850_v6, %s2083_s21  ;;  %874 = vrot.lane.b32.xlu1 %v2339_v36, %s2079_s17 }
 0x33c   : > { %880 = vrot.lane.b32.xlu0 %v850_v6, %s2084_s22 }
 0x340   : > { %884 = vrot.lane.b32.xlu0 %v850_v6, %s2085_s23 }
 0x35b   : > { %1273 = vxpose.xlu1.c.b16.start [1/4] (short) (narrow) %v1262_v25, 32 }
 0x35f   : > { %1274 = vxpose.xlu1.c.b16.cont [2/4] (short) (narrow) %v1264_v41, 32 }
 0x363   : > { %1275 = vxpose.xlu1.c.b16.cont [3/4] (short) (narrow) %v1266_v22, 32 }
 0x367   : > { %1276 = vxpose.xlu1.c.b16.end [4/4] (short) (narrow) %v1268_v51, 32 }
 0x36b   : > { %878 = vrot.lane.b32.xlu1 %v2339_v36, %s2083_s21 }
 0x36f   : > { %882 = vrot.lane.b32.xlu1 %v2339_v36, %s2084_s22 }
 0x373   : > { %886 = vrot.lane.b32.xlu1 %v2339_v36, %s2085_s23 }
 0x39a   : > { %v861_v7 = vpop.permute.xlu0 %860 }
 0x39b   : > { %v890_v31 = vpack.i.b16 %v861_v7, %v850_v6  ;;  %v893_v32 = vshrl.u32 %v861_v7, 16  ;;  %v2088_v7 = vmov 0  }
 0x39d   : > { %v894_v52 = vpack.i.b16 %v893_v32, %v892_v35 }
 0x39e   : > { %v865_v8 = vpop.permute.xlu0 %864  ;;  %v2361_v13 = vpop.permute.xlu1 %862 }
 0x39f   : > { %v900_v40 = vshrl.u32 %v865_v8, 16 }
 0x3a2   : > { %v869_v10 = vpop.permute.xlu0 %868  ;;  %v2363_v23 = vpop.permute.xlu1 %866 }
 0x3a3   : > { %v901_v37 = vshrl.u32 %v869_v10, 16  ;;  %v898_v45 = vpack.i.b16 %v869_v10, %v865_v8 }
 0x3a5   : > { %v902_v53 = vpack.i.b16 %v901_v37, %v900_v40  ;;  %v922_v40 = vpack.i.b16 %v2361_v13, %v2339_v36 }
 0x3a6   : > { %v873_v12 = vpop.permute.xlu0 %872  ;;  %v2368_v46 = vpop.permute.xlu1 %870 }
 0x3a7   : > { %v908_v33 = vshrl.u32 %v873_v12, 16 }
 0x3aa   : > { %v877_v16 = vpop.permute.xlu0 %876  ;;  %v2378_v60 = vpop.permute.xlu1 %874 }
 0x3ab   : > { %v906_v24 = vpack.i.b16 %v877_v16, %v873_v12  ;;  %v909_v26 = vshrl.u32 %v877_v16, 16 }
 0x3ad   : > { %v910_v42 = vpack.i.b16 %v909_v26, %v908_v33  ;;  %v952_v20 = vcombine.low %v890_v31, %v906_v24  ;;  %v953_v43 = vcombine.high %v890_v31, %v906_v24 }
 0x3ae   : > { %v881_v27 = vpop.permute.xlu0 %880 }
 0x3af   : > { %v916_v47 = vshrl.u32 %v881_v27, 16  ;;  %v960_v55 = vrot.slane %v952_v20, %v2366_v34  ;;  %v967_v56 = vrot.slane %v953_v43, %v2366_v34  ;;  %v1020_v57 = vcombine.low %v894_v52, %v910_v42 }
 0x3b0   : > { %v1021_v58 = vcombine.high %v894_v52, %v910_v42  ;;  %v925_v42 = vshrl.u32 %v2361_v13, 16  ;;  %v940_v20 = vshrl.u32 %v2378_v60, 16  ;;  %v924_v43 = vshrl.u32 %v2339_v36, 16 }
 0x3b1   : > { %v1028_v4 = vrot.slane %v1020_v57, %v2366_v34 }
 0x3b2   : > { %v885_v44 = vpop.permute.xlu0 %884  ;;  %v1035_v9 = vrot.slane %v1021_v58, %v2366_v34 }
 0x3b3   : > { %v914_v50 = vpack.i.b16 %v885_v44, %v881_v27  ;;  %v917_v28 = vshrl.u32 %v885_v44, 16  ;;  %v933_v44 = vshrl.u32 %v2368_v46, 16 }
 0x3b5   : > { %v918_v54 = vpack.i.b16 %v917_v28, %v916_v47  ;;  %v968_v29 = vcombine.low %v898_v45, %v914_v50  ;;  %v969_v38 = vcombine.high %v898_v45, %v914_v50  ;;  %v932_v45 = vshrl.u32 %v2363_v23, 16 }
 0x3b7   : > { %v976_v59 = vrot.slane %v968_v29, %v2366_v34  ;;  %v983_v39 = vrot.slane %v969_v38, %v2366_v34  ;;  %v1036_v48 = vcombine.low %v902_v53, %v918_v54  ;;  %v1037_v61 = vcombine.high %v902_v53, %v918_v54 }
 0x3b8   : > { %v930_v53 = vpack.i.b16 %v2368_v46, %v2363_v23  ;;  %v934_v13 = vpack.i.b16 %v933_v44, %v932_v45 }
 0x3b9   : > { %v984_v62 = vcombine.low %v960_v55, %v976_v59  ;;  %v985_v49 = vcombine.high %v960_v55, %v976_v59  ;;  %v1000_v63 = vcombine.low %v967_v56, %v983_v39  ;;  %v1001_v1 = vcombine.high %v967_v56, %v983_v39 }
 0x3ba   : > { %v1044_v2 = vrot.slane %v1036_v48, %v2366_v34  ;;  %v1051_v3 = vrot.slane %v1037_v61, %v2366_v34  ;;  %v926_v55 = vpack.i.b16 %v925_v42, %v924_v43 }
 0x3bb   : > { %v992_v0 = vrot.slane %v984_v62, %v2371_v21  ;;  %v999_v5 = vrot.slane %v985_v49, %v2371_v21  ;;  %v1008_v11 = vrot.slane %v1000_v63, %v2371_v21  ;;  %v1015_v25 = vrot.slane %v1001_v1, %v2371_v21 }
 0x3bc   : > { %v1052_v22 = vcombine.low %v1028_v4, %v1044_v2  ;;  %v1053_v6 = vcombine.high %v1028_v4, %v1044_v2  ;;  %v1068_v41 = vcombine.low %v1035_v9, %v1051_v3  ;;  %v1069_v51 = vcombine.high %v1035_v9, %v1051_v3 }
 0x3bd   : > { %v1016_v8 = vcombine.high %v992_v0, %v2088_v7  ;;  %v1017_v10 = vcombine.high %v999_v5, %v2088_v7  ;;  %v1018_v12 = vcombine.high %v1008_v11, %v2088_v7  ;;  %v1019_v14 = vcombine.high %v1015_v25, %v2088_v7  ;;  %1225 = vst.msk [vmem:[%s2385_s8] sm:$0xf] %vm1224_vm2, %v992_v0  ;;  %v2407_v15 = vpop.trf.xlu1 }
 0x3be   : > { %1229 = vst.msk [vmem:[%s2385_s8 + $0x10] sm:$0xf] %vm1224_vm2, %v999_v5  ;;  %1233 = vst.msk [vmem:[%s2385_s8 + $0x20] sm:$0xf] %vm1224_vm2, %v1008_v11  ;;  %v1060_v16 = vrot.slane %v1052_v22, %v2371_v21  ;;  %v1067_v17 = vrot.slane %v1053_v6, %v2371_v21  ;;  %v1076_v18 = vrot.slane %v1068_v41, %v2371_v21  ;;  %1291 = vrot.lane.b32.xlu0 %v2407_v15, %s2080_s18 }
 0x3bf   : > { %1237 = vst.msk [vmem:[%s2385_s8 + $0x30] sm:$0xf] %vm1224_vm2, %v1015_v25  ;;  %v1083_v19 = vrot.slane %v1069_v51, %v2371_v21  ;;  %1227 = vst.msk [vmem:[%s2385_s8 + $0x8] sm:$0xf] %vm1224_vm2, %v1016_v8 }
 0x3c0   : > { %1231 = vst.msk [vmem:[%s2385_s8 + $0x18] sm:$0xf] %vm1224_vm2, %v1017_v10  ;;  %1235 = vst.msk [vmem:[%s2385_s8 + $0x28] sm:$0xf] %vm1224_vm2, %v1018_v12  ;;  %v1084_v24 = vcombine.high %v1060_v16, %v2088_v7  ;;  %v1085_v26 = vcombine.high %v1067_v17, %v2088_v7  ;;  %v1086_v27 = vcombine.high %v1076_v18, %v2088_v7 }
 0x3c1   : > { %1239 = vst.msk [vmem:[%s2385_s8 + $0x38] sm:$0xf] %vm1224_vm2, %v1019_v14  ;;  %v1087_v30 = vcombine.high %v1083_v19, %v2088_v7  ;;  %1226 = vst.msk [vmem:[%s2385_s8 + $0x4] sm:$0xf] %vm1224_vm2, %v1060_v16  ;;  %v2435_v31 = vpop.trf.xlu1 }
 0x3c2   : > { %1230 = vst.msk [vmem:[%s2385_s8 + $0x14] sm:$0xf] %vm1224_vm2, %v1067_v17  ;;  %1234 = vst.msk [vmem:[%s2385_s8 + $0x24] sm:$0xf] %vm1224_vm2, %v1076_v18  ;;  %1295 = vrot.lane.b32.xlu0 %v2407_v15, %s2081_s19  ;;  %1293 = vrot.lane.b32.xlu1 %v2435_v31, %s2080_s18 }
 0x3c3   : > { %1238 = vst.msk [vmem:[%s2385_s8 + $0x34] sm:$0xf] %vm1224_vm2, %v1083_v19  ;;  %1228 = vst.msk [vmem:[%s2385_s8 + $0xc] sm:$0xf] %vm1224_vm2, %v1084_v24 }
 0x3c4   : > { %1232 = vst.msk [vmem:[%s2385_s8 + $0x1c] sm:$0xf] %vm1224_vm2, %v1085_v26  ;;  %1236 = vst.msk [vmem:[%s2385_s8 + $0x2c] sm:$0xf] %vm1224_vm2, %v1086_v27 }
 0x3c5   : > { %1240 = vst.msk [vmem:[%s2385_s8 + $0x3c] sm:$0xf] %vm1224_vm2, %v1087_v30 }
 0x3c6   : > { %1299 = vrot.lane.b32.xlu0 %v2407_v15, %s2082_s20  ;;  %1297 = vrot.lane.b32.xlu1 %v2435_v31, %s2081_s19 }
 0x3ca   : > { %1303 = vrot.lane.b32.xlu0 %v2407_v15, %s2079_s17  ;;  %1301 = vrot.lane.b32.xlu1 %v2435_v31, %s2082_s20 }
 0x3ce   : > { %1307 = vrot.lane.b32.xlu0 %v2407_v15, %s2083_s21  ;;  %1305 = vrot.lane.b32.xlu1 %v2435_v31, %s2079_s17 }
 0x3d2   : > { %1311 = vrot.lane.b32.xlu0 %v2407_v15, %s2084_s22  ;;  %1309 = vrot.lane.b32.xlu1 %v2435_v31, %s2083_s21 }
 0x3d6   : > { %1315 = vrot.lane.b32.xlu0 %v2407_v15, %s2085_s23  ;;  %1313 = vrot.lane.b32.xlu1 %v2435_v31, %s2084_s22 }
 0x3da   : > { %1317 = vrot.lane.b32.xlu1 %v2435_v31, %s2085_s23 }
 0x3dd   : > { %v879_v32 = vpop.permute.xlu1 %878 }
 0x3de   : > { %v938_v33 = vpack.i.b16 %v879_v32, %v2378_v60  ;;  %v941_v35 = vshrl.u32 %v879_v32, 16 }
 0x3e0   : > { %v942_v47 = vpack.i.b16 %v941_v35, %v940_v20  ;;  %v1088_v50 = vcombine.low %v922_v40, %v938_v33  ;;  %v1089_v28 = vcombine.high %v922_v40, %v938_v33 }
 0x3e1   : > { %v883_v37 = vpop.permute.xlu1 %882 }
 0x3e2   : > { %v948_v54 = vshrl.u32 %v883_v37, 16  ;;  %v1096_v36 = vrot.slane %v1088_v50, %v2366_v34  ;;  %v1103_v59 = vrot.slane %v1089_v28, %v2366_v34  ;;  %v1156_v39 = vcombine.low %v926_v55, %v942_v47 }
 0x3e3   : > { %v1157_v48 = vcombine.high %v926_v55, %v942_v47 }
 0x3e4   : > { %v1164_v4 = vrot.slane %v1156_v39, %v2366_v34 }
 0x3e5   : > { %v887_v52 = vpop.permute.xlu1 %886  ;;  %v1171_v9 = vrot.slane %v1157_v48, %v2366_v34 }
 0x3e6   : > { %v946_v29 = vpack.i.b16 %v887_v52, %v883_v37  ;;  %v949_v38 = vshrl.u32 %v887_v52, 16  ;;  %v1323_v52 = vshrl.u32 %v2407_v15, 16 }
 0x3e8   : > { %v950_v56 = vpack.i.b16 %v949_v38, %v948_v54  ;;  %v1104_v57 = vcombine.low %v930_v53, %v946_v29  ;;  %v1105_v58 = vcombine.high %v930_v53, %v946_v29  ;;  %v1355_v54 = vshrl.u32 %v2435_v31, 16 }
 0x3ea   : > { %v1112_v61 = vrot.slane %v1104_v57, %v2366_v34  ;;  %v1119_v60 = vrot.slane %v1105_v58, %v2366_v34  ;;  %v1172_v62 = vcombine.low %v934_v13, %v950_v56  ;;  %v1173_v23 = vcombine.high %v934_v13, %v950_v56 }
 0x3ec   : > { %v1120_v46 = vcombine.low %v1096_v36, %v1112_v61  ;;  %v1121_v49 = vcombine.high %v1096_v36, %v1112_v61  ;;  %v1136_v63 = vcombine.low %v1103_v59, %v1119_v60  ;;  %v1137_v1 = vcombine.high %v1103_v59, %v1119_v60 }
 0x3ed   : > { %v1180_v2 = vrot.slane %v1172_v62, %v2366_v34  ;;  %v1187_v3 = vrot.slane %v1173_v23, %v2366_v34 }
 0x3ee   : > { %v1128_v0 = vrot.slane %v1120_v46, %v2371_v21  ;;  %v1135_v5 = vrot.slane %v1121_v49, %v2371_v21  ;;  %v1144_v11 = vrot.slane %v1136_v63, %v2371_v21  ;;  %v1151_v25 = vrot.slane %v1137_v1, %v2371_v21 }
 0x3ef   : > { %v1188_v22 = vcombine.low %v1164_v4, %v1180_v2  ;;  %v1189_v6 = vcombine.high %v1164_v4, %v1180_v2  ;;  %v1204_v41 = vcombine.low %v1171_v9, %v1187_v3  ;;  %v1205_v51 = vcombine.high %v1171_v9, %v1187_v3 }
 0x3f0   : > { %v1152_v8 = vcombine.high %v1128_v0, %v2088_v7  ;;  %v1153_v10 = vcombine.high %v1135_v5, %v2088_v7  ;;  %v1154_v12 = vcombine.high %v1144_v11, %v2088_v7  ;;  %v1155_v14 = vcombine.high %v1151_v25, %v2088_v7  ;;  %1241 = vst.msk [vmem:[%s2385_s8 + $0x40] sm:$0xf] %vm1224_vm2, %v1128_v0 }
 0x3f1   : > { %1245 = vst.msk [vmem:[%s2385_s8 + $0x50] sm:$0xf] %vm1224_vm2, %v1135_v5  ;;  %1249 = vst.msk [vmem:[%s2385_s8 + $0x60] sm:$0xf] %vm1224_vm2, %v1144_v11  ;;  %v1196_v16 = vrot.slane %v1188_v22, %v2371_v21  ;;  %v1203_v17 = vrot.slane %v1189_v6, %v2371_v21  ;;  %v1212_v18 = vrot.slane %v1204_v41, %v2371_v21 }
 0x3f2   : > { %1253 = vst.msk [vmem:[%s2385_s8 + $0x70] sm:$0xf] %vm1224_vm2, %v1151_v25  ;;  %v1219_v19 = vrot.slane %v1205_v51, %v2371_v21  ;;  %1243 = vst.msk [vmem:[%s2385_s8 + $0x48] sm:$0xf] %vm1224_vm2, %v1152_v8 }
 0x3f3   : > { %1247 = vst.msk [vmem:[%s2385_s8 + $0x58] sm:$0xf] %vm1224_vm2, %v1153_v10  ;;  %1251 = vst.msk [vmem:[%s2385_s8 + $0x68] sm:$0xf] %vm1224_vm2, %v1154_v12  ;;  %v1220_v24 = vcombine.high %v1196_v16, %v2088_v7  ;;  %v1221_v26 = vcombine.high %v1203_v17, %v2088_v7  ;;  %v1222_v27 = vcombine.high %v1212_v18, %v2088_v7 }
 0x3f4   : > { %1255 = vst.msk [vmem:[%s2385_s8 + $0x78] sm:$0xf] %vm1224_vm2, %v1155_v14  ;;  %v1223_v30 = vcombine.high %v1219_v19, %v2088_v7  ;;  %1242 = vst.msk [vmem:[%s2385_s8 + $0x44] sm:$0xf] %vm1224_vm2, %v1196_v16 }
 0x3f5   : > { %1246 = vst.msk [vmem:[%s2385_s8 + $0x54] sm:$0xf] %vm1224_vm2, %v1203_v17  ;;  %1250 = vst.msk [vmem:[%s2385_s8 + $0x64] sm:$0xf] %vm1224_vm2, %v1212_v18 }
 0x3f6   : > { %1254 = vst.msk [vmem:[%s2385_s8 + $0x74] sm:$0xf] %vm1224_vm2, %v1219_v19  ;;  %1244 = vst.msk [vmem:[%s2385_s8 + $0x4c] sm:$0xf] %vm1224_vm2, %v1220_v24 }
 0x3f7   : > { %1248 = vst.msk [vmem:[%s2385_s8 + $0x5c] sm:$0xf] %vm1224_vm2, %v1221_v26  ;;  %1252 = vst.msk [vmem:[%s2385_s8 + $0x6c] sm:$0xf] %vm1224_vm2, %v1222_v27 }
 0x3f8   : > { %1256 = vst.msk [vmem:[%s2385_s8 + $0x7c] sm:$0xf] %vm1224_vm2, %v1223_v30 }
 0x430   : > { %v1292_v32 = vpop.permute.xlu0 %1291 }
 0x431   : > { %v1324_v43 = vshrl.u32 %v1292_v32, 16  ;;  %v1321_v55 = vpack.i.b16 %v1292_v32, %v2407_v15 }
 0x433   : > { %v1325_v13 = vpack.i.b16 %v1324_v43, %v1323_v52 }
 0x434   : > { %v1294_v33 = vpop.permute.xlu1 %1293  ;;  %v1296_v35 = vpop.permute.xlu0 %1295 }
 0x435   : > { %v1356_v47 = vshrl.u32 %v1294_v33, 16  ;;  %v1353_v58 = vpack.i.b16 %v1294_v33, %v2435_v31  ;;  %v1331_v59 = vshrl.u32 %v1296_v35, 16 }
 0x437   : > { %v2541_v36 = vpack.i.b16 %v1356_v47, %v1355_v54 }
 0x438   : > { %v1298_v37 = vpop.permute.xlu1 %1297  ;;  %v1300_v40 = vpop.permute.xlu0 %1299 }
 0x439   : > { %v1332_v29 = vshrl.u32 %v1300_v40, 16  ;;  %v1363_v23 = vshrl.u32 %v1298_v37, 16  ;;  %v1329_v46 = vpack.i.b16 %v1300_v40, %v1296_v35 }
 0x43b   : > { %v1333_v49 = vpack.i.b16 %v1332_v29, %v1331_v59 }
 0x43c   : > { %v1302_v42 = vpop.permute.xlu1 %1301  ;;  %v1304_v20 = vpop.permute.xlu0 %1303 }
 0x43d   : > { %v1339_v50 = vshrl.u32 %v1304_v20, 16  ;;  %v1364_v39 = vshrl.u32 %v1302_v42, 16  ;;  %v2543_v0 = vpack.i.b16 %v1302_v42, %v1298_v37 }
 0x43f   : > { %v2545_v25 = vpack.i.b16 %v1364_v39, %v1363_v23 }
 0x440   : > { %v1306_v44 = vpop.permute.xlu1 %1305  ;;  %v1308_v45 = vpop.permute.xlu0 %1307 }
 0x441   : > { %v1340_v28 = vshrl.u32 %v1308_v45, 16  ;;  %v1337_v53 = vpack.i.b16 %v1308_v45, %v1304_v20  ;;  %v1371_v1 = vshrl.u32 %v1306_v44, 16 }
 0x443   : > { %v1341_v38 = vpack.i.b16 %v1340_v28, %v1339_v50  ;;  %v1383_v48 = vcombine.low %v1321_v55, %v1337_v53  ;;  %v1384_v61 = vcombine.high %v1321_v55, %v1337_v53 }
 0x444   : > { %v1310_v56 = vpop.permute.xlu1 %1309  ;;  %v1312_v57 = vpop.permute.xlu0 %1311 }
 0x445   : > { %v1369_v60 = vpack.i.b16 %v1310_v56, %v1306_v44  ;;  %v1372_v62 = vshrl.u32 %v1310_v56, 16  ;;  %v1451_v63 = vcombine.low %v1325_v13, %v1341_v38  ;;  %v1452_v4 = vcombine.high %v1325_v13, %v1341_v38 }
 0x446   : > { %v1347_v31 = vshrl.u32 %v1312_v57, 16  ;;  %v1391_v22 = vrot.slane %v1383_v48, %v2366_v34  ;;  %v1398_v6 = vrot.slane %v1384_v61, %v2366_v34 }
 0x447   : > { %v1519_v15 = vcombine.low %v1353_v58, %v1369_v60  ;;  %v1520_v9 = vcombine.high %v1353_v58, %v1369_v60  ;;  %v2549_v41 = vpack.i.b16 %v1372_v62, %v1371_v1  ;;  %v1459_v51 = vrot.slane %v1451_v63, %v2366_v34 }
 0x448   : > { %v1314_v2 = vpop.permute.xlu1 %1313  ;;  %v1316_v3 = vpop.permute.xlu0 %1315  ;;  %v1466_v14 = vrot.slane %v1452_v4, %v2366_v34 }
 0x449   : > { %v1345_v5 = vpack.i.b16 %v1316_v3, %v1312_v57  ;;  %v1348_v11 = vshrl.u32 %v1316_v3, 16  ;;  %v2554_v16 = vrot.slane %v1519_v15, %v2366_v34  ;;  %v2557_v17 = vrot.slane %v1520_v9, %v2366_v34 }
 0x44a   : > { %v1379_v18 = vshrl.u32 %v1314_v2, 16  ;;  %v1587_v32 = vcombine.low %v2541_v36, %v2549_v41  ;;  %v1588_v33 = vcombine.high %v2541_v36, %v2549_v41 }
 0x44b   : > { %v1349_v8 = vpack.i.b16 %v1348_v11, %v1347_v31  ;;  %v1399_v10 = vcombine.low %v1329_v46, %v1345_v5  ;;  %v1400_v12 = vcombine.high %v1329_v46, %v1345_v5 }
 0x44c   : > { %v1318_v19 = vpop.permute.xlu1 %1317  ;;  %v1602_v31 = vrot.slane %v1588_v33, %v2366_v34 }
 0x44d   : > { %v1407_v24 = vrot.slane %v1399_v10, %v2366_v34  ;;  %v1414_v26 = vrot.slane %v1400_v12, %v2366_v34  ;;  %v1467_v27 = vcombine.low %v1333_v49, %v1349_v8  ;;  %v1468_v30 = vcombine.high %v1333_v49, %v1349_v8 }
 0x44e   : > { %v1377_v35 = vpack.i.b16 %v1318_v19, %v1314_v2  ;;  %v1380_v37 = vshrl.u32 %v1318_v19, 16 }
 0x44f   : > { %v1415_v40 = vcombine.low %v1391_v22, %v1407_v24  ;;  %v1416_v42 = vcombine.high %v1391_v22, %v1407_v24  ;;  %v1431_v20 = vcombine.low %v1398_v6, %v1414_v26  ;;  %v1432_v43 = vcombine.high %v1398_v6, %v1414_v26 }
 0x450   : > { %v1475_v44 = vrot.slane %v1467_v27, %v2366_v34  ;;  %v1482_v45 = vrot.slane %v1468_v30, %v2366_v34  ;;  %v1381_v47 = vpack.i.b16 %v1380_v37, %v1379_v18  ;;  %v1535_v50 = vcombine.low %v2543_v0, %v1377_v35 }
 0x451   : > { %v1423_v28 = vrot.slane %v1415_v40, %v2371_v21  ;;  %v1430_v52 = vrot.slane %v1416_v42, %v2371_v21  ;;  %v1439_v53 = vrot.slane %v1431_v20, %v2371_v21  ;;  %v1446_v54 = vrot.slane %v1432_v43, %v2371_v21 }
 0x452   : > { %v1483_v29 = vcombine.low %v1459_v51, %v1475_v44  ;;  %v1484_v38 = vcombine.high %v1459_v51, %v1475_v44  ;;  %v1499_v55 = vcombine.low %v1466_v14, %v1482_v45  ;;  %v1500_v13 = vcombine.high %v1466_v14, %v1482_v45 }
 0x453   : > { %v1447_v56 = vcombine.high %v1423_v28, %v2088_v7  ;;  %v1448_v57 = vcombine.high %v1430_v52, %v2088_v7  ;;  %v1449_v58 = vcombine.high %v1439_v53, %v2088_v7  ;;  %v1450_v36 = vcombine.high %v1446_v54, %v2088_v7  ;;  %1655 = vst.msk [vmem:[%s2570_s11] sm:$0xf] %vm1224_vm2, %v1423_v28 }
 0x454   : > { %1659 = vst.msk [vmem:[%s2570_s11 + $0x10] sm:$0xf] %vm1224_vm2, %v1430_v52  ;;  %1663 = vst.msk [vmem:[%s2570_s11 + $0x20] sm:$0xf] %vm1224_vm2, %v1439_v53  ;;  %v1491_v59 = vrot.slane %v1483_v29, %v2371_v21  ;;  %v1498_v39 = vrot.slane %v1484_v38, %v2371_v21  ;;  %v1507_v48 = vrot.slane %v1499_v55, %v2371_v21 }
 0x455   : > { %1667 = vst.msk [vmem:[%s2570_s11 + $0x30] sm:$0xf] %vm1224_vm2, %v1446_v54  ;;  %v1514_v61 = vrot.slane %v1500_v13, %v2371_v21  ;;  %1657 = vst.msk [vmem:[%s2570_s11 + $0x8] sm:$0xf] %vm1224_vm2, %v1447_v56  ;;  %v1536_v60 = vcombine.high %v2543_v0, %v1377_v35  ;;  %v1543_v62 = vrot.slane %v1535_v50, %v2366_v34 }
 0x456   : > { %1661 = vst.msk [vmem:[%s2570_s11 + $0x18] sm:$0xf] %vm1224_vm2, %v1448_v57  ;;  %1665 = vst.msk [vmem:[%s2570_s11 + $0x28] sm:$0xf] %vm1224_vm2, %v1449_v58  ;;  %v1603_v23 = vcombine.low %v2545_v25, %v1381_v47  ;;  %v1604_v46 = vcombine.high %v2545_v25, %v1381_v47  ;;  %v1515_v49 = vcombine.high %v1491_v59, %v2088_v7 }
 0x457   : > { %1669 = vst.msk [vmem:[%s2570_s11 + $0x38] sm:$0xf] %vm1224_vm2, %v1450_v36  ;;  %v1516_v63 = vcombine.high %v1498_v39, %v2088_v7  ;;  %v1517_v1 = vcombine.high %v1507_v48, %v2088_v7  ;;  %v1518_v4 = vcombine.high %v1514_v61, %v2088_v7  ;;  %1656 = vst.msk [vmem:[%s2570_s11 + $0x4] sm:$0xf] %vm1224_vm2, %v1491_v59 }
 0x458   : > { %1660 = vst.msk [vmem:[%s2570_s11 + $0x14] sm:$0xf] %vm1224_vm2, %v1498_v39  ;;  %1664 = vst.msk [vmem:[%s2570_s11 + $0x24] sm:$0xf] %vm1224_vm2, %v1507_v48  ;;  %v1550_v15 = vrot.slane %v1536_v60, %v2366_v34  ;;  %v1551_v9 = vcombine.low %v2554_v16, %v1543_v62  ;;  %v1552_v2 = vcombine.high %v2554_v16, %v1543_v62 }
 0x459   : > { %1668 = vst.msk [vmem:[%s2570_s11 + $0x34] sm:$0xf] %vm1224_vm2, %v1514_v61  ;;  %v1611_v3 = vrot.slane %v1603_v23, %v2366_v34  ;;  %v1595_v0 = vrot.slane %v1587_v32, %v2366_v34  ;;  %1658 = vst.msk [vmem:[%s2570_s11 + $0xc] sm:$0xf] %vm1224_vm2, %v1515_v49  ;;  %v1618_v5 = vrot.slane %v1604_v46, %v2366_v34 }
 0x45a   : > { %1662 = vst.msk [vmem:[%s2570_s11 + $0x1c] sm:$0xf] %vm1224_vm2, %v1516_v63  ;;  %1666 = vst.msk [vmem:[%s2570_s11 + $0x2c] sm:$0xf] %vm1224_vm2, %v1517_v1  ;;  %v1559_v11 = vrot.slane %v1551_v9, %v2371_v21  ;;  %v1566_v25 = vrot.slane %v1552_v2, %v2371_v21  ;;  %v1567_v22 = vcombine.low %v2557_v17, %v1550_v15 }
 0x45b   : > { %1670 = vst.msk [vmem:[%s2570_s11 + $0x3c] sm:$0xf] %vm1224_vm2, %v1518_v4  ;;  %v1568_v6 = vcombine.high %v2557_v17, %v1550_v15  ;;  %v1619_v41 = vcombine.low %v1595_v0, %v1611_v3  ;;  %v1620_v51 = vcombine.high %v1595_v0, %v1611_v3  ;;  %v1635_v8 = vcombine.low %v1602_v31, %v1618_v5 }
 0x45c   : > { %v1636_v10 = vcombine.high %v1602_v31, %v1618_v5  ;;  %v1575_v12 = vrot.slane %v1567_v22, %v2371_v21  ;;  %v1583_v14 = vcombine.high %v1559_v11, %v2088_v7  ;;  %v1584_v16 = vcombine.high %v1566_v25, %v2088_v7  ;;  %1671 = vst.msk [vmem:[%s2570_s11 + $0x40] sm:$0xf] %vm1224_vm2, %v1559_v11 }
 0x45d   : > { %v1582_v34 = vrot.slane %v1568_v6, %v2371_v21  ;;  %1675 = vst.msk [vmem:[%s2570_s11 + $0x50] sm:$0xf] %vm1224_vm2, %v1566_v25  ;;  %v1627_v17 = vrot.slane %v1619_v41, %v2371_v21  ;;  %v1634_v18 = vrot.slane %v1620_v51, %v2371_v21  ;;  %v1643_v19 = vrot.slane %v1635_v8, %v2371_v21 }
 0x45e   : > { %v1650_v24 = vrot.slane %v1636_v10, %v2371_v21  ;;  %v1585_v26 = vcombine.high %v1575_v12, %v2088_v7  ;;  %1673 = vst.msk [vmem:[%s2570_s11 + $0x48] sm:$0xf] %vm1224_vm2, %v1583_v14  ;;  %1677 = vst.msk [vmem:[%s2570_s11 + $0x58] sm:$0xf] %vm1224_vm2, %v1584_v16 }
 0x45f   : > { %v1586_v27 = vcombine.high %v1582_v34, %v2088_v7  ;;  %1679 = vst.msk [vmem:[%s2570_s11 + $0x60] sm:$0xf] %vm1224_vm2, %v1575_v12  ;;  %1683 = vst.msk [vmem:[%s2570_s11 + $0x70] sm:$0xf] %vm1224_vm2, %v1582_v34  ;;  %v1651_v30 = vcombine.high %v1627_v17, %v2088_v7  ;;  %v1652_v21 = vcombine.high %v1634_v18, %v2088_v7 }
 0x460   : > { %v1653_v32 = vcombine.high %v1643_v19, %v2088_v7  ;;  %v1654_v33 = vcombine.high %v1650_v24, %v2088_v7  ;;  %1672 = vst.msk [vmem:[%s2570_s11 + $0x44] sm:$0xf] %vm1224_vm2, %v1627_v17  ;;  %1676 = vst.msk [vmem:[%s2570_s11 + $0x54] sm:$0xf] %vm1224_vm2, %v1634_v18 }
 0x461   : > { %1680 = vst.msk [vmem:[%s2570_s11 + $0x64] sm:$0xf] %vm1224_vm2, %v1643_v19  ;;  %1684 = vst.msk [vmem:[%s2570_s11 + $0x74] sm:$0xf] %vm1224_vm2, %v1650_v24 }
 0x462   : > { %1681 = vst.msk [vmem:[%s2570_s11 + $0x68] sm:$0xf] %vm1224_vm2, %v1585_v26  ;;  %1685 = vst.msk [vmem:[%s2570_s11 + $0x78] sm:$0xf] %vm1224_vm2, %v1586_v27 }
 0x463   : > { %1674 = vst.msk [vmem:[%s2570_s11 + $0x4c] sm:$0xf] %vm1224_vm2, %v1651_v30  ;;  %1678 = vst.msk [vmem:[%s2570_s11 + $0x5c] sm:$0xf] %vm1224_vm2, %v1652_v21 }
 0x464   : > { %1682 = vst.msk [vmem:[%s2570_s11 + $0x6c] sm:$0xf] %vm1224_vm2, %v1653_v32  ;;  %1686 = vst.msk [vmem:[%s2570_s11 + $0x7c] sm:$0xf] %vm1224_vm2, %v1654_v33 }
 0x465 PF: > { %s18_s26 = sadd.s32 1, %s2075_s26   ;;  %s2701_s24 = smov %s2071_s25 }
 0x466   : > { %p15_p5 = scmp.ge.s32.totalorder %s18_s26, 4   ;;  %s2702_s25 = smov %s2704_s27 }
 0x468   :  { %17 = sbr.rel (!%p15_p5) target bundleno = 2 (0x2), region = 94 }

// kernel: pairwise_mixer_forward.3
= control target key start
LH: loop header
LB: loop body
LE: loop exit
PB: predicated region body
PF: predicated region fallthrough
CT: control target
= control target key end

     0   :  { %13 = vsyncpa [#allocation4], 0  ;;  %s5069_s0 = inlined_call_operand.vmem [shape: bf16[2,32,8,8], index: 0, kind: input, shape index: {}]   ;;  %s5070_s1 = inlined_call_operand.vmem [shape: bf16[2,32,8,8], index: 1, kind: input, shape index: {}]   ;;  %s5071_s2 = inlined_call_operand.vmem [shape: bf16[2,8,8,32], index: 2, kind: input, shape index: {}]   ;;  %s5072_s3 = inlined_call_operand.vmem [shape: f32[2,8,8,32], index: 3, kind: input, shape index: {}]   ;;  %s5073_s4 = inlined_call_operand.vmem [shape: f32[1,32], index: 4, kind: input, shape index: {}]   ;;  %s5074_s5 = inlined_call_operand.vmem [shape: f32[1,32], index: 5, kind: input, shape index: {}]   ;;  %s5075_s6 = inlined_call_operand.vmem [shape: f32[32,32], index: 6, kind: input, shape index: {}]   ;;  %s5076_s7 = inlined_call_operand.vmem [shape: f32[1,32], index: 7, kind: input, shape index: {}]   ;;  %s5077_s8 = inlined_call_operand.hbm [shape: f32[2,8,8,32], index: 8, kind: output, shape index: {}]  }
   0x1   :  { %15 = vsyncpa [#allocation4 + $0x1], 0  ;;  %s4324_s27 = smov 0   ;;  %s4326_s28 = smov 0  }
   0x2   :  { %s4328_s29 = smov 0   ;;  %s4330_s30 = smov 0  }
   0x3   :  { %s4332_s9 = smov 0   ;;  %s4334_s10 = smov 0  }
   0x4 LB: > { %s3730_s11 = sadd.s32 4294967295, %s4264_s10   ;;  %s3731_s12 = sadd.s32 4294967294, %s4264_s10   ;;  %s4264_s10 = sphi %s4334_s10, %s21_s10   ;;  %s4260_s9 = sphi %s4332_s9, %s5084_s9   ;;  %s4256_s30 = sphi %s4330_s30, %s5083_s30   ;;  %s4252_s29 = sphi %s4328_s29, %s5082_s29   ;;  %s4248_s28 = sphi %s4326_s28, %s5081_s28   ;;  %s4244_s27 = sphi %s4324_s27, %s5080_s27  }
   0x5   : > { %s33_s13 = sadd.s32 1, %s4260_s9  ;;  %s236_s14 = sadd.s32 1, %s4252_s29 }
   0x6   : > { %p35_p0 = scmp.ge.s32.totalorder %s33_s13, 2  ;;  %p246_p1 = scmp.ne.s32.totalorder %s4252_s29, %s4248_s28 }
   0x7   : > { %p247_p2 = scmp.eq.s32.totalorder %s3730_s11, 1  ;;  %p252_p3 = scmp.ne.s32.totalorder %s4248_s28, %s4244_s27 }
   0x8   : > { %s5086_s13 = smov (%p35_p0, %s33_s13), 0  ;;  %p253_p5 = scmp.eq.s32.totalorder %s3731_s12, 1 }
   0x9   : > { %p4364_p4 = por %p247_p2, %p246_p1  ;;  %s231_s16 = ssub.s32 %s4260_s9, %s5086_s13 }
   0xa   : > { %p3734_p6 = scmp.ge.s32.totalorder %s4264_s10, 1  ;;  %p234_p7 = scmp.eq.s32.totalorder %s231_s16, 0 }
   0xb   : > { %p4371_p8 = por %p253_p5, %p252_p3  ;;  %p328_p9 = scmp.lt.s32.totalorder %s4264_s10, 3 }
   0xc   : > { %s4377_s18 = scalar_select %p234_p7, %s4252_s29, %s236_s14  }
   0xd   : > { %p329_p10 = pnand %p3734_p6, %p328_p9 }
   0xe   : > { %p388_p11 = scmp.lt.s32.totalorder (!%p329_p10), %s4256_s30, 1  ;;  %s4270_s11 = smov (!%p329_p10), 16  }
   0xf   : > { %332 = sbr.rel (%p329_p10) target bundleno = 1264 (0x4f0), region = 52  ;;  %s4271_s12 = smov (!%p329_p10), 8  }
  0x10   : > { %s4272_s14 = smov (!%p329_p10), 24   ;;  %s4273_s16 = smov (!%p329_p10), 40  }
  0x11   : > { %s4275_s21 = smov (!%p329_p10), 48   ;;  %s4276_s22 = smov (!%p329_p10), 56  }
  0x14   : > { %v4266_v0 = vmov 0.0   ;;  %s4383_s19 = scalar_select %p388_p11, %s4256_s30, 1  ;;  %vm4267_vm0 = vmmov 0   ;;  %vm971_vm1 = vcmask 60416   ;;  %vm1072_vm2 = vcmask 1043456  }
  0x15   : > { %3892 = vmatprep.subr.bf16.mxu1 %v4266_v0  ;;  %3904 = vmatprep.subr.bf16.mxu0 %v4266_v0  ;;  %vm1068_vm3 = vcmask 64512   ;;  %vm3202_vm4 = vcmask 130048   ;;  %vm3207_vm5 = vcmask 195584   ;;  %vm3212_vm6 = vcmask 261120  }
  0x16   : > { %3894 = vmatprep.mubr.msk.bf16.mxu1 %vm4267_vm0, %v4266_v0  ;;  %3906 = vmatprep.mubr.msk.bf16.mxu0 %vm4267_vm0, %v4266_v0  ;;  %s3792_s20 = sshll.u32 %s4383_s19, 7  ;;  %vm3217_vm7 = vcmask 326656   ;;  %vm3222_vm8 = vcmask 392192   ;;  %vm3227_vm9 = vcmask 457728  }
  0x17   : > { %s4395_s23 = scalar_lea.vmem %s5070_s1, %s3792_s20  ;;  %s4438_s26 = scalar_lea.vmem %s5069_s0, %s3792_s20 }
  0x18   : > { %v427_v1 = vld [vmem:[%s4395_s23] sm:$0xf]  ;;  %v429_v2 = vld [vmem:[%s4395_s23 + $0x8] sm:$0xf]  ;;  %v428_v3 = vld [vmem:[%s4395_s23 + $0x4] sm:$0xf] }
  0x19   : > { %459 = vxpose.xlu0.c.b16.start.end [1/1] (short) (narrow) %v427_v1, 16  ;;  %491 = vxpose.xlu1.c.b16.start.end [1/1] (short) (narrow) %v429_v2, 16  ;;  %v430_v4 = vld [vmem:[%s4395_s23 + $0xc] sm:$0xf]  ;;  %v431_v5 = vld [vmem:[%s4395_s23 + $0x10] sm:$0xf] }
  0x1a   : > { %v432_v6 = vld [vmem:[%s4395_s23 + $0x14] sm:$0xf]  ;;  %v433_v7 = vld [vmem:[%s4395_s23 + $0x18] sm:$0xf]  ;;  %v434_v8 = vld [vmem:[%s4395_s23 + $0x1c] sm:$0xf] }
  0x1b   : > { %v435_v9 = vld [vmem:[%s4395_s23 + $0x20] sm:$0xf]  ;;  %v436_v10 = vld [vmem:[%s4395_s23 + $0x24] sm:$0xf]  ;;  %v437_v11 = vld [vmem:[%s4395_s23 + $0x28] sm:$0xf] }
  0x1c   : > { %v438_v12 = vld [vmem:[%s4395_s23 + $0x2c] sm:$0xf]  ;;  %v439_v13 = vld [vmem:[%s4395_s23 + $0x30] sm:$0xf]  ;;  %v440_v14 = vld [vmem:[%s4395_s23 + $0x34] sm:$0xf] }
  0x1d   : > { %475 = vxpose.xlu0.c.b16.start.end [1/1] (short) (narrow) %v428_v3, 16  ;;  %507 = vxpose.xlu1.c.b16.start.end [1/1] (short) (narrow) %v430_v4, 16  ;;  %v441_v15 = vld [vmem:[%s4395_s23 + $0x38] sm:$0xf]  ;;  %v442_v16 = vld [vmem:[%s4395_s23 + $0x3c] sm:$0xf] }
  0x1e   : > { %v443_v17 = vld [vmem:[%s4395_s23 + $0x40] sm:$0xf]  ;;  %v444_v18 = vld [vmem:[%s4395_s23 + $0x44] sm:$0xf]  ;;  %v445_v19 = vld [vmem:[%s4395_s23 + $0x48] sm:$0xf] }
  0x1f   : > { %v446_v20 = vld [vmem:[%s4395_s23 + $0x4c] sm:$0xf]  ;;  %v447_v21 = vld [vmem:[%s4395_s23 + $0x50] sm:$0xf]  ;;  %v448_v22 = vld [vmem:[%s4395_s23 + $0x54] sm:$0xf] }
  0x20   : > { %v449_v23 = vld [vmem:[%s4395_s23 + $0x58] sm:$0xf]  ;;  %v450_v24 = vld [vmem:[%s4395_s23 + $0x5c] sm:$0xf]  ;;  %v451_v25 = vld [vmem:[%s4395_s23 + $0x60] sm:$0xf] }
  0x21   : > { %523 = vxpose.xlu0.c.b16.start.end [1/1] (short) (narrow) %v431_v5, 16  ;;  %539 = vxpose.xlu1.c.b16.start.end [1/1] (short) (narrow) %v432_v6, 16  ;;  %v452_v26 = vld [vmem:[%s4395_s23 + $0x64] sm:$0xf]  ;;  %v453_v27 = vld [vmem:[%s4395_s23 + $0x68] sm:$0xf] }
  0x22   : > { %v454_v28 = vld [vmem:[%s4395_s23 + $0x6c] sm:$0xf]  ;;  %v455_v29 = vld [vmem:[%s4395_s23 + $0x70] sm:$0xf]  ;;  %v456_v30 = vld [vmem:[%s4395_s23 + $0x74] sm:$0xf] }
  0x23   : > { %v457_v31 = vld [vmem:[%s4395_s23 + $0x78] sm:$0xf]  ;;  %v458_v32 = vld [vmem:[%s4395_s23 + $0x7c] sm:$0xf]  ;;  %v1004_v43 = vld [vmem:[%s4438_s26] sm:$0xf] }
  0x24   : > { %v1006_v44 = vld [vmem:[%s4438_s26 + $0x8] sm:$0xf]  ;;  %v1005_v54 = vld [vmem:[%s4438_s26 + $0x4] sm:$0xf]  ;;  %v1008_v55 = vld [vmem:[%s4438_s26 + $0x10] sm:$0xf] }
  0x25   : > { %555 = vxpose.xlu0.c.b16.start.end [1/1] (short) (narrow) %v433_v7, 16  ;;  %571 = vxpose.xlu1.c.b16.start.end [1/1] (short) (narrow) %v434_v8, 16  ;;  %v1007_v2 = vld [vmem:[%s4438_s26 + $0xc] sm:$0xf]  ;;  %v1010_v3 = vld [vmem:[%s4438_s26 + $0x18] sm:$0xf] }
  0x26   : > { %s4274_s20 = smov 32  }
  0x29   : > { %587 = vxpose.xlu0.c.b16.start.end [1/1] (short) (narrow) %v435_v9, 16  ;;  %603 = vxpose.xlu1.c.b16.start.end [1/1] (short) (narrow) %v436_v10, 16 }
  0x2d   : > { %619 = vxpose.xlu0.c.b16.start.end [1/1] (short) (narrow) %v437_v11, 16  ;;  %635 = vxpose.xlu1.c.b16.start.end [1/1] (short) (narrow) %v438_v12, 16  ;;  %v1009_v12 = vld [vmem:[%s4438_s26 + $0x14] sm:$0xf] }
  0x31   : > { %651 = vxpose.xlu0.c.b16.start.end [1/1] (short) (narrow) %v439_v13, 16  ;;  %667 = vxpose.xlu1.c.b16.start.end [1/1] (short) (narrow) %v440_v14, 16  ;;  %v1012_v13 = vld [vmem:[%s4438_s26 + $0x20] sm:$0xf] }
  0x35   : > { %683 = vxpose.xlu0.c.b16.start.end [1/1] (short) (narrow) %v441_v15, 16  ;;  %699 = vxpose.xlu1.c.b16.start.end [1/1] (short) (narrow) %v442_v16, 16 }
  0x39   : > { %715 = vxpose.xlu0.c.b16.start.end [1/1] (short) (narrow) %v443_v17, 16  ;;  %731 = vxpose.xlu1.c.b16.start.end [1/1] (short) (narrow) %v444_v18, 16 }
  0x3d   : > { %747 = vxpose.xlu0.c.b16.start.end [1/1] (short) (narrow) %v445_v19, 16  ;;  %763 = vxpose.xlu1.c.b16.start.end [1/1] (short) (narrow) %v446_v20, 16 }
  0x41   : > { %779 = vxpose.xlu0.c.b16.start.end [1/1] (short) (narrow) %v447_v21, 16  ;;  %795 = vxpose.xlu1.c.b16.start.end [1/1] (short) (narrow) %v448_v22, 16  ;;  %v1011_v22 = vld [vmem:[%s4438_s26 + $0x1c] sm:$0xf] }
  0x45   : > { %811 = vxpose.xlu0.c.b16.start.end [1/1] (short) (narrow) %v449_v23, 16  ;;  %827 = vxpose.xlu1.c.b16.start.end [1/1] (short) (narrow) %v450_v24, 16  ;;  %v1014_v23 = vld [vmem:[%s4438_s26 + $0x28] sm:$0xf] }
  0x49   : > { %843 = vxpose.xlu0.c.b16.start.end [1/1] (short) (narrow) %v451_v25, 16  ;;  %859 = vxpose.xlu1.c.b16.start.end [1/1] (short) (narrow) %v452_v26, 16 }
  0x4d   : > { %875 = vxpose.xlu0.c.b16.start.end [1/1] (short) (narrow) %v453_v27, 16  ;;  %891 = vxpose.xlu1.c.b16.start.end [1/1] (short) (narrow) %v454_v28, 16 }
  0x51   : > { %907 = vxpose.xlu0.c.b16.start.end [1/1] (short) (narrow) %v455_v29, 16  ;;  %923 = vxpose.xlu1.c.b16.start.end [1/1] (short) (narrow) %v456_v30, 16 }
  0x55   : > { %939 = vxpose.xlu0.c.b16.start.end [1/1] (short) (narrow) %v457_v31, 16  ;;  %955 = vxpose.xlu1.c.b16.start.end [1/1] (short) (narrow) %v458_v32, 16  ;;  %v1013_v32 = vld [vmem:[%s4438_s26 + $0x24] sm:$0xf] }
  0x7b   : > { %v467_v33 = vpop.trf.xlu0  ;;  %v499_v34 = vpop.trf.xlu1 }
  0x7c   : > { %972 = vst.msk [vmem:[#allocation2] sm:$0xf] %vm971_vm1, %v467_v33  ;;  %974 = vst.msk [vmem:[#allocation2 + $0x8] sm:$0xf] %vm971_vm1, %v499_v34  ;;  %v1016_v33 = vld [vmem:[%s4438_s26 + $0x30] sm:$0xf] }
  0x7f   : > { %v483_v35 = vpop.trf.xlu0  ;;  %v515_v36 = vpop.trf.xlu1 }
  0x80   : > { %973 = vst.msk [vmem:[#allocation2 + $0x4] sm:$0xf] %vm971_vm1, %v483_v35  ;;  %975 = vst.msk [vmem:[#allocation2 + $0xc] sm:$0xf] %vm971_vm1, %v515_v36 }
  0x83   : > { %v1036_v37 = vld [vmem:[#allocation2] sm:$0xf]  ;;  %v1038_v38 = vld [vmem:[#allocation2 + $0x8] sm:$0xf]  ;;  %v531_v39 = vpop.trf.xlu0  ;;  %v547_v40 = vpop.trf.xlu1 }
  0x84   : > { %v1074_v41 = vsel %vm1072_vm2, %v1036_v37, 0  ;;  %v1166_v42 = vsel %vm1072_vm2, %v1038_v38, 0  ;;  %976 = vst.msk [vmem:[#allocation2 + $0x10] sm:$0xf] %vm971_vm1, %v531_v39  ;;  %977 = vst.msk [vmem:[#allocation2 + $0x14] sm:$0xf] %vm971_vm1, %v547_v40 }
  0x85   : > { %3893 = vmatpush3.bf16.msra.mxu1 %v1074_v41  ;;  %3905 = vmatpush3.bf16.msra.mxu0 %v1166_v42  ;;  %v1015_v42 = vld [vmem:[%s4438_s26 + $0x2c] sm:$0xf] }
  0x86   : > { %3898 = vmatprep.subr.bf16.mxu1 %v4266_v0  ;;  %3916 = vmatprep.subr.bf16.mxu0 %v4266_v0 }
  0x87   : > { %v1037_v45 = vld [vmem:[#allocation2 + $0x4] sm:$0xf]  ;;  %v563_v46 = vpop.trf.xlu0  ;;  %v579_v47 = vpop.trf.xlu1  ;;  %v1039_v49 = vld [vmem:[#allocation2 + $0xc] sm:$0xf] }
  0x88   : > { %3895 = vmatmul.mubr.msk.bf16.vlgmr.msra.gmra.mxu1 %vm1068_vm3, %v1004_v43  ;;  %v1120_v48 = vsel %vm1072_vm2, %v1037_v45, 0  ;;  %3907 = vmatmul.mubr.msk.bf16.vlgmr.msra.gmra.mxu0 %vm1068_vm3, %v1006_v44  ;;  %978 = vst.msk [vmem:[#allocation2 + $0x18] sm:$0xf] %vm971_vm1, %v563_v46  ;;  %979 = vst.msk [vmem:[#allocation2 + $0x1c] sm:$0xf] %vm971_vm1, %v579_v47  ;;  %v1212_v56 = vsel %vm1072_vm2, %v1039_v49, 0 }
  0x89   : > { %3899 = vmatpush3.bf16.msra.mxu1 %v1120_v48  ;;  %3900 = vmatprep.mubr.msk.bf16.mxu1 %vm4267_vm0, %v4266_v0  ;;  %v1018_v43 = vld [vmem:[%s4438_s26 + $0x38] sm:$0xf] }
  0x8a   : > { %3910 = vmatprep.subr.bf16.mxu1 %v4266_v0  ;;  %3918 = vmatprep.mubr.msk.bf16.mxu0 %vm4267_vm0, %v4266_v0 }
  0x8b   : > { %v1040_v50 = vld [vmem:[#allocation2 + $0x10] sm:$0xf]  ;;  %v595_v51 = vpop.trf.xlu0  ;;  %v611_v52 = vpop.trf.xlu1  ;;  %v1041_v61 = vld [vmem:[#allocation2 + $0x14] sm:$0xf] }
  0x8c   : > { %v1258_v53 = vsel %vm1072_vm2, %v1040_v50, 0  ;;  %980 = vst.msk [vmem:[#allocation2 + $0x20] sm:$0xf] %vm971_vm1, %v595_v51  ;;  %981 = vst.msk [vmem:[#allocation2 + $0x24] sm:$0xf] %vm971_vm1, %v611_v52  ;;  %v1304_v4 = vsel %vm1072_vm2, %v1041_v61, 0 }
  0x8d   : > { %3917 = vmatpush3.bf16.msra.mxu0 %v1258_v53  ;;  %v1017_v50 = vld [vmem:[%s4438_s26 + $0x34] sm:$0xf]  ;;  %v1020_v51 = vld [vmem:[%s4438_s26 + $0x40] sm:$0xf] }
  0x8e   : > { %3928 = vmatprep.subr.bf16.mxu0 %v4266_v0 }
  0x8f   : > { %v1042_v57 = vld [vmem:[#allocation2 + $0x18] sm:$0xf]  ;;  %v627_v58 = vpop.trf.xlu0  ;;  %v643_v59 = vpop.trf.xlu1  ;;  %v1043_v8 = vld [vmem:[#allocation2 + $0x1c] sm:$0xf] }
  0x90   : > { %3901 = vmatmul.mubr.msk.bf16.vlgmr.msra.gmra.mxu1 %vm1068_vm3, %v1005_v54  ;;  %3919 = vmatmul.mubr.msk.bf16.vlgmr.msra.gmra.mxu0 %vm1068_vm3, %v1008_v55  ;;  %v1350_v60 = vsel %vm1072_vm2, %v1042_v57, 0  ;;  %982 = vst.msk [vmem:[#allocation2 + $0x28] sm:$0xf] %vm971_vm1, %v627_v58  ;;  %983 = vst.msk [vmem:[#allocation2 + $0x2c] sm:$0xf] %vm971_vm1, %v643_v59  ;;  %v1396_v14 = vsel %vm1072_vm2, %v1043_v8, 0 }
  0x91   : > { %3911 = vmatpush3.bf16.msra.mxu1 %v1212_v56  ;;  %3912 = vmatprep.mubr.msk.bf16.mxu1 %vm4267_vm0, %v4266_v0  ;;  %v1019_v56 = vld [vmem:[%s4438_s26 + $0x3c] sm:$0xf]  ;;  %v1022_v57 = vld [vmem:[%s4438_s26 + $0x48] sm:$0xf] }
  0x92   : > { %3922 = vmatprep.subr.bf16.mxu1 %v4266_v0  ;;  %3929 = vmatpush3.bf16.msra.mxu0 %v1350_v60 }
  0x93   : > { %3930 = vmatprep.mubr.msk.bf16.mxu0 %vm4267_vm0, %v4266_v0  ;;  %3940 = vmatprep.subr.bf16.mxu0 %v4266_v0  ;;  %v659_v62 = vpop.trf.xlu0  ;;  %v675_v63 = vpop.trf.xlu1  ;;  %v1044_v1 = vld [vmem:[#allocation2 + $0x20] sm:$0xf]  ;;  %v1045_v18 = vld [vmem:[#allocation2 + $0x24] sm:$0xf] }
  0x94   : > { %984 = vst.msk [vmem:[#allocation2 + $0x30] sm:$0xf] %vm971_vm1, %v659_v62  ;;  %985 = vst.msk [vmem:[#allocation2 + $0x34] sm:$0xf] %vm971_vm1, %v675_v63  ;;  %v1442_v5 = vsel %vm1072_vm2, %v1044_v1, 0  ;;  %v1488_v24 = vsel %vm1072_vm2, %v1045_v18, 0 }
  0x95   : > { %v1021_v62 = vld [vmem:[%s4438_s26 + $0x44] sm:$0xf]  ;;  %v1024_v63 = vld [vmem:[%s4438_s26 + $0x50] sm:$0xf]  ;;  %v1030_v18 = vld [vmem:[%s4438_s26 + $0x68] sm:$0xf] }
  0x97   : > { %v691_v6 = vpop.trf.xlu0  ;;  %v707_v7 = vpop.trf.xlu1  ;;  %v1046_v11 = vld [vmem:[#allocation2 + $0x28] sm:$0xf]  ;;  %v1047_v28 = vld [vmem:[#allocation2 + $0x2c] sm:$0xf] }
  0x98   : > { %3913 = vmatmul.mubr.msk.bf16.vlgmr.msra.gmra.mxu1 %vm1068_vm3, %v1007_v2  ;;  %3931 = vmatmul.mubr.msk.bf16.vlgmr.msra.gmra.mxu0 %vm1068_vm3, %v1010_v3  ;;  %986 = vst.msk [vmem:[#allocation2 + $0x38] sm:$0xf] %vm971_vm1, %v691_v6  ;;  %987 = vst.msk [vmem:[#allocation2 + $0x3c] sm:$0xf] %vm971_vm1, %v707_v7  ;;  %v1534_v15 = vsel %vm1072_vm2, %v1046_v11, 0  ;;  %v1580_v34 = vsel %vm1072_vm2, %v1047_v28, 0 }
  0x99   : > { %3923 = vmatpush3.bf16.msra.mxu1 %v1304_v4  ;;  %3924 = vmatprep.mubr.msk.bf16.mxu1 %vm4267_vm0, %v4266_v0  ;;  %v1026_v6 = vld [vmem:[%s4438_s26 + $0x58] sm:$0xf]  ;;  %v1025_v11 = vld [vmem:[%s4438_s26 + $0x54] sm:$0xf]  ;;  %v1031_v28 = vld [vmem:[%s4438_s26 + $0x6c] sm:$0xf] }
  0x9a   : > { %3934 = vmatprep.subr.bf16.mxu1 %v4266_v0  ;;  %3941 = vmatpush3.bf16.msra.mxu0 %v1442_v5  ;;  %v1023_v5 = vld [vmem:[%s4438_s26 + $0x4c] sm:$0xf] }
  0x9b   : > { %3942 = vmatprep.mubr.msk.bf16.mxu0 %vm4267_vm0, %v4266_v0  ;;  %3952 = vmatprep.subr.bf16.mxu0 %v4266_v0  ;;  %v723_v9 = vpop.trf.xlu0  ;;  %v739_v10 = vpop.trf.xlu1  ;;  %v1048_v21 = vld [vmem:[#allocation2 + $0x30] sm:$0xf]  ;;  %v1049_v38 = vld [vmem:[#allocation2 + $0x34] sm:$0xf] }
  0x9c   : > { %988 = vst.msk [vmem:[#allocation2 + $0x40] sm:$0xf] %vm971_vm1, %v723_v9  ;;  %989 = vst.msk [vmem:[#allocation2 + $0x44] sm:$0xf] %vm971_vm1, %v739_v10  ;;  %v1626_v25 = vsel %vm1072_vm2, %v1048_v21, 0  ;;  %v1672_v44 = vsel %vm1072_vm2, %v1049_v38, 0 }
  0x9f   : > { %v755_v16 = vpop.trf.xlu0  ;;  %v771_v17 = vpop.trf.xlu1  ;;  %v1050_v31 = vld [vmem:[#allocation2 + $0x38] sm:$0xf]  ;;  %v1051_v48 = vld [vmem:[#allocation2 + $0x3c] sm:$0xf] }
  0xa0   : > { %3925 = vmatmul.mubr.msk.bf16.vlgmr.msra.gmra.mxu1 %vm1068_vm3, %v1009_v12  ;;  %3943 = vmatmul.mubr.msk.bf16.vlgmr.msra.gmra.mxu0 %vm1068_vm3, %v1012_v13  ;;  %990 = vst.msk [vmem:[#allocation2 + $0x48] sm:$0xf] %vm971_vm1, %v755_v16  ;;  %991 = vst.msk [vmem:[#allocation2 + $0x4c] sm:$0xf] %vm971_vm1, %v771_v17  ;;  %v1718_v35 = vsel %vm1072_vm2, %v1050_v31, 0  ;;  %v1764_v52 = vsel %vm1072_vm2, %v1051_v48, 0 }
  0xa1   : > { %3935 = vmatpush3.bf16.msra.mxu1 %v1396_v14  ;;  %3936 = vmatprep.mubr.msk.bf16.mxu1 %vm4267_vm0, %v4266_v0  ;;  %v1028_v12 = vld [vmem:[%s4438_s26 + $0x60] sm:$0xf]  ;;  %v1027_v17 = vld [vmem:[%s4438_s26 + $0x5c] sm:$0xf] }
  0xa2   : > { %3946 = vmatprep.subr.bf16.mxu1 %v4266_v0  ;;  %3953 = vmatpush3.bf16.msra.mxu0 %v1534_v15 }
  0xa3   : > { %3954 = vmatprep.mubr.msk.bf16.mxu0 %vm4267_vm0, %v4266_v0  ;;  %3964 = vmatprep.subr.bf16.mxu0 %v4266_v0  ;;  %v787_v19 = vpop.trf.xlu0  ;;  %v803_v20 = vpop.trf.xlu1  ;;  %v1052_v41 = vld [vmem:[#allocation2 + $0x40] sm:$0xf]  ;;  %v1053_v54 = vld [vmem:[#allocation2 + $0x44] sm:$0xf] }
  0xa4   : > { %992 = vst.msk [vmem:[#allocation2 + $0x50] sm:$0xf] %vm971_vm1, %v787_v19  ;;  %993 = vst.msk [vmem:[#allocation2 + $0x54] sm:$0xf] %vm971_vm1, %v803_v20  ;;  %v1810_v45 = vsel %vm1072_vm2, %v1052_v41, 0  ;;  %v1856_v58 = vsel %vm1072_vm2, %v1053_v54, 0 }
  0xa7   : > { %v819_v26 = vpop.trf.xlu0  ;;  %v835_v27 = vpop.trf.xlu1  ;;  %v1054_v49 = vld [vmem:[#allocation2 + $0x48] sm:$0xf]  ;;  %v1055_v60 = vld [vmem:[#allocation2 + $0x4c] sm:$0xf] }
  0xa8   : > { %3937 = vmatmul.mubr.msk.bf16.vlgmr.msra.gmra.mxu1 %vm1068_vm3, %v1011_v22  ;;  %3955 = vmatmul.mubr.msk.bf16.vlgmr.msra.gmra.mxu0 %vm1068_vm3, %v1014_v23  ;;  %994 = vst.msk [vmem:[#allocation2 + $0x58] sm:$0xf] %vm971_vm1, %v819_v26  ;;  %995 = vst.msk [vmem:[#allocation2 + $0x5c] sm:$0xf] %vm971_vm1, %v835_v27  ;;  %v1902_v53 = vsel %vm1072_vm2, %v1054_v49, 0  ;;  %v1948_v1 = vsel %vm1072_vm2, %v1055_v60, 0 }
  0xa9   : > { %3947 = vmatpush3.bf16.msra.mxu1 %v1488_v24  ;;  %3948 = vmatprep.mubr.msk.bf16.mxu1 %vm4267_vm0, %v4266_v0  ;;  %v1029_v23 = vld [vmem:[%s4438_s26 + $0x64] sm:$0xf]  ;;  %v1032_v24 = vld [vmem:[%s4438_s26 + $0x70] sm:$0xf] }
  0xaa   : > { %3958 = vmatprep.subr.bf16.mxu1 %v4266_v0  ;;  %3965 = vmatpush3.bf16.msra.mxu0 %v1626_v25 }
  0xab   : > { %3966 = vmatprep.mubr.msk.bf16.mxu0 %vm4267_vm0, %v4266_v0  ;;  %3976 = vmatprep.subr.bf16.mxu0 %v4266_v0  ;;  %v851_v29 = vpop.trf.xlu0  ;;  %v867_v30 = vpop.trf.xlu1  ;;  %v1056_v55 = vld [vmem:[#allocation2 + $0x50] sm:$0xf]  ;;  %v1057_v3 = vld [vmem:[#allocation2 + $0x54] sm:$0xf] }
  0xac   : > { %996 = vst.msk [vmem:[#allocation2 + $0x60] sm:$0xf] %vm971_vm1, %v851_v29  ;;  %997 = vst.msk [vmem:[#allocation2 + $0x64] sm:$0xf] %vm971_vm1, %v867_v30  ;;  %v1994_v59 = vsel %vm1072_vm2, %v1056_v55, 0  ;;  %v2040_v7 = vsel %vm1072_vm2, %v1057_v3, 0 }
  0xad   : > { %v1034_v29 = vld [vmem:[%s4438_s26 + $0x78] sm:$0xf] }
  0xaf   : > { %v883_v36 = vpop.trf.xlu0  ;;  %v899_v37 = vpop.trf.xlu1  ;;  %v1058_v61 = vld [vmem:[#allocation2 + $0x58] sm:$0xf]  ;;  %v1059_v9 = vld [vmem:[#allocation2 + $0x5c] sm:$0xf] }
  0xb0   : > { %3949 = vmatmul.mubr.msk.bf16.vlgmr.msra.gmra.mxu1 %vm1068_vm3, %v1013_v32  ;;  %3967 = vmatmul.mubr.msk.bf16.vlgmr.msra.gmra.mxu0 %vm1068_vm3, %v1016_v33  ;;  %998 = vst.msk [vmem:[#allocation2 + $0x68] sm:$0xf] %vm971_vm1, %v883_v36  ;;  %999 = vst.msk [vmem:[#allocation2 + $0x6c] sm:$0xf] %vm971_vm1, %v899_v37  ;;  %v2086_v2 = vsel %vm1072_vm2, %v1058_v61, 0  ;;  %v2132_v13 = vsel %vm1072_vm2, %v1059_v9, 0 }
  0xb1   : > { %3959 = vmatpush3.bf16.msra.mxu1 %v1580_v34  ;;  %3960 = vmatprep.mubr.msk.bf16.mxu1 %vm4267_vm0, %v4266_v0  ;;  %v1033_v32 = vld [vmem:[%s4438_s26 + $0x74] sm:$0xf]  ;;  %v1035_v34 = vld [vmem:[%s4438_s26 + $0x7c] sm:$0xf] }
  0xb2   : > { %3970 = vmatprep.subr.bf16.mxu1 %v4266_v0  ;;  %3977 = vmatpush3.bf16.msra.mxu0 %v1718_v35 }
  0xb3   : > { %3978 = vmatprep.mubr.msk.bf16.mxu0 %vm4267_vm0, %v4266_v0  ;;  %3988 = vmatprep.subr.bf16.mxu0 %v4266_v0  ;;  %v915_v39 = vpop.trf.xlu0  ;;  %v931_v40 = vpop.trf.xlu1  ;;  %v1060_v4 = vld [vmem:[#allocation2 + $0x60] sm:$0xf]  ;;  %v1061_v15 = vld [vmem:[#allocation2 + $0x64] sm:$0xf] }
  0xb4   : > { %1000 = vst.msk [vmem:[#allocation2 + $0x70] sm:$0xf] %vm971_vm1, %v915_v39  ;;  %1001 = vst.msk [vmem:[#allocation2 + $0x74] sm:$0xf] %vm971_vm1, %v931_v40  ;;  %v2178_v8 = vsel %vm1072_vm2, %v1060_v4, 0  ;;  %v2224_v19 = vsel %vm1072_vm2, %v1061_v15, 0 }
  0xb5   : > { %v4269_v4 = vmov 1934713408  }
  0xb7   : > { %v947_v46 = vpop.trf.xlu0  ;;  %v963_v47 = vpop.trf.xlu1  ;;  %v1062_v10 = vld [vmem:[#allocation2 + $0x68] sm:$0xf]  ;;  %v1063_v21 = vld [vmem:[#allocation2 + $0x6c] sm:$0xf] }
  0xb8   : > { %3961 = vmatmul.mubr.msk.bf16.vlgmr.msra.gmra.mxu1 %vm1068_vm3, %v1015_v42  ;;  %3979 = vmatmul.mubr.msk.bf16.vlgmr.msra.gmra.mxu0 %vm1068_vm3, %v1018_v43  ;;  %1002 = vst.msk [vmem:[#allocation2 + $0x78] sm:$0xf] %vm971_vm1, %v947_v46  ;;  %1003 = vst.msk [vmem:[#allocation2 + $0x7c] sm:$0xf] %vm971_vm1, %v963_v47  ;;  %v2270_v14 = vsel %vm1072_vm2, %v1062_v10, 0  ;;  %v2316_v25 = vsel %vm1072_vm2, %v1063_v21, 0 }
  0xb9   : > { %3971 = vmatpush3.bf16.msra.mxu1 %v1672_v44  ;;  %3972 = vmatprep.mubr.msk.bf16.mxu1 %vm4267_vm0, %v4266_v0 }
  0xba   : > { %3982 = vmatprep.subr.bf16.mxu1 %v4266_v0  ;;  %3989 = vmatpush3.bf16.msra.mxu0 %v1810_v45 }
  0xbb   : > { %3990 = vmatprep.mubr.msk.bf16.mxu0 %vm4267_vm0, %v4266_v0  ;;  %4000 = vmatprep.subr.bf16.mxu0 %v4266_v0  ;;  %v1064_v16 = vld [vmem:[#allocation2 + $0x70] sm:$0xf]  ;;  %v1065_v27 = vld [vmem:[#allocation2 + $0x74] sm:$0xf] }
  0xbc   : > { %v2362_v20 = vsel %vm1072_vm2, %v1064_v16, 0  ;;  %v2408_v30 = vsel %vm1072_vm2, %v1065_v27, 0 }
  0xbf   : > { %v1066_v22 = vld [vmem:[#allocation2 + $0x78] sm:$0xf]  ;;  %v1067_v31 = vld [vmem:[#allocation2 + $0x7c] sm:$0xf] }
  0xc0   : > { %3973 = vmatmul.mubr.msk.bf16.vlgmr.msra.gmra.mxu1 %vm1068_vm3, %v1017_v50  ;;  %3991 = vmatmul.mubr.msk.bf16.vlgmr.msra.gmra.mxu0 %vm1068_vm3, %v1020_v51  ;;  %v2454_v26 = vsel %vm1072_vm2, %v1066_v22, 0  ;;  %v2500_v33 = vsel %vm1072_vm2, %v1067_v31, 0 }
  0xc1   : > { %3983 = vmatpush3.bf16.msra.mxu1 %v1764_v52  ;;  %3984 = vmatprep.mubr.msk.bf16.mxu1 %vm4267_vm0, %v4266_v0 }
  0xc2   : > { %3994 = vmatprep.subr.bf16.mxu1 %v4266_v0  ;;  %4001 = vmatpush3.bf16.msra.mxu0 %v1902_v53 }
  0xc3   : > { %4002 = vmatprep.mubr.msk.bf16.mxu0 %vm4267_vm0, %v4266_v0  ;;  %4012 = vmatprep.subr.bf16.mxu0 %v4266_v0 }
  0xc8   : > { %3985 = vmatmul.mubr.msk.bf16.vlgmr.msra.gmra.mxu1 %vm1068_vm3, %v1019_v56  ;;  %4003 = vmatmul.mubr.msk.bf16.vlgmr.msra.gmra.mxu0 %vm1068_vm3, %v1022_v57  ;;  %v4268_v56 = vmov 1983009808  }
  0xc9   : > { %3995 = vmatpush3.bf16.msra.mxu1 %v1856_v58  ;;  %3996 = vmatprep.mubr.msk.bf16.mxu1 %vm4267_vm0, %v4266_v0  ;;  %v2545_v57 = vunpack.c.l.s4 %v4268_v56  ;;  %v2547_v58 = vlaneseq }
  0xca   : > { %4006 = vmatprep.subr.bf16.mxu1 %v4266_v0  ;;  %4013 = vmatpush3.bf16.msra.mxu0 %v1994_v59 }
  0xcb   : > { %4014 = vmatprep.mubr.msk.bf16.mxu0 %vm4267_vm0, %v4266_v0  ;;  %4024 = vmatprep.subr.bf16.mxu0 %v4266_v0 }
  0xd0   : > { %3997 = vmatmul.mubr.msk.bf16.vlgmr.msra.gmra.mxu1 %vm1068_vm3, %v1021_v62  ;;  %4015 = vmatmul.mubr.msk.bf16.vlgmr.msra.gmra.mxu0 %vm1068_vm3, %v1024_v63  ;;  %v2546_v63 = vunpack.c.0.s8 %v2545_v57 }
  0xd1   : > { %4007 = vmatpush3.bf16.msra.mxu1 %v1948_v1  ;;  %4008 = vmatprep.mubr.msk.bf16.mxu1 %vm4267_vm0, %v4266_v0  ;;  %v2548_v1 = vshrl.u32 %v2547_v58, 7 }
  0xd2   : > { %4018 = vmatprep.subr.bf16.mxu1 %v4266_v0  ;;  %4025 = vmatpush3.bf16.msra.mxu0 %v2086_v2 }
  0xd3   : > { %4026 = vmatprep.mubr.msk.bf16.mxu0 %vm4267_vm0, %v4266_v0  ;;  %4036 = vmatprep.subr.bf16.mxu0 %v4266_v0  ;;  %v4662_v10 = vsub.s32 %v2546_v63, %v2548_v1 }
  0xd8   : > { %4009 = vmatmul.mubr.msk.bf16.vlgmr.msra.gmra.mxu1 %vm1068_vm3, %v1023_v5  ;;  %4027 = vmatmul.mubr.msk.bf16.vlgmr.msra.gmra.mxu0 %vm1068_vm3, %v1026_v6  ;;  %v2609_v5 = vunpack.c.l.s4 %v4269_v4 }
  0xd9   : > { %4019 = vmatpush3.bf16.msra.mxu1 %v2040_v7  ;;  %4020 = vmatprep.mubr.msk.bf16.mxu1 %vm4267_vm0, %v4266_v0 }
  0xda   : > { %4030 = vmatprep.subr.bf16.mxu1 %v4266_v0  ;;  %4037 = vmatpush3.bf16.msra.mxu0 %v2178_v8  ;;  %v2610_v16 = vunpack.c.0.s8 %v2609_v5 }
  0xdb   : > { %4038 = vmatprep.mubr.msk.bf16.mxu0 %vm4267_vm0, %v4266_v0  ;;  %4048 = vmatprep.subr.bf16.mxu0 %v4266_v0 }
  0xe0   : > { %4021 = vmatmul.mubr.msk.bf16.vlgmr.msra.gmra.mxu1 %vm1068_vm3, %v1025_v11  ;;  %4039 = vmatmul.mubr.msk.bf16.vlgmr.msra.gmra.mxu0 %vm1068_vm3, %v1028_v12 }
  0xe1   : > { %4031 = vmatpush3.bf16.msra.mxu1 %v2132_v13  ;;  %4032 = vmatprep.mubr.msk.bf16.mxu1 %vm4267_vm0, %v4266_v0 }
  0xe2   : > { %4042 = vmatprep.subr.bf16.mxu1 %v4266_v0  ;;  %4049 = vmatpush3.bf16.msra.mxu0 %v2270_v14 }
  0xe3   : > { %4050 = vmatprep.mubr.msk.bf16.mxu0 %vm4267_vm0, %v4266_v0  ;;  %4060 = vmatprep.subr.bf16.mxu0 %v4266_v0 }
  0xe8   : > { %4033 = vmatmul.mubr.msk.bf16.vlgmr.msra.gmra.mxu1 %vm1068_vm3, %v1027_v17  ;;  %4051 = vmatmul.mubr.msk.bf16.vlgmr.msra.gmra.mxu0 %vm1068_vm3, %v1030_v18 }
  0xe9   : > { %4043 = vmatpush3.bf16.msra.mxu1 %v2224_v19  ;;  %4044 = vmatprep.mubr.msk.bf16.mxu1 %vm4267_vm0, %v4266_v0 }
  0xea   : > { %4054 = vmatprep.subr.bf16.mxu1 %v4266_v0  ;;  %4061 = vmatpush3.bf16.msra.mxu0 %v2362_v20 }
  0xeb   : > { %4062 = vmatprep.mubr.msk.bf16.mxu0 %vm4267_vm0, %v4266_v0  ;;  %4072 = vmatprep.subr.bf16.mxu0 %v4266_v0 }
  0xf0   : > { %4045 = vmatmul.mubr.msk.bf16.vlgmr.msra.gmra.mxu1 %vm1068_vm3, %v1029_v23  ;;  %4063 = vmatmul.mubr.msk.bf16.vlgmr.msra.gmra.mxu0 %vm1068_vm3, %v1032_v24 }
  0xf1   : > { %4055 = vmatpush3.bf16.msra.mxu1 %v2316_v25  ;;  %4056 = vmatprep.mubr.msk.bf16.mxu1 %vm4267_vm0, %v4266_v0 }
  0xf2   : > { %4066 = vmatprep.subr.bf16.mxu1 %v4266_v0  ;;  %4073 = vmatpush3.bf16.msra.mxu0 %v2454_v26 }
  0xf3   : > { %4074 = vmatprep.mubr.msk.bf16.mxu0 %vm4267_vm0, %v4266_v0 }
  0xf8   : > { %4057 = vmatmul.mubr.msk.bf16.vlgmr.msra.gmra.mxu1 %vm1068_vm3, %v1031_v28  ;;  %4075 = vmatmul.mubr.msk.bf16.vlgmr.msra.gmra.mxu0 %vm1068_vm3, %v1034_v29  ;;  %v4673_v29 = vsub.s32 %v2610_v16, %v2548_v1 }
  0xf9   : > { %4067 = vmatpush3.bf16.msra.mxu1 %v2408_v30  ;;  %4068 = vmatprep.mubr.msk.bf16.mxu1 %vm4267_vm0, %v4266_v0 }
  0xfa   : > { %4078 = vmatprep.subr.bf16.mxu1 %v4266_v0 }
 0x100   : > { %4069 = vmatmul.mubr.msk.bf16.vlgmr.msra.gmra.mxu1 %vm1068_vm3, %v1033_v32 }
 0x101   : > { %4079 = vmatpush3.bf16.msra.mxu1 %v2500_v33  ;;  %4080 = vmatprep.mubr.msk.bf16.mxu1 %vm4267_vm0, %v4266_v0 }
 0x108   : > { %4081 = vmatmul.mubr.msk.bf16.vlgmr.msra.gmra.mxu1 %vm1068_vm3, %v1035_v34 }
 0x148   : > { %v4654_v35 = vpop.f32.mrf.mxu1  ;;  %v4656_v36 = vpop.f32.mrf.mxu0 }
 0x149   : > { %v2542_v9 = vcombine.low %v4654_v35, %v4656_v36  ;;  %v2543_v18 = vcombine.high %v4654_v35, %v4656_v36 }
 0x14a   : > { %v3896_v37 = vpop.f32.mrf.mxu1  ;;  %v3908_v38 = vpop.f32.mrf.mxu0 }
 0x14b   : > { %v2550_v21 = vrot.slane %v2542_v9, %v4662_v10  ;;  %v2557_v34 = vrot.slane %v2543_v18, %v4662_v10 }
 0x14c   : > { %v1113_v39 = vpop.f32.mrf.mxu1  ;;  %v1205_v40 = vpop.f32.mrf.mxu0 }
 0x14e   : > { %v3897_v41 = vpop.f32.mrf.mxu1  ;;  %v3909_v42 = vpop.f32.mrf.mxu0 }
 0x150   : > { %v1156_v43 = vpop.f32.mrf.mxu1  ;;  %v1294_v44 = vpop.f32.mrf.mxu0 }
 0x152   : > { %v3902_v45 = vpop.f32.mrf.mxu1  ;;  %v3920_v46 = vpop.f32.mrf.mxu0 }
 0x154   : > { %v1159_v47 = vpop.f32.mrf.mxu1  ;;  %v1297_v48 = vpop.f32.mrf.mxu0 }
 0x156   : > { %v3903_v0 = vpop.f32.mrf.mxu1  ;;  %v3921_v49 = vpop.f32.mrf.mxu0 }
 0x158   : > { %v1248_v50 = vpop.f32.mrf.mxu1  ;;  %v1386_v51 = vpop.f32.mrf.mxu0 }
 0x159   : > { %v2558_v6 = vcombine.low %v1156_v43, %v1248_v50  ;;  %v2559_v11 = vcombine.high %v1156_v43, %v1248_v50  ;;  %v2574_v12 = vcombine.low %v1294_v44, %v1386_v51  ;;  %v2575_v13 = vcombine.high %v1294_v44, %v1386_v51 }
 0x15a   : > { %v3914_v52 = vpop.f32.mrf.mxu1  ;;  %v3932_v53 = vpop.f32.mrf.mxu0 }
 0x15b   : > { %v2566_v17 = vrot.slane %v2558_v6, %v4662_v10  ;;  %v2573_v24 = vrot.slane %v2559_v11, %v4662_v10  ;;  %v2582_v25 = vrot.slane %v2574_v12, %v4662_v10  ;;  %v2589_v26 = vrot.slane %v2575_v13, %v4662_v10 }
 0x15c   : > { %v1251_v54 = vpop.f32.mrf.mxu1  ;;  %v1389_v55 = vpop.f32.mrf.mxu0 }
 0x15d   : > { %v2606_v30 = vcombine.low %v2550_v21, %v2566_v17  ;;  %v2607_v31 = vcombine.high %v2550_v21, %v2566_v17  ;;  %v2622_v40 = vcombine.low %v2557_v34, %v2573_v24  ;;  %v2623_v63 = vcombine.high %v2557_v34, %v2573_v24 }
 0x15e   : > { %v3915_v59 = vpop.f32.mrf.mxu1  ;;  %v3933_v60 = vpop.f32.mrf.mxu0 }
 0x15f   : > { %v2621_v43 = vrot.slane %v2607_v31, %v4673_v29  ;;  %v4681_v45 = vrot.slane %v2606_v30, %v4673_v29  ;;  %v2630_v54 = vrot.slane %v2622_v40, %v4673_v29 }
 0x160   : > { %v1340_v61 = vpop.f32.mrf.mxu1  ;;  %v4658_v62 = vpop.f32.mrf.mxu0 }
 0x162   : > { %v3926_v2 = vpop.f32.mrf.mxu1  ;;  %v3944_v3 = vpop.f32.mrf.mxu0 }
 0x164   : > { %v1343_v7 = vpop.f32.mrf.mxu1  ;;  %v1481_v8 = vpop.f32.mrf.mxu0 }
 0x165   : > { %v2637_v7 = vrot.slane %v2623_v63, %v4673_v29 }
 0x166   : > { %v3927_v14 = vpop.f32.mrf.mxu1  ;;  %v3945_v15 = vpop.f32.mrf.mxu0 }
 0x168   : > { %v1432_v19 = vpop.f32.mrf.mxu1  ;;  %v4667_v20 = vpop.f32.mrf.mxu0 }
 0x169   : > { %v2590_v22 = vcombine.low %v1340_v61, %v1432_v19  ;;  %v2591_v23 = vcombine.high %v1340_v61, %v1432_v19  ;;  %v2679_v31 = vcombine.high %v4658_v62, %v4667_v20 }
 0x16a   : > { %v3938_v27 = vpop.f32.mrf.mxu1  ;;  %v3956_v28 = vpop.f32.mrf.mxu0 }
 0x16b   : > { %v2598_v32 = vrot.slane %v2590_v22, %v4662_v10  ;;  %v2605_v33 = vrot.slane %v2591_v23, %v4662_v10  ;;  %v2678_v23 = vcombine.low %v4658_v62, %v4667_v20  ;;  %v2693_v20 = vrot.slane %v2679_v31, %v4662_v10 }
 0x16c   : > { %v1435_v35 = vpop.f32.mrf.mxu1  ;;  %v1573_v36 = vpop.f32.mrf.mxu0 }
 0x16d   : > { %v2638_v37 = vcombine.low %v2582_v25, %v2598_v32  ;;  %v2639_v38 = vcombine.high %v2582_v25, %v2598_v32  ;;  %v2654_v39 = vcombine.low %v2589_v26, %v2605_v33  ;;  %v2655_v57 = vcombine.high %v2589_v26, %v2605_v33 }
 0x16e   : > { %v3939_v41 = vpop.f32.mrf.mxu1  ;;  %v3957_v42 = vpop.f32.mrf.mxu0  ;;  %v2686_v34 = vrot.slane %v2678_v23, %v4662_v10 }
 0x16f   : > { %v2653_v44 = vrot.slane %v2639_v38, %v4673_v29  ;;  %v4684_v46 = vrot.slane %v2638_v37, %v4673_v29  ;;  %v2662_v50 = vrot.slane %v2654_v39, %v4673_v29  ;;  %v2669_v4 = vrot.slane %v2655_v57, %v4673_v29 }
 0x170   : > { %v4686_v47 = vpop.f32.mrf.mxu1  ;;  %v4688_v48 = vpop.f32.mrf.mxu0 }
 0x171   : > { %v2672_v0 = vcombine.low %v2621_v43, %v2653_v44  ;;  %v2671_v49 = vcombine.high %v4681_v45, %v4684_v46  ;;  %v2670_v53 = vcombine.low %v4681_v45, %v4684_v46  ;;  %v2673_v58 = vcombine.high %v2621_v43, %v2653_v44 }
 0x172   : > { %v3950_v51 = vpop.f32.mrf.mxu1  ;;  %v3968_v52 = vpop.f32.mrf.mxu0  ;;  %v2675_v59 = vcombine.high %v2630_v54, %v2662_v50  ;;  %v2674_v3 = vcombine.low %v2630_v54, %v2662_v50  ;;  %v2676_v11 = vcombine.low %v2637_v7, %v2669_v4  ;;  %v2677_v16 = vcombine.high %v2637_v7, %v2669_v4 }
 0x173   : > { %3106 = vrot.lane.b32.xlu1 %v2672_v0, %s4270_s11  ;;  %3090 = vrot.lane.b32.xlu0 %v2671_v49, %s4271_s12 }
 0x174   : > { %v1527_v55 = vpop.f32.mrf.mxu1  ;;  %v1665_v56 = vpop.f32.mrf.mxu0 }
 0x176   : > { %v3951_v60 = vpop.f32.mrf.mxu1  ;;  %v3969_v61 = vpop.f32.mrf.mxu0 }
 0x177   : > { %3122 = vrot.lane.b32.xlu1 %v2673_v58, %s4272_s14  ;;  %3154 = vrot.lane.b32.xlu0 %v2675_v59, %s4273_s16 }
 0x178   : > { %v1616_v1 = vpop.f32.mrf.mxu1  ;;  %v1754_v2 = vpop.f32.mrf.mxu0 }
 0x179   : > { %v2694_v19 = vcombine.low %v4686_v47, %v1616_v1  ;;  %v2695_v24 = vcombine.high %v4686_v47, %v1616_v1  ;;  %v2710_v25 = vcombine.low %v4688_v48, %v1754_v2  ;;  %v2711_v26 = vcombine.high %v4688_v48, %v1754_v2 }
 0x17a   : > { %v3962_v5 = vpop.f32.mrf.mxu1  ;;  %v3980_v6 = vpop.f32.mrf.mxu0 }
 0x17b   : > { %3138 = vrot.lane.b32.xlu1 %v2674_v3, %s4274_s20  ;;  %v2702_v30 = vrot.slane %v2694_v19, %v4662_v10  ;;  %v2709_v37 = vrot.slane %v2695_v24, %v4662_v10  ;;  %v2718_v38 = vrot.slane %v2710_v25, %v4662_v10  ;;  %v2725_v39 = vrot.slane %v2711_v26, %v4662_v10 }
 0x17c   : > { %v1619_v8 = vpop.f32.mrf.mxu1  ;;  %v1757_v9 = vpop.f32.mrf.mxu0 }
 0x17d   : > { %v2742_v42 = vcombine.low %v2686_v34, %v2702_v30  ;;  %v2743_v43 = vcombine.high %v2686_v34, %v2702_v30  ;;  %v2758_v51 = vcombine.low %v2693_v20, %v2709_v37  ;;  %v2759_v6 = vcombine.high %v2693_v20, %v2709_v37 }
 0x17e   : > { %v3963_v12 = vpop.f32.mrf.mxu1  ;;  %v3981_v13 = vpop.f32.mrf.mxu0 }
 0x17f   : > { %3170 = vrot.lane.b32.xlu1 %v2676_v11, %s4275_s21  ;;  %v2757_v55 = vrot.slane %v2743_v43, %v4673_v29  ;;  %v4728_v57 = vrot.slane %v2742_v42, %v4673_v29  ;;  %v2766_v7 = vrot.slane %v2758_v51, %v4673_v29 }
 0x180   : > { %v1708_v14 = vpop.f32.mrf.mxu1  ;;  %v4704_v15 = vpop.f32.mrf.mxu0 }
 0x182   : > { %v3974_v17 = vpop.f32.mrf.mxu1  ;;  %v3992_v18 = vpop.f32.mrf.mxu0 }
 0x183   : > { %3186 = vrot.lane.b32.xlu1 %v2677_v16, %s4276_s22  ;;  %v2773_v17 = vrot.slane %v2759_v6, %v4673_v29 }
 0x184   : > { %v1711_v21 = vpop.f32.mrf.mxu1  ;;  %v1849_v22 = vpop.f32.mrf.mxu0 }
 0x186   : > { %v3975_v27 = vpop.f32.mrf.mxu1  ;;  %v3993_v28 = vpop.f32.mrf.mxu0 }
 0x188   : > { %v1800_v32 = vpop.f32.mrf.mxu1  ;;  %v4716_v33 = vpop.f32.mrf.mxu0 }
 0x189   : > { %v2726_v35 = vcombine.low %v1708_v14, %v1800_v32  ;;  %v2727_v36 = vcombine.high %v1708_v14, %v1800_v32  ;;  %v2815_v20 = vcombine.high %v4704_v15, %v4716_v33 }
 0x18a   : > { %v3986_v40 = vpop.f32.mrf.mxu1  ;;  %v4004_v41 = vpop.f32.mrf.mxu0 }
 0x18b   : > { %v2734_v44 = vrot.slane %v2726_v35, %v4662_v10  ;;  %v2741_v62 = vrot.slane %v2727_v36, %v4662_v10 }
 0x18c   : > { %v1803_v47 = vpop.f32.mrf.mxu1  ;;  %v1941_v48 = vpop.f32.mrf.mxu0 }
 0x18d   : > { %v2774_v0 = vcombine.low %v2718_v38, %v2734_v44  ;;  %v2775_v49 = vcombine.high %v2718_v38, %v2734_v44  ;;  %v2790_v50 = vcombine.low %v2725_v39, %v2741_v62  ;;  %v2791_v61 = vcombine.high %v2725_v39, %v2741_v62 }
 0x18e   : > { %v3987_v52 = vpop.f32.mrf.mxu1  ;;  %v4005_v54 = vpop.f32.mrf.mxu0  ;;  %v2814_v39 = vcombine.low %v4704_v15, %v4716_v33  ;;  %v2829_v33 = vrot.slane %v2815_v20, %v4662_v10 }
 0x18f   : > { %v2789_v56 = vrot.slane %v2775_v49, %v4673_v29  ;;  %v4731_v58 = vrot.slane %v2774_v0, %v4673_v29  ;;  %v2798_v2 = vrot.slane %v2790_v50, %v4673_v29  ;;  %v2805_v13 = vrot.slane %v2791_v61, %v4673_v29 }
 0x190   : > { %v1892_v59 = vpop.f32.mrf.mxu1  ;;  %v2030_v60 = vpop.f32.mrf.mxu0  ;;  %v2822_v0 = vrot.slane %v2814_v39, %v4662_v10 }
 0x191   : > { %v2808_v63 = vcombine.low %v2757_v55, %v2789_v56  ;;  %v2807_v1 = vcombine.high %v4728_v57, %v4731_v58  ;;  %v2806_v5 = vcombine.low %v4728_v57, %v4731_v58  ;;  %v2810_v11 = vcombine.low %v2766_v7, %v2798_v2 }
 0x192   : > { %v3998_v3 = vpop.f32.mrf.mxu1  ;;  %v4016_v4 = vpop.f32.mrf.mxu0  ;;  %v2809_v12 = vcombine.high %v2757_v55, %v2789_v56  ;;  %v2811_v21 = vcombine.high %v2766_v7, %v2798_v2  ;;  %v2813_v22 = vcombine.high %v2773_v17, %v2805_v13  ;;  %v2812_v27 = vcombine.low %v2773_v17, %v2805_v13 }
 0x193   : > { %3108 = vrot.lane.b32.xlu0 %v2808_v63, %s4270_s11  ;;  %3092 = vrot.lane.b32.xlu1 %v2807_v1, %s4271_s12 }
 0x194   : > { %v1895_v8 = vpop.f32.mrf.mxu1  ;;  %v2033_v9 = vpop.f32.mrf.mxu0 }
 0x196   : > { %v3999_v14 = vpop.f32.mrf.mxu1  ;;  %v4017_v16 = vpop.f32.mrf.mxu0 }
 0x197   : > { %3140 = vrot.lane.b32.xlu0 %v2810_v11, %s4274_s20  ;;  %3124 = vrot.lane.b32.xlu1 %v2809_v12, %s4272_s14 }
 0x198   : > { %v1984_v18 = vpop.f32.mrf.mxu1  ;;  %v2122_v19 = vpop.f32.mrf.mxu0 }
 0x199   : > { %v2830_v36 = vcombine.low %v1892_v59, %v1984_v18  ;;  %v2831_v40 = vcombine.high %v1892_v59, %v1984_v18  ;;  %v2846_v41 = vcombine.low %v2030_v60, %v2122_v19  ;;  %v2847_v42 = vcombine.high %v2030_v60, %v2122_v19 }
 0x19a   : > { %v4010_v23 = vpop.f32.mrf.mxu1  ;;  %v4028_v24 = vpop.f32.mrf.mxu0 }
 0x19b   : > { %3156 = vrot.lane.b32.xlu0 %v2811_v21, %s4273_s16  ;;  %3188 = vrot.lane.b32.xlu1 %v2813_v22, %s4276_s22  ;;  %v2838_v62 = vrot.slane %v2830_v36, %v4662_v10  ;;  %v2845_v51 = vrot.slane %v2831_v40, %v4662_v10  ;;  %v2854_v52 = vrot.slane %v2846_v41, %v4662_v10 }
 0x19c   : > { %v1987_v25 = vpop.f32.mrf.mxu1  ;;  %v2125_v26 = vpop.f32.mrf.mxu0  ;;  %v2861_v54 = vrot.slane %v2847_v42, %v4662_v10 }
 0x19d   : > { %v2878_v59 = vcombine.low %v2822_v0, %v2838_v62  ;;  %v2879_v60 = vcombine.high %v2822_v0, %v2838_v62  ;;  %v2894_v6 = vcombine.low %v2829_v33, %v2845_v51 }
 0x19e   : > { %v4011_v28 = vpop.f32.mrf.mxu1  ;;  %v4029_v30 = vpop.f32.mrf.mxu0 }
 0x19f   : > { %3172 = vrot.lane.b32.xlu0 %v2812_v27, %s4275_s21  ;;  %v2893_v9 = vrot.slane %v2879_v60, %v4673_v29  ;;  %v4767_v12 = vrot.slane %v2878_v59, %v4673_v29  ;;  %v2902_v24 = vrot.slane %v2894_v6, %v4673_v29 }
 0x1a0   : > { %v2076_v31 = vpop.f32.mrf.mxu1  ;;  %v4748_v32 = vpop.f32.mrf.mxu0 }
 0x1a2   : > { %v4022_v34 = vpop.f32.mrf.mxu1  ;;  %v4040_v35 = vpop.f32.mrf.mxu0 }
 0x1a3   : > { %v2895_v35 = vcombine.high %v2829_v33, %v2845_v51 }
 0x1a4   : > { %v2079_v37 = vpop.f32.mrf.mxu1  ;;  %v2217_v38 = vpop.f32.mrf.mxu0 }
 0x1a5   : > { %v2909_v42 = vrot.slane %v2895_v35, %v4673_v29 }
 0x1a6   : > { %v4023_v43 = vpop.f32.mrf.mxu1  ;;  %v4041_v44 = vpop.f32.mrf.mxu0 }
 0x1a8   : > { %v2168_v47 = vpop.f32.mrf.mxu1  ;;  %v4755_v48 = vpop.f32.mrf.mxu0 }
 0x1a9   : > { %v2862_v49 = vcombine.low %v2076_v31, %v2168_v47  ;;  %v2863_v50 = vcombine.high %v2076_v31, %v2168_v47 }
 0x1aa   : > { %v4034_v55 = vpop.f32.mrf.mxu1  ;;  %v4052_v56 = vpop.f32.mrf.mxu0 }
 0x1ab   : > { %v2870_v61 = vrot.slane %v2862_v49, %v4662_v10  ;;  %v2877_v15 = vrot.slane %v2863_v50, %v4662_v10 }
 0x1ac   : > { %v2171_v63 = vpop.f32.mrf.mxu1  ;;  %v2309_v1 = vpop.f32.mrf.mxu0 }
 0x1ad   : > { %v2910_v2 = vcombine.low %v2854_v52, %v2870_v61  ;;  %v2911_v3 = vcombine.high %v2854_v52, %v2870_v61  ;;  %v2926_v4 = vcombine.low %v2861_v54, %v2877_v15  ;;  %v2927_v27 = vcombine.high %v2861_v54, %v2877_v15 }
 0x1ae   : > { %v4035_v7 = vpop.f32.mrf.mxu1  ;;  %v4053_v8 = vpop.f32.mrf.mxu0  ;;  %v2950_v54 = vcombine.low %v4748_v32, %v4755_v48  ;;  %v2951_v15 = vcombine.high %v4748_v32, %v4755_v48 }
 0x1af   : > { %v2925_v11 = vrot.slane %v2911_v3, %v4673_v29  ;;  %v4770_v13 = vrot.slane %v2910_v2, %v4673_v29  ;;  %v2934_v19 = vrot.slane %v2926_v4, %v4673_v29  ;;  %v2941_v39 = vrot.slane %v2927_v27, %v4673_v29 }
 0x1b0   : > { %v2260_v14 = vpop.f32.mrf.mxu1  ;;  %v2398_v16 = vpop.f32.mrf.mxu0  ;;  %v2958_v63 = vrot.slane %v2950_v54, %v4662_v10  ;;  %v2965_v32 = vrot.slane %v2951_v15, %v4662_v10 }
 0x1b1   : > { %v2944_v17 = vcombine.low %v2893_v9, %v2925_v11  ;;  %v2943_v18 = vcombine.high %v4767_v12, %v4770_v13  ;;  %v2942_v23 = vcombine.low %v4767_v12, %v4770_v13  ;;  %v2945_v28 = vcombine.high %v2893_v9, %v2925_v11 }
 0x1b2   : > { %v4046_v21 = vpop.f32.mrf.mxu1  ;;  %v4064_v22 = vpop.f32.mrf.mxu0  ;;  %v2947_v30 = vcombine.high %v2902_v24, %v2934_v19  ;;  %v2946_v38 = vcombine.low %v2902_v24, %v2934_v19  ;;  %v2948_v62 = vcombine.low %v2909_v42, %v2941_v39  ;;  %v2949_v49 = vcombine.high %v2909_v42, %v2941_v39 }
 0x1b3   : > { %3110 = vrot.lane.b32.xlu1 %v2944_v17, %s4270_s11  ;;  %3094 = vrot.lane.b32.xlu0 %v2943_v18, %s4271_s12 }
 0x1b4   : > { %v2263_v25 = vpop.f32.mrf.mxu1  ;;  %v2401_v26 = vpop.f32.mrf.mxu0 }
 0x1b6   : > { %v4047_v31 = vpop.f32.mrf.mxu1  ;;  %v4065_v34 = vpop.f32.mrf.mxu0 }
 0x1b7   : > { %3126 = vrot.lane.b32.xlu1 %v2945_v28, %s4272_s14  ;;  %3158 = vrot.lane.b32.xlu0 %v2947_v30, %s4273_s16 }
 0x1b8   : > { %v2352_v36 = vpop.f32.mrf.mxu1  ;;  %v2490_v37 = vpop.f32.mrf.mxu0 }
 0x1b9   : > { %v2966_v51 = vcombine.low %v2260_v14, %v2352_v36  ;;  %v2967_v55 = vcombine.high %v2260_v14, %v2352_v36  ;;  %v2982_v56 = vcombine.low %v2398_v16, %v2490_v37  ;;  %v2983_v59 = vcombine.high %v2398_v16, %v2490_v37 }
 0x1ba   : > { %v4058_v40 = vpop.f32.mrf.mxu1  ;;  %v4076_v41 = vpop.f32.mrf.mxu0 }
 0x1bb   : > { %3142 = vrot.lane.b32.xlu1 %v2946_v38, %s4274_s20  ;;  %v2974_v61 = vrot.slane %v2966_v51, %v4662_v10  ;;  %v2981_v3 = vrot.slane %v2967_v55, %v4662_v10  ;;  %v2990_v4 = vrot.slane %v2982_v56, %v4662_v10  ;;  %v2997_v6 = vrot.slane %v2983_v59, %v4662_v10 }
 0x1bc   : > { %v2355_v43 = vpop.f32.mrf.mxu1  ;;  %v2493_v44 = vpop.f32.mrf.mxu0 }
 0x1bd   : > { %v3014_v8 = vcombine.low %v2958_v63, %v2974_v61  ;;  %v3015_v9 = vcombine.high %v2958_v63, %v2974_v61  ;;  %v3031_v19 = vcombine.high %v2965_v32, %v2981_v3  ;;  %v3030_v34 = vcombine.low %v2965_v32, %v2981_v3 }
 0x1be   : > { %v4059_v20 = vpop.f32.mrf.mxu1  ;;  %v4077_v47 = vpop.f32.mrf.mxu0 }
 0x1bf   : > { %3174 = vrot.lane.b32.xlu1 %v2948_v62, %s4275_s21  ;;  %v3029_v22 = vrot.slane %v3015_v9, %v4673_v29  ;;  %v4802_v25 = vrot.slane %v3014_v8, %v4673_v29  ;;  %v3045_v35 = vrot.slane %v3031_v19, %v4673_v29  ;;  %v3038_v39 = vrot.slane %v3030_v34, %v4673_v29 }
 0x1c0   : > { %v2444_v0 = vpop.f32.mrf.mxu1 }
 0x1c2   : > { %v4070_v50 = vpop.f32.mrf.mxu1 }
 0x1c3   : > { %3190 = vrot.lane.b32.xlu1 %v2949_v49, %s4276_s22 }
 0x1c4   : > { %v2447_v52 = vpop.f32.mrf.mxu1 }
 0x1c6   : > { %v4071_v60 = vpop.f32.mrf.mxu1 }
 0x1c8   : > { %v2536_v33 = vpop.f32.mrf.mxu1 }
 0x1c9   : > { %v2998_v1 = vcombine.low %v2444_v0, %v2536_v33  ;;  %v2999_v2 = vcombine.high %v2444_v0, %v2536_v33 }
 0x1ca   : > { %v4082_v7 = vpop.f32.mrf.mxu1 }
 0x1cb   : > { %v3006_v11 = vrot.slane %v2998_v1, %v4662_v10  ;;  %v3013_v14 = vrot.slane %v2999_v2, %v4662_v10 }
 0x1cc   : > { %v2539_v48 = vpop.f32.mrf.mxu1 }
 0x1cd   : > { %v3046_v16 = vcombine.low %v2990_v4, %v3006_v11  ;;  %v3047_v17 = vcombine.high %v2990_v4, %v3006_v11  ;;  %v3063_v18 = vcombine.high %v2997_v6, %v3013_v14  ;;  %v3062_v27 = vcombine.low %v2997_v6, %v3013_v14 }
 0x1ce   : > { %v4083_v21 = vpop.f32.mrf.mxu1 }
 0x1cf   : > { %v3061_v24 = vrot.slane %v3047_v17, %v4673_v29  ;;  %v4805_v26 = vrot.slane %v3046_v16, %v4673_v29  ;;  %v3077_v30 = vrot.slane %v3063_v18, %v4673_v29  ;;  %v3070_v38 = vrot.slane %v3062_v27, %v4673_v29 }
 0x1d1   : > { %v3081_v28 = vcombine.high %v3029_v22, %v3061_v24  ;;  %v3079_v10 = vcombine.high %v4802_v25, %v4805_v26  ;;  %v3078_v31 = vcombine.low %v4802_v25, %v4805_v26  ;;  %v3085_v36 = vcombine.high %v3045_v35, %v3077_v30 }
 0x1d2   : > { %v3080_v37 = vcombine.low %v3029_v22, %v3061_v24  ;;  %v3082_v40 = vcombine.low %v3038_v39, %v3070_v38  ;;  %v3083_v41 = vcombine.high %v3038_v39, %v3070_v38  ;;  %v3084_v42 = vcombine.low %v3045_v35, %v3077_v30 }
 0x1d3   : > { %3128 = vrot.lane.b32.xlu1 %v3081_v28, %s4272_s14  ;;  %3096 = vrot.lane.b32.xlu0 %v3079_v10, %s4271_s12 }
 0x1d7   : > { %3192 = vrot.lane.b32.xlu1 %v3085_v36, %s4276_s22  ;;  %3112 = vrot.lane.b32.xlu0 %v3080_v37, %s4270_s11  ;;  %s3796_s11 = sshll.u32 %s4256_s30, 10 }
 0x1d8   : > { %s5013_s22 = scalar_lea.hbm %s5077_s8, %s3796_s11 }
 0x1db   : > { %3144 = vrot.lane.b32.xlu0 %v3082_v40, %s4274_s20  ;;  %s385_s20 = sand.u32 1, %s4248_s28  }
 0x1dc   : > { %s3735_s26 = sshll.u32 %s385_s20, 6  ;;  %s5023_s30 = scalar_lea.sflag [#allocation4], %s385_s20 }
 0x1df   : > { %3160 = vrot.lane.b32.xlu0 %v3083_v41, %s4273_s16  ;;  %s3795_s16 = sshll.u32 %s4383_s19, 6 }
 0x1e0   : > { %s4979_s23 = scalar_lea.vmem %s5072_s3, %s3795_s16 }
 0x1e3   : > { %3176 = vrot.lane.b32.xlu0 %v3084_v42, %s4275_s21  ;;  %s3794_s21 = sshll.u32 %s4383_s19, 5  ;;  %s4988_s19 = scalar_lea.vmem [#allocation3], %s3735_s26 }
 0x1e4   : > { %s4926_s24 = scalar_lea.vmem %s5071_s2, %s3794_s21  ;;  %s3603_s14 = sshll.u32 %s4988_s19, 4  ;;  %s5017_s14 = int_to_ptr.vmem [resolvable:$true] %s3603_s14 }
 0x1e5   : > { %v3107_v43 = vpop.permute.xlu1 %3106  ;;  %v3091_v20 = vpop.permute.xlu0 %3090 }
 0x1e6   : > { %v3198_v47 = vsel %vm1068_vm3, %v2670_v53, %v3091_v20 }
 0x1e7   : > { %v3203_v0 = vsel %vm3202_vm4, %v3198_v47, %v3107_v43 }
 0x1e9   : > { %v3123_v44 = vpop.permute.xlu1 %3122  ;;  %v3155_v51 = vpop.permute.xlu0 %3154 }
 0x1ea   : > { %v3208_v49 = vsel %vm3207_vm5, %v3203_v0, %v3123_v44 }
 0x1ed   : > { %v3139_v62 = vpop.permute.xlu1 %3138 }
 0x1ee   : > { %v3213_v50 = vsel %vm3212_vm6, %v3208_v49, %v3139_v62 }
 0x1ef   : > { %v3218_v54 = vsel %vm3217_vm7, %v3213_v50, %v3155_v51 }
 0x1f1   : > { %v3171_v29 = vpop.permute.xlu1 %3170 }
 0x1f2   : > { %v3223_v45 = vsel %vm3222_vm8, %v3218_v54, %v3171_v29 }
 0x1f5   : > { %v3187_v52 = vpop.permute.xlu1 %3186 }
 0x1f6   : > { %v3228_v46 = vsel %vm3227_vm9, %v3223_v45, %v3187_v52 }
 0x201   : > { %3232 = vxpose.xlu0.b32.start [1/4] (short) (narrow) %v3228_v46, 64 }
 0x205   : > { %v3109_v53 = vpop.permute.xlu0 %3108  ;;  %v3093_v55 = vpop.permute.xlu1 %3092 }
 0x206   : > { %v3199_v56 = vsel %vm1068_vm3, %v2806_v5, %v3093_v55 }
 0x207   : > { %v3204_v61 = vsel %vm3202_vm4, %v3199_v56, %v3109_v53 }
 0x209   : > { %v3141_v59 = vpop.permute.xlu0 %3140  ;;  %v3125_v60 = vpop.permute.xlu1 %3124 }
 0x20a   : > { %v3209_v15 = vsel %vm3207_vm5, %v3204_v61, %v3125_v60 }
 0x20b   : > { %v3214_v63 = vsel %vm3212_vm6, %v3209_v15, %v3141_v59 }
 0x20d   : > { %v3157_v33 = vpop.permute.xlu0 %3156  ;;  %v3189_v3 = vpop.permute.xlu1 %3188 }
 0x20e   : > { %v3219_v1 = vsel %vm3217_vm7, %v3214_v63, %v3157_v33 }
 0x211   : > { %v3173_v2 = vpop.permute.xlu0 %3172 }
 0x212   : > { %v3224_v4 = vsel %vm3222_vm8, %v3219_v1, %v3173_v2 }
 0x213   : > { %v3229_v6 = vsel %vm3227_vm9, %v3224_v4, %v3189_v3 }
 0x214   : > { %3233 = vxpose.xlu0.b32.cont [2/4] (short) (narrow) %v3229_v6, 64 }
 0x225   : > { %v3111_v57 = vpop.permute.xlu1 %3110  ;;  %v3095_v58 = vpop.permute.xlu0 %3094 }
 0x226   : > { %v3200_v7 = vsel %vm1068_vm3, %v2942_v23, %v3095_v58 }
 0x227   : > { %v3205_v9 = vsel %vm3202_vm4, %v3200_v7, %v3111_v57 }
 0x229   : > { %v3127_v5 = vpop.permute.xlu1 %3126  ;;  %v3159_v48 = vpop.permute.xlu0 %3158 }
 0x22a   : > { %v3210_v11 = vsel %vm3207_vm5, %v3205_v9, %v3127_v5 }
 0x22d   : > { %v3143_v8 = vpop.permute.xlu1 %3142 }
 0x22e   : > { %v3215_v14 = vsel %vm3212_vm6, %v3210_v11, %v3143_v8 }
 0x22f   : > { %v3220_v16 = vsel %vm3217_vm7, %v3215_v14, %v3159_v48 }
 0x231   : > { %v3175_v32 = vpop.permute.xlu1 %3174 }
 0x232   : > { %v3225_v17 = vsel %vm3222_vm8, %v3220_v16, %v3175_v32 }
 0x235   : > { %v3191_v18 = vpop.permute.xlu1 %3190 }
 0x236   : > { %v3230_v19 = vsel %vm3227_vm9, %v3225_v17, %v3191_v18 }
 0x237   : > { %3234 = vxpose.xlu0.b32.cont [3/4] (short) (narrow) %v3230_v19, 64 }
 0x245   : > { %v3097_v12 = vpop.permute.xlu0 %3096  ;;  %v3129_v22 = vpop.permute.xlu1 %3128 }
 0x246   : > { %v3201_v21 = vsel %vm1068_vm3, %v3078_v31, %v3097_v12 }
 0x249   : > { %v3113_v13 = vpop.permute.xlu0 %3112  ;;  %v3193_v35 = vpop.permute.xlu1 %3192 }
 0x24a   : > { %v3206_v24 = vsel %vm3202_vm4, %v3201_v21, %v3113_v13 }
 0x24b   : > { %v3211_v28 = vsel %vm3207_vm5, %v3206_v24, %v3129_v22 }
 0x24d   : > { %v3145_v23 = vpop.permute.xlu0 %3144 }
 0x24e   : > { %v3216_v10 = vsel %vm3212_vm6, %v3211_v28, %v3145_v23  ;;  %v3425_v28 = vld [vmem:[%s5075_s6 + $0x10] sm:$0xff] }
 0x251   : > { %v3161_v27 = vpop.permute.xlu0 %3160 }
 0x252   : > { %v3221_v30 = vsel %vm3217_vm7, %v3216_v10, %v3161_v27  ;;  %v3426_v27 = vld [vmem:[%s5075_s6 + $0x18] sm:$0xff]  ;;  %v3424_v10 = vld [vmem:[%s5075_s6 + $0x8] sm:$0xff] }
 0x253   : > { %4084 = vmatprep.subr.mxu0 %v3426_v27 }
 0x254   : > { %4085 = vmatpush3.msra.mxu0 %v3426_v27 }
 0x255   : > { %v3177_v34 = vpop.permute.xlu0 %3176  ;;  %4086 = vmatprep.subr.mxu0 %v3425_v28 }
 0x256   : > { %v3226_v36 = vsel %vm3222_vm8, %v3221_v30, %v3177_v34  ;;  %4087 = vmatpush3.msra.mxu0 %v3425_v28  ;;  %v3423_v30 = vld [vmem:[%s5075_s6] sm:$0xff] }
 0x257   : > { %v3231_v37 = vsel %vm3227_vm9, %v3226_v36, %v3193_v35  ;;  %4088 = vmatprep.subr.mxu0 %v3424_v10 }
 0x258   : > { %3235 = vxpose.xlu0.b32.end [4/4] (short) (narrow) %v3231_v37, 64  ;;  %4089 = vmatpush3.msra.mxu0 %v3424_v10 }
 0x259   : > { %4090 = vmatprep.subr.mxu0 %v3423_v30 }
 0x25a   : > { %4091 = vmatpush3.msra.mxu0 %v3423_v30 }
 0x2c8   : > { %v3248_v25 = vpop.trf.xlu0 }
 0x2c9   : > { %v3282_v26 = vsel %vm3212_vm6, %v3248_v25, 0.0 }
 0x2ca   : > { %3283 = vadd.xlane.f32.xlu1 %v3282_v26 }
 0x2cc   : > { %v3249_v31 = vpop.trf.xlu0 }
 0x2cd   : > { %v3285_v38 = vsel %vm3212_vm6, %v3249_v31, 0.0 }
 0x2ce   : > { %3286 = vadd.xlane.f32.xlu1 %v3285_v38 }
 0x2d0   : > { %v3250_v39 = vpop.trf.xlu0 }
 0x2d1   : > { %v3288_v40 = vsel %vm3212_vm6, %v3250_v39, 0.0 }
 0x2d2   : > { %3289 = vadd.xlane.f32.xlu0 %v3288_v40 }
 0x2d4   : > { %v3251_v41 = vpop.trf.xlu0 }
 0x2d5   : > { %v3291_v42 = vsel %vm3212_vm6, %v3251_v41, 0.0 }
 0x2d6   : > { %3292 = vadd.xlane.f32.xlu1 %v3291_v42 }
 0x2d8   : > { %v3252_v43 = vpop.trf.xlu0 }
 0x2d9   : > { %v3294_v44 = vsel %vm3212_vm6, %v3252_v43, 0.0 }
 0x2da   : > { %3295 = vadd.xlane.f32.xlu1 %v3294_v44 }
 0x2dc   : > { %v3253_v62 = vpop.trf.xlu0 }
 0x2dd   : > { %v3297_v20 = vsel %vm3212_vm6, %v3253_v62, 0.0 }
 0x2de   : > { %3298 = vadd.xlane.f32.xlu1 %v3297_v20  ;;  %v3798_v20 = vld [vmem:[%s4926_s24] sm:$0xff]  }
 0x2e0   : > { %v3254_v47 = vpop.trf.xlu0 }
 0x2e1   : > { %v3300_v29 = vsel %vm3212_vm6, %v3254_v47, 0.0 }
 0x2e2   : > { %3301 = vadd.xlane.f32.xlu1 %v3300_v29 }
 0x2e4   : > { %v3255_v0 = vpop.trf.xlu0 }
 0x2e5   : > { %v3303_v49 = vsel %vm3212_vm6, %v3255_v0, 0.0 }
 0x2e6   : > { %3304 = vadd.xlane.f32.xlu1 %v3303_v49 }
 0x353   : > { %v3284_v50 = vpop.xlane.xlu1 %3283 }
 0x354   : > { %v3307_v51 = vmul.f32 0.03125, %v3284_v50  ;;  %v4938_v50 = vld [vmem:[%s5074_s5] ss:$0 sm:$0xff] }
 0x356   : > { %v4870_v52 = vsub.f32 %v3248_v25, %v3307_v51 }
 0x357   : > { %v3287_v54 = vpop.xlane.xlu1 %3286 }
 0x358   : > { %v3308_v45 = vmul.f32 0.03125, %v3287_v54  ;;  %v3323_v46 = vmul.f32 %v4870_v52, %v4870_v52  ;;  %v3799_v54 = vunpack.c.l.bf16 %v3798_v20 }
 0x35a   : > { %v4874_v53 = vsub.f32 %v3249_v31, %v3308_v45  ;;  %v3331_v55 = vsel %vm3212_vm6, %v3323_v46, 0.0 }
 0x35b   : > { %3332 = vadd.xlane.f32.xlu1 %v3331_v55  ;;  %v3290_v56 = vpop.xlane.xlu0 %3289 }
 0x35c   : > { %v3309_v59 = vmul.f32 0.03125, %v3290_v56  ;;  %v3324_v60 = vmul.f32 %v4874_v53, %v4874_v53 }
 0x35e   : > { %v4879_v61 = vsub.f32 %v3250_v39, %v3309_v59  ;;  %v3334_v15 = vsel %vm3212_vm6, %v3324_v60, 0.0 }
 0x35f   : > { %v3293_v33 = vpop.xlane.xlu1 %3292  ;;  %3335 = vadd.xlane.f32.xlu1 %v3334_v15 }
 0x360   : > { %v3310_v63 = vmul.f32 0.03125, %v3293_v33  ;;  %v3325_v1 = vmul.f32 %v4879_v61, %v4879_v61 }
 0x362   : > { %v4884_v2 = vsub.f32 %v3251_v41, %v3310_v63  ;;  %v3337_v3 = vsel %vm3212_vm6, %v3325_v1, 0.0  ;;  %v3813_v1 = vld [vmem:[%s4926_s24 + $0x8] sm:$0xff]  }
 0x363   : > { %v3296_v4 = vpop.xlane.xlu1 %3295  ;;  %3338 = vadd.xlane.f32.xlu1 %v3337_v3 }
 0x364   : > { %v3311_v6 = vmul.f32 0.03125, %v3296_v4  ;;  %v3326_v57 = vmul.f32 %v4884_v2, %v4884_v2 }
 0x366   : > { %v4889_v58 = vsub.f32 %v3252_v43, %v3311_v6  ;;  %v3340_v5 = vsel %vm3212_vm6, %v3326_v57, 0.0 }
 0x367   : > { %v3299_v7 = vpop.xlane.xlu1 %3298  ;;  %3341 = vadd.xlane.f32.xlu1 %v3340_v5  ;;  %v3803_v5 = vunpack.c.l.bf16 %v3813_v1 }
 0x368   : > { %v3312_v8 = vmul.f32 0.03125, %v3299_v7  ;;  %v3327_v9 = vmul.f32 %v4889_v58, %v4889_v58 }
 0x36a   : > { %v4894_v11 = vsub.f32 %v3253_v62, %v3312_v8  ;;  %v3343_v14 = vsel %vm3212_vm6, %v3327_v9, 0.0 }
 0x36b   : > { %v3302_v32 = vpop.xlane.xlu1 %3301  ;;  %3344 = vadd.xlane.f32.xlu1 %v3343_v14 }
 0x36c   : > { %v3313_v48 = vmul.f32 0.03125, %v3302_v32  ;;  %v3328_v16 = vmul.f32 %v4894_v11, %v4894_v11 }
 0x36e   : > { %v4899_v17 = vsub.f32 %v3254_v47, %v3313_v48  ;;  %v3346_v18 = vsel %vm3212_vm6, %v3328_v16, 0.0  ;;  %v4932_v47 = vld [vmem:[%s5073_s4] ss:$0 sm:$0xff] }
 0x36f   : > { %v3305_v19 = vpop.xlane.xlu1 %3304  ;;  %3347 = vadd.xlane.f32.xlu1 %v3346_v18 }
 0x370   : > { %v3314_v12 = vmul.f32 0.03125, %v3305_v19  ;;  %v3329_v13 = vmul.f32 %v4899_v17, %v4899_v17  ;;  %v3804_v19 = vunpack.c.h.bf16 %v3813_v1 }
 0x372   : > { %v4904_v23 = vsub.f32 %v3255_v0, %v3314_v12  ;;  %v3349_v21 = vsel %vm3212_vm6, %v3329_v13, 0.0  ;;  %v3814_v13 = vld [vmem:[%s4926_s24 + $0x10] sm:$0xff]  }
 0x373   : > { %3350 = vadd.xlane.f32.xlu1 %v3349_v21  ;;  %v3807_v27 = vunpack.c.l.bf16 %v3814_v13 }
 0x374   : > { %v3330_v22 = vmul.f32 %v4904_v23, %v4904_v23 }
 0x376   : > { %v3352_v24 = vsel %vm3212_vm6, %v3330_v22, 0.0 }
 0x377   : > { %3353 = vadd.xlane.f32.xlu1 %v3352_v24 }
 0x3e4   : > { %v3333_v34 = vpop.xlane.xlu1 %3332 }
 0x3e5   : > { %v3355_v35 = vmul.f32 0.03125, %v3333_v34 }
 0x3e7   : > { %v3363_v36 = vadd.f32 1e-05, %v3355_v35  ;;  %v3808_v35 = vunpack.c.h.bf16 %v3814_v13 }
 0x3e8   : > { %v3336_v37 = vpop.xlane.xlu1 %3335 }
 0x3e9   : > { %4172 = vrsqrt.f32 %v3363_v36  ;;  %v3356_v25 = vmul.f32 0.03125, %v3336_v37 }
 0x3eb   : > { %v3364_v26 = vadd.f32 1e-05, %v3356_v25  ;;  %v3815_v25 = vld [vmem:[%s4926_s24 + $0x18] sm:$0xff]   ;;  %s4277_s24 = smov [#allocation3]  }
 0x3ec   : > { %v3339_v31 = vpop.xlane.xlu1 %3338  ;;  %s4192_s25 = sshll.u32 %s4277_s24, 4  ;;  %s4193_s25 = int_to_ptr.vmem [resolvable:$false] %s4192_s25 }
 0x3ed   : > { %4174 = vrsqrt.f32 %v3364_v26  ;;  %v3357_v38 = vmul.f32 0.03125, %v3339_v31  ;;  %s4194_s26 = scalar_lea.vmem %s4193_s25, 2048  ;;  %p4195_p1 = scmp.lt.s32.totalorder %s5017_s14, %s4193_s25 }
 0x3ef   : > { %v3365_v39 = vadd.f32 1e-05, %v3357_v38  ;;  %v3811_v38 = vunpack.c.l.bf16 %v3815_v25 }
 0x3f0   : > { %v3342_v40 = vpop.xlane.xlu1 %3341 }
 0x3f1   : > { %4176 = vrsqrt.f32 %v3365_v39  ;;  %v3358_v41 = vmul.f32 0.03125, %v3342_v40 }
 0x3f3   : > { %v3366_v42 = vadd.f32 1e-05, %v3358_v41 }
 0x3f4   : > { %v3345_v43 = vpop.xlane.xlu1 %3344 }
 0x3f5   : > { %4178 = vrsqrt.f32 %v3366_v42  ;;  %v3359_v44 = vmul.f32 0.03125, %v3345_v43  ;;  %v3812_v43 = vunpack.c.h.bf16 %v3815_v25 }
 0x3f6   : > { %v4173_v62 = vpop.eup %4172 }
 0x3f7   : > { %v3367_v29 = vadd.f32 1e-05, %v3359_v44  ;;  %v3379_v0 = vmul.f32 %v4173_v62, %v4870_v52  ;;  %v3800_v52 = vunpack.c.h.bf16 %v3798_v20 }
 0x3f8   : > { %v3348_v49 = vpop.xlane.xlu1 %3347 }
 0x3f9   : > { %4180 = vrsqrt.f32 %v3367_v29  ;;  %v3360_v51 = vmul.f32 0.03125, %v3348_v49  ;;  %v3393_v45 = vmul.f32 %v4932_v47, %v3379_v0  ;;  %v3563_v49 = vld [vmem:[%s4979_s23] sm:$0xff] }
 0x3fa   : > { %v4175_v46 = vpop.eup %4174 }
 0x3fb   : > { %v3380_v55 = vmul.f32 %v4175_v46, %v4874_v53  ;;  %v3368_v56 = vadd.f32 1e-05, %v3360_v51  ;;  %v3407_v59 = vadd.f32 %v4938_v50, %v3393_v45  ;;  %v3566_v46 = vld [vmem:[%s4979_s23 + $0x18] sm:$0xff] }
 0x3fc   : > { %v3351_v60 = vpop.xlane.xlu1 %3350 }
 0x3fd   : > { %4182 = vrsqrt.f32 %v3368_v56  ;;  %v3361_v15 = vmul.f32 0.03125, %v3351_v60  ;;  %v3415_v33 = vmul.f32 %v3799_v54, %v3407_v59  ;;  %v3394_v63 = vmul.f32 %v4932_v47, %v3380_v55  ;;  %v3565_v59 = vld [vmem:[%s4979_s23 + $0x10] sm:$0xff] }
 0x3fe   : > { %v4177_v3 = vpop.eup %4176 }
 0x3ff   : > { %v3369_v4 = vadd.f32 1e-05, %v3361_v15  ;;  %4092 = vmatprep.mubr.msk.f32.mxu0 %vm3212_vm6, %v3415_v33  ;;  %v3408_v6 = vadd.f32 %v4938_v50, %v3394_v63  ;;  %v3381_v57 = vmul.f32 %v4177_v3, %v4879_v61  ;;  %v3568_v63 = vld [vmem:[%s4979_s23 + $0x28] sm:$0xff] }
 0x400   : > { %v3354_v53 = vpop.xlane.xlu1 %3353 }
 0x401   : > { %4184 = vrsqrt.f32 %v3369_v4  ;;  %v3362_v7 = vmul.f32 0.03125, %v3354_v53  ;;  %v3416_v8 = vmul.f32 %v3800_v52, %v3408_v6  ;;  %v3395_v9 = vmul.f32 %v4932_v47, %v3381_v57  ;;  %v3567_v4 = vld [vmem:[%s4979_s23 + $0x20] sm:$0xff] }
 0x402   : > { %v4179_v14 = vpop.eup %4178 }
 0x403   : > { %v3370_v32 = vadd.f32 1e-05, %v3362_v7  ;;  %4093 = vmatmul.mubr.msk.f32.vlgmr.msra.gmra.mxu0 %vm3212_vm6, %v3416_v8  ;;  %v3409_v48 = vadd.f32 %v4938_v50, %v3395_v9  ;;  %v3382_v16 = vmul.f32 %v4179_v14, %v4884_v2  ;;  %v3570_v7 = vld [vmem:[%s4979_s23 + $0x38] sm:$0xff]  ;;  %v3569_v14 = vld [vmem:[%s4979_s23 + $0x30] sm:$0xff] }
 0x405   : > { %4186 = vrsqrt.f32 %v3370_v32  ;;  %v3417_v18 = vmul.f32 %v3803_v5, %v3409_v48  ;;  %v3396_v61 = vmul.f32 %v4932_v47, %v3382_v16 }
 0x406   : > { %v4181_v12 = vpop.eup %4180 }
 0x407   : > { %4095 = vmatprep.mubr.msk.f32.mxu0 %vm3212_vm6, %v3417_v18  ;;  %v3410_v21 = vadd.f32 %v4938_v50, %v3396_v61  ;;  %v3383_v22 = vmul.f32 %v4181_v12, %v4889_v58 }
 0x409   : > { %v3418_v24 = vmul.f32 %v3804_v19, %v3410_v21  ;;  %v3397_v28 = vmul.f32 %v4932_v47, %v3383_v22 }
 0x40a   : > { %v4183_v10 = vpop.eup %4182 }
 0x40b   : > { %4096 = vmatmul.mubr.msk.f32.gmra.mxu0 %vm3212_vm6, %v3418_v24  ;;  %v3411_v2 = vadd.f32 %v4938_v50, %v3397_v28  ;;  %v3384_v30 = vmul.f32 %v4183_v10, %v4894_v11 }
 0x40d   : > { %v3419_v34 = vmul.f32 %v3807_v27, %v3411_v2  ;;  %v3398_v36 = vmul.f32 %v4932_v47, %v3384_v30 }
 0x40e   : > { %v4185_v37 = vpop.eup %4184 }
 0x40f   : > { %4098 = vmatprep.mubr.msk.f32.mxu0 %vm3212_vm6, %v3419_v34  ;;  %v3412_v58 = vadd.f32 %v4938_v50, %v3398_v36  ;;  %v3385_v26 = vmul.f32 %v4185_v37, %v4899_v17 }
 0x411   : > { %v3420_v31 = vmul.f32 %v3808_v35, %v3412_v58  ;;  %v3399_v39 = vmul.f32 %v4932_v47, %v3385_v26 }
 0x412   : > { %v4187_v11 = vpop.eup %4186 }
 0x413   : > { %4099 = vmatmul.mubr.msk.f32.gmra.mxu0 %vm3212_vm6, %v3420_v31  ;;  %v3413_v40 = vadd.f32 %v4938_v50, %v3399_v39  ;;  %v3386_v41 = vmul.f32 %v4187_v11, %v4904_v23  ;;  %v3778_v23 = vld [vmem:[%s5076_s7] ss:$0 sm:$0xff] }
 0x415   : > { %v3421_v42 = vmul.f32 %v3811_v38, %v3413_v40  ;;  %v3400_v44 = vmul.f32 %v4932_v47, %v3386_v41  ;;  %v3564_v47 = vld [vmem:[%s4979_s23 + $0x8] sm:$0xff]  ;;  %s4188_s23 = scalar_lea.vmem %s5017_s14, 1024 }
 0x416   : > { %p4189_p12 = scmp.ne.s32.totalorder %s5017_s14, %s4188_s23  ;;  %p4196_p2 = scmp.lt.s32.totalorder %s4194_s26, %s4188_s23 }
 0x417   : > { %4101 = vmatprep.mubr.msk.f32.mxu0 %vm3212_vm6, %v3421_v42  ;;  %v3414_v17 = vadd.f32 %v4938_v50, %v3400_v44 }
 0x418   : > { %p4190_p13 = pnand %p4189_p12, %p4364_p4  ;;  %p4197_p3 = por %p4196_p2, %p4195_p1 }
 0x419   : > { %v3422_v62 = vmul.f32 %v3812_v43, %v3414_v17 }
 0x41a   : > { %p4191_p0 = pneg %p4190_p13 }
 0x41b   : > { %4102 = vmatmul.mubr.msk.f32.gmra.mxu0 %vm3212_vm6, %v3422_v62 }
 0x41c   : > { %p4198_p5 = pnand %p4197_p3, %p4191_p0 }
 0x4c3   : > { %v4094_v20 = vpop.f32.mrf.mxu0 }
 0x4c4   : > { %v3530_v29 = vadd.f32 %v4094_v20, %v3778_v23 }
 0x4c5   : > { %v3524_v0 = vpop.f32.mrf.mxu0 }
 0x4c6   : > { %v3572_v50 = vadd.f32 %v3564_v47, %v3530_v29  ;;  %v3525_v51 = vadd.f32 %v3778_v23, %v3524_v0 }
 0x4c8   : > { %3580 = vst.msk [vmem:[%s4988_s19 + $0x8] sm:$0xff] %vm3212_vm6, %v3572_v50  ;;  %v3571_v54 = vadd.f32 %v3563_v49, %v3525_v51 }
 0x4ca   : > { %3579 = vst.msk [vmem:[%s4988_s19] sm:$0xff] %vm3212_vm6, %v3571_v54 }
 0x4cb   : > { %v4097_v45 = vpop.f32.mrf.mxu0 }
 0x4cc   : > { %v3540_v55 = vadd.f32 %v4097_v45, %v3778_v23 }
 0x4cd   : > { %v3534_v56 = vpop.f32.mrf.mxu0 }
 0x4ce   : > { %v3574_v60 = vadd.f32 %v3566_v46, %v3540_v55  ;;  %v3535_v52 = vadd.f32 %v3778_v23, %v3534_v56 }
 0x4d0   : > { %3582 = vst.msk [vmem:[%s4988_s19 + $0x18] sm:$0xff] %vm3212_vm6, %v3574_v60  ;;  %v3573_v15 = vadd.f32 %v3565_v59, %v3535_v52 }
 0x4d2   : > { %3581 = vst.msk [vmem:[%s4988_s19 + $0x10] sm:$0xff] %vm3212_vm6, %v3573_v15 }
 0x4d3   : > { %v4100_v33 = vpop.f32.mrf.mxu0 }
 0x4d4   : > { %v3550_v1 = vadd.f32 %v4100_v33, %v3778_v23 }
 0x4d5   : > { %v3544_v3 = vpop.f32.mrf.mxu0 }
 0x4d6   : > { %v3576_v6 = vadd.f32 %v3568_v63, %v3550_v1  ;;  %v3545_v57 = vadd.f32 %v3778_v23, %v3544_v3 }
 0x4d8   : > { %3584 = vst.msk [vmem:[%s4988_s19 + $0x28] sm:$0xff] %vm3212_vm6, %v3576_v6  ;;  %v3575_v53 = vadd.f32 %v3567_v4, %v3545_v57 }
 0x4da   : > { %3583 = vst.msk [vmem:[%s4988_s19 + $0x20] sm:$0xff] %vm3212_vm6, %v3575_v53 }
 0x4db   : > { %v4103_v5 = vpop.f32.mrf.mxu0 }
 0x4dc   : > { %v3560_v8 = vadd.f32 %v4103_v5, %v3778_v23 }
 0x4dd   : > { %v3554_v9 = vpop.f32.mrf.mxu0 }
 0x4de   : > { %v3578_v32 = vadd.f32 %v3570_v7, %v3560_v8  ;;  %v3555_v48 = vadd.f32 %v3778_v23, %v3554_v9 }
 0x4e0   : > { %3586 = vst.msk [vmem:[%s4988_s19 + $0x38] sm:$0xff] %vm3212_vm6, %v3578_v32  ;;  %v3577_v16 = vadd.f32 %v3569_v14, %v3555_v48 }
 0x4e2   : > { %3585 = vst.msk [vmem:[%s4988_s19 + $0x30] sm:$0xff] %vm3212_vm6, %v3577_v16 }
 0x4e3   : > { %4201 = shalt.err (!%p4198_p5)
}
 0x4e4   : > { %s4202_s20 = scalar_lea.hbm %s5013_s22, 1024  ;;  %s4206_s16 = scalar_lea.hbm %s5077_s8, 2048 }
 0x4e5   : > { %p4203_p6 = scmp.ne.s32.totalorder %s5013_s22, %s4202_s20  ;;  %p4207_p10 = scmp.lt.s32.totalorder %s5013_s22, %s5077_s8 }
 0x4e6   : > { %p4208_p11 = scmp.lt.s32.totalorder %s4206_s16, %s4202_s20 }
 0x4e7   : > { %p4204_p7 = pnand %p4203_p6, %p4364_p4 }
 0x4e8   : > { %p4209_p12 = por %p4208_p11, %p4207_p10 }
 0x4e9   : > { %p4205_p9 = pneg %p4204_p7 }
 0x4eb   : > { %p4210_p13 = pnand %p4209_p12, %p4205_p9 }
 0x4ed   : > { %4213 = shalt.err (!%p4210_p13)
}
 0x4ee   : > { %s4278_s23 = smov 128  }
 0x4ef   : > { %4104 = dma.vmem_to_hbm [thread:$0]  (%p4364_p4), %s5017_s14, 1024, %s5013_s22, %s5023_s30, %s4278_s23, %s4278_s23, %s4271_s12  }
 0x4f0 PF: > { %p4110_p0 = scmp.ge.s32.totalorder %s4264_s10, 2  ;;  %s3618_s25 = sand.u32 1, %s4244_s27  }
 0x4f1   : > { %s3619_s26 = scalar_lea.sflag [#allocation4], %s3618_s25 }
 0x4f2   : > { %p4107_p1 = pnand %p4110_p0, %p4371_p8 }
 0x4f4   : > { %p4108_p2 = pneg %p4107_p1 }
 0x4f6   : > { %4239 = dma.done.wait (%p4108_p2), %s3619_s26, 1024  }
 0x4f7   : > { %4241 = vsyncadd (%p4108_p2), %s3619_s26, 4294966272  ;;  %s21_s10 = sadd.s32 1, %s4264_s10   ;;  %s5080_s27 = smov %s4248_s28 }
 0x4f8   : > { %p18_p3 = scmp.ge.s32.totalorder %s21_s10, 4   ;;  %s5081_s28 = smov %s4252_s29 }
 0x4f9   : > { %s5082_s29 = smov %s4377_s18  ;;  %s5083_s30 = smov %s4260_s9 }
 0x4fa   : > { %s5084_s9 = smov %s5086_s13  ;;  %20 = sbr.rel (!%p18_p3) target bundleno = 4 (0x4), region = 100 }
 0x4ff   :  { %3624 = vsyncpa [#allocation4], 1 }
 0x500   :  { %3626 = vsyncpa [#allocation4 + $0x1], 1 }

</bundles_post_ra>
